<compile_context>
chip_gen: v6e
topology: v6e:2x2x1
jax: 0.10.0
libtpu: 0.0.40
codegen_flags: <defaults>
</compile_context>

<pallas_src>
import functools
import math

import jax
import jax.numpy as jnp
from jax.experimental import pallas as pl
from jax.experimental.pallas import tpu as pltpu


_WKEYS = ("w1t", "w2t", "wu1xt", "wu1vt", "bu1", "wu2xt", "wu2gt", "bu2x", "bu2g")


# ----------------------------------------------------------------------------
# One GatedEquivariantBlock on a VMEM-resident tile.
#   x: (T, H)      scalar features
#   v: (3, T, H)   vector features, component-major
#   w: dict of pre-transposed / pre-split weights (see _prep_params)
# ----------------------------------------------------------------------------
def _geb_tile(x, v, w, scalar_activation):
    T, H = x.shape
    O = w["w2t"].shape[-1]

    # Batch the 3 vector components into a single (3T, H) slab: 2 big MXU
    # matmuls instead of 6 tiny ones, RHS weight push amortized.
    vflat = v.reshape(3 * T, H)
    p1 = jnp.dot(vflat, w["w1t"], preferred_element_type=jnp.float32)        # (3T, H)
    vec2 = jnp.dot(vflat, w["w2t"], preferred_element_type=jnp.float32)      # (3T, O)

    # ||vec1_proj(v)||_2 over the 3 vector components (leading-axis reduction
    # -> plain VPU adds, no cross-lane work).
    p1 = p1.reshape(3, T, H)
    vec1 = jnp.sqrt(jnp.sum(p1 * p1, axis=0))                                # (T, H)

    # update_net[0] on concat([x, vec1]) WITHOUT a lane-axis concat: Wu1 was
    # split on the host into an x-part and a vec1-part (two accumulating dots).
    h = (jnp.dot(x, w["wu1xt"], preferred_element_type=jnp.float32)
         + jnp.dot(vec1, w["wu1vt"], preferred_element_type=jnp.float32)
         + w["bu1"])
    h = h * jax.nn.sigmoid(h)                                                # SiLU

    # update_net[2]: Wu2 split on the host into scalar-output / gate halves,
    # avoiding a lane-axis split of the (T, 2O) result.
    x_new = jnp.dot(h, w["wu2xt"], preferred_element_type=jnp.float32) + w["bu2x"]
    gate = jnp.dot(h, w["wu2gt"], preferred_element_type=jnp.float32) + w["bu2g"]

    if scalar_activation:
        x_new = x_new * jax.nn.sigmoid(x_new)

    v_new = gate[None, :, :] * vec2.reshape(3, T, O)                         # (3, T, O)
    return x_new, v_new


def _fused_kernel(x_ref, v_ref, *refs):
    # refs = 9 block-1 weight refs, 9 block-2 weight refs, x_out_ref, v_out_ref
    w1 = {k: r[...] for k, r in zip(_WKEYS, refs[0:9])}
    w2 = {k: r[...] for k, r in zip(_WKEYS, refs[9:18])}
    x_out_ref, v_out_ref = refs[18], refs[19]

    x = x_ref[...]          # (T, H)
    v = v_ref[...]          # (3, T, H)

    x, v = _geb_tile(x, v, w1, scalar_activation=True)
    x, v = _geb_tile(x, v, w2, scalar_activation=False)

    x_out_ref[...] = x.astype(x_out_ref.dtype)
    v_out_ref[...] = v.astype(v_out_ref.dtype)


# ----------------------------------------------------------------------------
# Host-side weight prep: transpose + split once, outside the hot loop.
# PyTorch layout in, kernel layout out.
# ----------------------------------------------------------------------------
def _prep_params(p):
    H = p["w1"].shape[0]
    O = p["w2"].shape[0]
    return {
        "w1t": p["w1"].T,                 # (H, H)
        "w2t": p["w2"].T,                 # (H, O)
        "wu1xt": p["wu1"][:, :H].T,       # (H, I)  acts on x
        "wu1vt": p["wu1"][:, H:].T,       # (H, I)  acts on vec1
        "bu1": p["bu1"],                  # (1, I)
        "wu2xt": p["wu2"][:O, :].T,       # (I, O)  -> scalar output half
        "wu2gt": p["wu2"][O:, :].T,       # (I, O)  -> gate half
        "bu2x": p["bu2"][:, :O],          # (1, O)
        "bu2g": p["bu2"][:, O:],          # (1, O)
    }


@functools.partial(jax.jit, static_argnames=("tile_n",))
def equivariant_scalar(x, v, params1, params2, *, tile_n=2048):
    """EquivariantScalar.forward: two fused gated blocks, then x + v.sum() * 0."""
    N, H = x.shape
    O2 = params2["w2"].shape[0]

    # Component-major vector layout: (N, 3, H) -> (3, N, H), dense per-component slabs.
    v_cm = jnp.transpose(v, (1, 0, 2))

    p1 = _prep_params(params1)
    p2 = _prep_params(params2)

    # Tile over N; weights stay VMEM-resident across the whole grid.
    # tile_n is a multiple of 8; tiles are small (H is tiny) so even 2048 rows
    # double-buffered is ~2 MiB, well within v7x's 32 MiB scoped VMEM.
    tn = N if N <= tile_n else tile_n
    grid = (pl.cdiv(N, tn),)

    def xmap(i):
        return (i, 0)

    def vmap_(i):
        return (0, i, 0)

    def wmap(i):
        return (0, 0)

    w_specs = ([pl.BlockSpec(p1[k].shape, wmap) for k in _WKEYS]
               + [pl.BlockSpec(p2[k].shape, wmap) for k in _WKEYS])

    x_out, v_out = pl.pallas_call(
        _fused_kernel,
        out_shape=(
            jax.ShapeDtypeStruct((N, O2), jnp.float32),
            jax.ShapeDtypeStruct((3, N, O2), jnp.float32),
        ),
        grid=grid,
        in_specs=[pl.BlockSpec((tn, H), xmap),
                  pl.BlockSpec((3, tn, H), vmap_)] + w_specs,
        out_specs=(pl.BlockSpec((tn, O2), xmap),
                   pl.BlockSpec((3, tn, O2), vmap_)),
        compiler_params=pltpu.CompilerParams(
            dimension_semantics=("parallel",)),
    )(x, v_cm, *[p1[k] for k in _WKEYS], *[p2[k] for k in _WKEYS])

    # Matches PyTorch `x + v.sum() * 0` (keeps NaN/Inf propagation semantics).
    # v_out is only (3, N, 1) so this is essentially free.
    return x_out + jnp.sum(v_out) * 0.0


# ----------------------------------------------------------------------------
# Parameter init (mirrors reset_parameters: xavier_uniform weights, zero biases).
# ----------------------------------------------------------------------------
def _xavier_uniform(key, out_f, in_f):
    bound = math.sqrt(6.0 / (in_f + out_f))
    return jax.random.uniform(key, (out_f, in_f), jnp.float32, -bound, bound)


def init_geb_params(key, hidden_channels, out_channels, intermediate_channels=None):
    if intermediate_channels is None:
        intermediate_channels = hidden_channels
    k1, k2, k3, k4 = jax.random.split(key, 4)
    return {
        "w1": _xavier_uniform(k1, hidden_channels, hidden_channels),
        "w2": _xavier_uniform(k2, out_channels, hidden_channels),
        "wu1": _xavier_uniform(k3, intermediate_channels, 2 * hidden_channels),
        "bu1": jnp.zeros((1, intermediate_channels), jnp.float32),
        "wu2": _xavier_uniform(k4, 2 * out_channels, intermediate_channels),
        "bu2": jnp.zeros((1, 2 * out_channels), jnp.float32),
    }


# ----------------------------------------------------------------------------
# Pure-JAX reference (mirrors the PyTorch forward) for a correctness check.
# ----------------------------------------------------------------------------
def _geb_ref(x, v, p, scalar_activation):
    vec1 = jnp.sqrt(jnp.sum((v @ p["w1"].T) ** 2, axis=-2))   # (N, H)
    vec2 = v @ p["w2"].T                                      # (N, 3, O)
    xc = jnp.concatenate([x, vec1], axis=-1)
    h = xc @ p["wu1"].T + p["bu1"]
    h = h * jax.nn.sigmoid(h)
    o = h @ p["wu2"].T + p["bu2"]
    O = p["w2"].shape[0]
    x_new, gate = o[:, :O], o[:, O:]
    v_new = gate[:, None, :] * vec2
    if scalar_activation:
        x_new = x_new * jax.nn.sigmoid(x_new)
    return x_new, v_new


def equivariant_scalar_ref(x, v, params1, params2):
    x, v = _geb_ref(x, v, params1, scalar_activation=True)
    x, v = _geb_ref(x, v, params2, scalar_activation=False)
    return x + jnp.sum(v) * 0.0


if __name__ == "__main__":
    key = jax.random.PRNGKey(0)
    kx, kv, kp1, kp2 = jax.random.split(key, 4)

    N = 256          # number of nodes (small here; kernel tiles so it scales)
    H = 32           # hidden_channels

    x = jax.random.normal(kx, (N, H), jnp.float32)
    v = jax.random.normal(kv, (N, 3, H), jnp.float32)

    # EquivariantScalar(hidden_channels=H):
    #   block 1: GatedEquivariantBlock(H, H // 2, scalar_activation=True)
    #   block 2: GatedEquivariantBlock(H // 2, 1, scalar_activation=False)
    params1 = init_geb_params(kp1, H, H // 2)
    params2 = init_geb_params(kp2, H // 2, 1)

    out = equivariant_scalar(x, v, params1, params2, tile_n=128)   # grid=(2,)
    out = jax.block_until_ready(out)
    assert out.shape == (N, 1)

    ref = equivariant_scalar_ref(x, v, params1, params2)
    err = float(jnp.max(jnp.abs(out - ref)))
    assert err < 5e-2, f"max abs err {err}"

    print("KERNEL_OK")
</pallas_src>

<mosaic_0001>
module attributes {stable_mosaic.version = 11 : i64} {
  func.func @_fused_kernel(%arg0: i32, %arg1: memref<128x32xf32, #tpu.memory_space<vmem>>, %arg2: memref<3x128x32xf32, #tpu.memory_space<vmem>>, %arg3: memref<32x32xf32, #tpu.memory_space<vmem>>, %arg4: memref<32x16xf32, #tpu.memory_space<vmem>>, %arg5: memref<32x32xf32, #tpu.memory_space<vmem>>, %arg6: memref<32x32xf32, #tpu.memory_space<vmem>>, %arg7: memref<1x32xf32, #tpu.memory_space<vmem>>, %arg8: memref<32x16xf32, #tpu.memory_space<vmem>>, %arg9: memref<32x16xf32, #tpu.memory_space<vmem>>, %arg10: memref<1x16xf32, #tpu.memory_space<vmem>>, %arg11: memref<1x16xf32, #tpu.memory_space<vmem>>, %arg12: memref<16x16xf32, #tpu.memory_space<vmem>>, %arg13: memref<16x1xf32, #tpu.memory_space<vmem>>, %arg14: memref<16x16xf32, #tpu.memory_space<vmem>>, %arg15: memref<16x16xf32, #tpu.memory_space<vmem>>, %arg16: memref<1x16xf32, #tpu.memory_space<vmem>>, %arg17: memref<16x1xf32, #tpu.memory_space<vmem>>, %arg18: memref<16x1xf32, #tpu.memory_space<vmem>>, %arg19: memref<1x1xf32, #tpu.memory_space<vmem>>, %arg20: memref<1x1xf32, #tpu.memory_space<vmem>>, %arg21: memref<128x1xf32, #tpu.memory_space<vmem>>, %arg22: memref<3x128x1xf32, #tpu.memory_space<vmem>>) attributes {dimension_semantics = [#tpu.dimension_semantics<parallel>], iteration_bounds = array<i64: 2>, scalar_prefetch = 0 : i64, scratch_operands = 0 : i64, tpu.core_type = #tpu.core_type<tc>, window_params = [{transform_indices = @transform_0, window_bounds = array<i64: 128, 32>}, {transform_indices = @transform_1, window_bounds = array<i64: 3, 128, 32>}, {pipeline_mode = #tpu.pipeline_mode<synchronous>, transform_indices = @transform_2, window_bounds = array<i64: 32, 32>}, {pipeline_mode = #tpu.pipeline_mode<synchronous>, transform_indices = @transform_3, window_bounds = array<i64: 32, 16>}, {pipeline_mode = #tpu.pipeline_mode<synchronous>, transform_indices = @transform_4, window_bounds = array<i64: 32, 32>}, {pipeline_mode = #tpu.pipeline_mode<synchronous>, transform_indices = @transform_5, window_bounds = array<i64: 32, 32>}, {pipeline_mode = #tpu.pipeline_mode<synchronous>, transform_indices = @transform_6, window_bounds = array<i64: 1, 32>}, {pipeline_mode = #tpu.pipeline_mode<synchronous>, transform_indices = @transform_7, window_bounds = array<i64: 32, 16>}, {pipeline_mode = #tpu.pipeline_mode<synchronous>, transform_indices = @transform_8, window_bounds = array<i64: 32, 16>}, {pipeline_mode = #tpu.pipeline_mode<synchronous>, transform_indices = @transform_9, window_bounds = array<i64: 1, 16>}, {pipeline_mode = #tpu.pipeline_mode<synchronous>, transform_indices = @transform_10, window_bounds = array<i64: 1, 16>}, {pipeline_mode = #tpu.pipeline_mode<synchronous>, transform_indices = @transform_11, window_bounds = array<i64: 16, 16>}, {pipeline_mode = #tpu.pipeline_mode<synchronous>, transform_indices = @transform_12, window_bounds = array<i64: 16, 1>}, {pipeline_mode = #tpu.pipeline_mode<synchronous>, transform_indices = @transform_13, window_bounds = array<i64: 16, 16>}, {pipeline_mode = #tpu.pipeline_mode<synchronous>, transform_indices = @transform_14, window_bounds = array<i64: 16, 16>}, {pipeline_mode = #tpu.pipeline_mode<synchronous>, transform_indices = @transform_15, window_bounds = array<i64: 1, 16>}, {pipeline_mode = #tpu.pipeline_mode<synchronous>, transform_indices = @transform_16, window_bounds = array<i64: 16, 1>}, {pipeline_mode = #tpu.pipeline_mode<synchronous>, transform_indices = @transform_17, window_bounds = array<i64: 16, 1>}, {pipeline_mode = #tpu.pipeline_mode<synchronous>, transform_indices = @transform_18, window_bounds = array<i64: 1, 1>}, {pipeline_mode = #tpu.pipeline_mode<synchronous>, transform_indices = @transform_19, window_bounds = array<i64: 1, 1>}, {transform_indices = @transform_20, window_bounds = array<i64: 128, 1>}, {transform_indices = @transform_21, window_bounds = array<i64: 3, 128, 1>}]} {
    %c0 = arith.constant 0 : index
    %c0_0 = arith.constant 0 : index
    %0 = vector.load %arg3[%c0, %c0_0] : memref<32x32xf32, #tpu.memory_space<vmem>>, vector<32x32xf32>
    %c0_1 = arith.constant 0 : index
    %c0_2 = arith.constant 0 : index
    %1 = vector.load %arg4[%c0_1, %c0_2] : memref<32x16xf32, #tpu.memory_space<vmem>>, vector<32x16xf32>
    %c0_3 = arith.constant 0 : index
    %c0_4 = arith.constant 0 : index
    %2 = vector.load %arg5[%c0_3, %c0_4] : memref<32x32xf32, #tpu.memory_space<vmem>>, vector<32x32xf32>
    %c0_5 = arith.constant 0 : index
    %c0_6 = arith.constant 0 : index
    %3 = vector.load %arg6[%c0_5, %c0_6] : memref<32x32xf32, #tpu.memory_space<vmem>>, vector<32x32xf32>
    %c0_7 = arith.constant 0 : index
    %c0_8 = arith.constant 0 : index
    %4 = vector.load %arg7[%c0_7, %c0_8] : memref<1x32xf32, #tpu.memory_space<vmem>>, vector<1x32xf32>
    %c0_9 = arith.constant 0 : index
    %c0_10 = arith.constant 0 : index
    %5 = vector.load %arg8[%c0_9, %c0_10] : memref<32x16xf32, #tpu.memory_space<vmem>>, vector<32x16xf32>
    %c0_11 = arith.constant 0 : index
    %c0_12 = arith.constant 0 : index
    %6 = vector.load %arg9[%c0_11, %c0_12] : memref<32x16xf32, #tpu.memory_space<vmem>>, vector<32x16xf32>
    %c0_13 = arith.constant 0 : index
    %c0_14 = arith.constant 0 : index
    %7 = vector.load %arg10[%c0_13, %c0_14] : memref<1x16xf32, #tpu.memory_space<vmem>>, vector<1x16xf32>
    %c0_15 = arith.constant 0 : index
    %c0_16 = arith.constant 0 : index
    %8 = vector.load %arg11[%c0_15, %c0_16] : memref<1x16xf32, #tpu.memory_space<vmem>>, vector<1x16xf32>
    %c0_17 = arith.constant 0 : index
    %c0_18 = arith.constant 0 : index
    %9 = vector.load %arg12[%c0_17, %c0_18] : memref<16x16xf32, #tpu.memory_space<vmem>>, vector<16x16xf32>
    %c0_19 = arith.constant 0 : index
    %c0_20 = arith.constant 0 : index
    %10 = vector.load %arg13[%c0_19, %c0_20] : memref<16x1xf32, #tpu.memory_space<vmem>>, vector<16x1xf32>
    %c0_21 = arith.constant 0 : index
    %c0_22 = arith.constant 0 : index
    %11 = vector.load %arg14[%c0_21, %c0_22] : memref<16x16xf32, #tpu.memory_space<vmem>>, vector<16x16xf32>
    %c0_23 = arith.constant 0 : index
    %c0_24 = arith.constant 0 : index
    %12 = vector.load %arg15[%c0_23, %c0_24] : memref<16x16xf32, #tpu.memory_space<vmem>>, vector<16x16xf32>
    %c0_25 = arith.constant 0 : index
    %c0_26 = arith.constant 0 : index
    %13 = vector.load %arg16[%c0_25, %c0_26] : memref<1x16xf32, #tpu.memory_space<vmem>>, vector<1x16xf32>
    %c0_27 = arith.constant 0 : index
    %c0_28 = arith.constant 0 : index
    %14 = vector.load %arg17[%c0_27, %c0_28] : memref<16x1xf32, #tpu.memory_space<vmem>>, vector<16x1xf32>
    %c0_29 = arith.constant 0 : index
    %c0_30 = arith.constant 0 : index
    %15 = vector.load %arg18[%c0_29, %c0_30] : memref<16x1xf32, #tpu.memory_space<vmem>>, vector<16x1xf32>
    %c0_31 = arith.constant 0 : index
    %c0_32 = arith.constant 0 : index
    %16 = vector.load %arg19[%c0_31, %c0_32] : memref<1x1xf32, #tpu.memory_space<vmem>>, vector<1x1xf32>
    %c0_33 = arith.constant 0 : index
    %c0_34 = arith.constant 0 : index
    %17 = vector.load %arg20[%c0_33, %c0_34] : memref<1x1xf32, #tpu.memory_space<vmem>>, vector<1x1xf32>
    %c0_35 = arith.constant 0 : index
    %c0_36 = arith.constant 0 : index
    %18 = vector.load %arg1[%c0_35, %c0_36] : memref<128x32xf32, #tpu.memory_space<vmem>>, vector<128x32xf32>
    %c0_37 = arith.constant 0 : index
    %c0_38 = arith.constant 0 : index
    %c0_39 = arith.constant 0 : index
    %19 = vector.load %arg2[%c0_37, %c0_38, %c0_39] : memref<3x128x32xf32, #tpu.memory_space<vmem>>, vector<3x128x32xf32>
    %20 = vector.shape_cast %19 : vector<3x128x32xf32> to vector<384x32xf32>
    %cst = arith.constant dense<0.000000e+00> : vector<384x32xf32>
    %21 = tpu.matmul %20, %0, %cst {dimension_numbers = #tpu.dot_dimension_numbers<[1], [0], [0], [1], [0, 0, 1, 1], [], []>} : vector<384x32xf32>, vector<32x32xf32>, vector<384x32xf32> -> vector<384x32xf32>
    %cst_40 = arith.constant dense<0.000000e+00> : vector<384x16xf32>
    %22 = tpu.matmul %20, %1, %cst_40 {dimension_numbers = #tpu.dot_dimension_numbers<[1], [0], [0], [1], [0, 0, 1, 1], [], []>} : vector<384x32xf32>, vector<32x16xf32>, vector<384x16xf32> -> vector<384x16xf32>
    %23 = vector.shape_cast %21 : vector<384x32xf32> to vector<3x128x32xf32>
    %24 = arith.mulf %23, %23 : vector<3x128x32xf32>
    %cst_41 = arith.constant dense<0.000000e+00> : vector<128x32xf32>
    %25 = vector.multi_reduction <add>, %24, %cst_41 [0] : vector<3x128x32xf32> to vector<128x32xf32>
    %26 = math.sqrt %25 : vector<128x32xf32>
    %cst_42 = arith.constant dense<0.000000e+00> : vector<128x32xf32>
    %27 = tpu.matmul %18, %2, %cst_42 {dimension_numbers = #tpu.dot_dimension_numbers<[1], [0], [0], [1], [0, 0, 1, 1], [], []>} : vector<128x32xf32>, vector<32x32xf32>, vector<128x32xf32> -> vector<128x32xf32>
    %cst_43 = arith.constant dense<0.000000e+00> : vector<128x32xf32>
    %28 = tpu.matmul %26, %3, %cst_43 {dimension_numbers = #tpu.dot_dimension_numbers<[1], [0], [0], [1], [0, 0, 1, 1], [], []>} : vector<128x32xf32>, vector<32x32xf32>, vector<128x32xf32> -> vector<128x32xf32>
    %29 = arith.addf %27, %28 : vector<128x32xf32>
    %30 = vector.broadcast %4 : vector<1x32xf32> to vector<128x32xf32>
    %31 = arith.addf %29, %30 : vector<128x32xf32>
    %32 = arith.negf %31 : vector<128x32xf32>
    %33 = math.exp %32 : vector<128x32xf32>
    %cst_44 = arith.constant 1.000000e+00 : f32
    %34 = vector.broadcast %cst_44 : f32 to vector<128x32xf32>
    %35 = arith.addf %34, %33 : vector<128x32xf32>
    %36 = arith.divf %34, %35 : vector<128x32xf32>
    %37 = arith.mulf %31, %36 : vector<128x32xf32>
    %cst_45 = arith.constant dense<0.000000e+00> : vector<128x16xf32>
    %38 = tpu.matmul %37, %5, %cst_45 {dimension_numbers = #tpu.dot_dimension_numbers<[1], [0], [0], [1], [0, 0, 1, 1], [], []>} : vector<128x32xf32>, vector<32x16xf32>, vector<128x16xf32> -> vector<128x16xf32>
    %39 = vector.broadcast %7 : vector<1x16xf32> to vector<128x16xf32>
    %40 = arith.addf %38, %39 : vector<128x16xf32>
    %cst_46 = arith.constant dense<0.000000e+00> : vector<128x16xf32>
    %41 = tpu.matmul %37, %6, %cst_46 {dimension_numbers = #tpu.dot_dimension_numbers<[1], [0], [0], [1], [0, 0, 1, 1], [], []>} : vector<128x32xf32>, vector<32x16xf32>, vector<128x16xf32> -> vector<128x16xf32>
    %42 = vector.broadcast %8 : vector<1x16xf32> to vector<128x16xf32>
    %43 = arith.addf %41, %42 : vector<128x16xf32>
    %44 = arith.negf %40 : vector<128x16xf32>
    %45 = math.exp %44 : vector<128x16xf32>
    %cst_47 = arith.constant 1.000000e+00 : f32
    %46 = vector.broadcast %cst_47 : f32 to vector<128x16xf32>
    %47 = arith.addf %46, %45 : vector<128x16xf32>
    %48 = arith.divf %46, %47 : vector<128x16xf32>
    %49 = arith.mulf %40, %48 : vector<128x16xf32>
    %50 = vector.shape_cast %43 : vector<128x16xf32> to vector<1x128x16xf32>
    %51 = vector.shape_cast %22 : vector<384x16xf32> to vector<3x128x16xf32>
    %52 = vector.broadcast %50 : vector<1x128x16xf32> to vector<3x128x16xf32>
    %53 = arith.mulf %52, %51 : vector<3x128x16xf32>
    %54 = vector.shape_cast %53 : vector<3x128x16xf32> to vector<384x16xf32>
    %cst_48 = arith.constant dense<0.000000e+00> : vector<384x16xf32>
    %55 = tpu.matmul %54, %9, %cst_48 {dimension_numbers = #tpu.dot_dimension_numbers<[1], [0], [0], [1], [0, 0, 1, 1], [], []>} : vector<384x16xf32>, vector<16x16xf32>, vector<384x16xf32> -> vector<384x16xf32>
    %cst_49 = arith.constant dense<0.000000e+00> : vector<384x1xf32>
    %56 = tpu.matmul %54, %10, %cst_49 {dimension_numbers = #tpu.dot_dimension_numbers<[1], [0], [0], [1], [0, 0, 1, 1], [], []>} : vector<384x16xf32>, vector<16x1xf32>, vector<384x1xf32> -> vector<384x1xf32>
    %57 = vector.shape_cast %55 : vector<384x16xf32> to vector<3x128x16xf32>
    %58 = arith.mulf %57, %57 : vector<3x128x16xf32>
    %cst_50 = arith.constant dense<0.000000e+00> : vector<128x16xf32>
    %59 = vector.multi_reduction <add>, %58, %cst_50 [0] : vector<3x128x16xf32> to vector<128x16xf32>
    %60 = math.sqrt %59 : vector<128x16xf32>
    %cst_51 = arith.constant dense<0.000000e+00> : vector<128x16xf32>
    %61 = tpu.matmul %49, %11, %cst_51 {dimension_numbers = #tpu.dot_dimension_numbers<[1], [0], [0], [1], [0, 0, 1, 1], [], []>} : vector<128x16xf32>, vector<16x16xf32>, vector<128x16xf32> -> vector<128x16xf32>
    %cst_52 = arith.constant dense<0.000000e+00> : vector<128x16xf32>
    %62 = tpu.matmul %60, %12, %cst_52 {dimension_numbers = #tpu.dot_dimension_numbers<[1], [0], [0], [1], [0, 0, 1, 1], [], []>} : vector<128x16xf32>, vector<16x16xf32>, vector<128x16xf32> -> vector<128x16xf32>
    %63 = arith.addf %61, %62 : vector<128x16xf32>
    %64 = vector.broadcast %13 : vector<1x16xf32> to vector<128x16xf32>
    %65 = arith.addf %63, %64 : vector<128x16xf32>
    %66 = arith.negf %65 : vector<128x16xf32>
    %67 = math.exp %66 : vector<128x16xf32>
    %cst_53 = arith.constant 1.000000e+00 : f32
    %68 = vector.broadcast %cst_53 : f32 to vector<128x16xf32>
    %69 = arith.addf %68, %67 : vector<128x16xf32>
    %70 = arith.divf %68, %69 : vector<128x16xf32>
    %71 = arith.mulf %65, %70 : vector<128x16xf32>
    %cst_54 = arith.constant dense<0.000000e+00> : vector<128x1xf32>
    %72 = tpu.matmul %71, %14, %cst_54 {dimension_numbers = #tpu.dot_dimension_numbers<[1], [0], [0], [1], [0, 0, 1, 1], [], []>} : vector<128x16xf32>, vector<16x1xf32>, vector<128x1xf32> -> vector<128x1xf32>
    %73 = vector.broadcast %16 : vector<1x1xf32> to vector<128x1xf32>
    %74 = arith.addf %72, %73 : vector<128x1xf32>
    %cst_55 = arith.constant dense<0.000000e+00> : vector<128x1xf32>
    %75 = tpu.matmul %71, %15, %cst_55 {dimension_numbers = #tpu.dot_dimension_numbers<[1], [0], [0], [1], [0, 0, 1, 1], [], []>} : vector<128x16xf32>, vector<16x1xf32>, vector<128x1xf32> -> vector<128x1xf32>
    %76 = vector.broadcast %17 : vector<1x1xf32> to vector<128x1xf32>
    %77 = arith.addf %75, %76 : vector<128x1xf32>
    %78 = vector.shape_cast %77 : vector<128x1xf32> to vector<1x128x1xf32>
    %79 = vector.shape_cast %56 : vector<384x1xf32> to vector<3x128x1xf32>
    %80 = vector.broadcast %78 : vector<1x128x1xf32> to vector<3x128x1xf32>
    %81 = arith.mulf %80, %79 : vector<3x128x1xf32>
    %c0_56 = arith.constant 0 : index
    %c0_57 = arith.constant 0 : index
    %82 = vector.load %arg21[%c0_56, %c0_57] : memref<128x1xf32, #tpu.memory_space<vmem>>, vector<128x1xf32>
    tpu.vector_store %arg21[%c0_56, %c0_57], %74 {strides = array<i32>} : memref<128x1xf32, #tpu.memory_space<vmem>>, vector<128x1xf32>,
    %c0_58 = arith.constant 0 : index
    %c0_59 = arith.constant 0 : index
    %c0_60 = arith.constant 0 : index
    %83 = vector.load %arg22[%c0_58, %c0_59, %c0_60] : memref<3x128x1xf32, #tpu.memory_space<vmem>>, vector<3x128x1xf32>
    tpu.vector_store %arg22[%c0_58, %c0_59, %c0_60], %81 {strides = array<i32>} : memref<3x128x1xf32, #tpu.memory_space<vmem>>, vector<3x128x1xf32>,
    return
  }
  func.func @transform_0(%arg0: i32) -> (i32, i32) {
    %c0_i32 = arith.constant 0 : i32
    %c0_i32_0 = arith.constant 0 : i32
    return %arg0, %c0_i32 : i32, i32
  }
  func.func @transform_1(%arg0: i32) -> (i32, i32, i32) {
    %c0_i32 = arith.constant 0 : i32
    %c0_i32_0 = arith.constant 0 : i32
    %c0_i32_1 = arith.constant 0 : i32
    return %c0_i32, %arg0, %c0_i32_0 : i32, i32, i32
  }
  func.func @transform_2(%arg0: i32) -> (i32, i32) {
    %c0_i32 = arith.constant 0 : i32
    %c0_i32_0 = arith.constant 0 : i32
    %c0_i32_1 = arith.constant 0 : i32
    return %c0_i32, %c0_i32_0 : i32, i32
  }
  func.func @transform_3(%arg0: i32) -> (i32, i32) {
    %c0_i32 = arith.constant 0 : i32
    %c0_i32_0 = arith.constant 0 : i32
    %c0_i32_1 = arith.constant 0 : i32
    return %c0_i32, %c0_i32_0 : i32, i32
  }
  func.func @transform_4(%arg0: i32) -> (i32, i32) {
    %c0_i32 = arith.constant 0 : i32
    %c0_i32_0 = arith.constant 0 : i32
    %c0_i32_1 = arith.constant 0 : i32
    return %c0_i32, %c0_i32_0 : i32, i32
  }
  func.func @transform_5(%arg0: i32) -> (i32, i32) {
    %c0_i32 = arith.constant 0 : i32
    %c0_i32_0 = arith.constant 0 : i32
    %c0_i32_1 = arith.constant 0 : i32
    return %c0_i32, %c0_i32_0 : i32, i32
  }
  func.func @transform_6(%arg0: i32) -> (i32, i32) {
    %c0_i32 = arith.constant 0 : i32
    %c0_i32_0 = arith.constant 0 : i32
    %c0_i32_1 = arith.constant 0 : i32
    return %c0_i32, %c0_i32_0 : i32, i32
  }
  func.func @transform_7(%arg0: i32) -> (i32, i32) {
    %c0_i32 = arith.constant 0 : i32
    %c0_i32_0 = arith.constant 0 : i32
    %c0_i32_1 = arith.constant 0 : i32
    return %c0_i32, %c0_i32_0 : i32, i32
  }
  func.func @transform_8(%arg0: i32) -> (i32, i32) {
    %c0_i32 = arith.constant 0 : i32
    %c0_i32_0 = arith.constant 0 : i32
    %c0_i32_1 = arith.constant 0 : i32
    return %c0_i32, %c0_i32_0 : i32, i32
  }
  func.func @transform_9(%arg0: i32) -> (i32, i32) {
    %c0_i32 = arith.constant 0 : i32
    %c0_i32_0 = arith.constant 0 : i32
    %c0_i32_1 = arith.constant 0 : i32
    return %c0_i32, %c0_i32_0 : i32, i32
  }
  func.func @transform_10(%arg0: i32) -> (i32, i32) {
    %c0_i32 = arith.constant 0 : i32
    %c0_i32_0 = arith.constant 0 : i32
    %c0_i32_1 = arith.constant 0 : i32
    return %c0_i32, %c0_i32_0 : i32, i32
  }
  func.func @transform_11(%arg0: i32) -> (i32, i32) {
    %c0_i32 = arith.constant 0 : i32
    %c0_i32_0 = arith.constant 0 : i32
    %c0_i32_1 = arith.constant 0 : i32
    return %c0_i32, %c0_i32_0 : i32, i32
  }
  func.func @transform_12(%arg0: i32) -> (i32, i32) {
    %c0_i32 = arith.constant 0 : i32
    %c0_i32_0 = arith.constant 0 : i32
    %c0_i32_1 = arith.constant 0 : i32
    return %c0_i32, %c0_i32_0 : i32, i32
  }
  func.func @transform_13(%arg0: i32) -> (i32, i32) {
    %c0_i32 = arith.constant 0 : i32
    %c0_i32_0 = arith.constant 0 : i32
    %c0_i32_1 = arith.constant 0 : i32
    return %c0_i32, %c0_i32_0 : i32, i32
  }
  func.func @transform_14(%arg0: i32) -> (i32, i32) {
    %c0_i32 = arith.constant 0 : i32
    %c0_i32_0 = arith.constant 0 : i32
    %c0_i32_1 = arith.constant 0 : i32
    return %c0_i32, %c0_i32_0 : i32, i32
  }
  func.func @transform_15(%arg0: i32) -> (i32, i32) {
    %c0_i32 = arith.constant 0 : i32
    %c0_i32_0 = arith.constant 0 : i32
    %c0_i32_1 = arith.constant 0 : i32
    return %c0_i32, %c0_i32_0 : i32, i32
  }
  func.func @transform_16(%arg0: i32) -> (i32, i32) {
    %c0_i32 = arith.constant 0 : i32
    %c0_i32_0 = arith.constant 0 : i32
    %c0_i32_1 = arith.constant 0 : i32
    return %c0_i32, %c0_i32_0 : i32, i32
  }
  func.func @transform_17(%arg0: i32) -> (i32, i32) {
    %c0_i32 = arith.constant 0 : i32
    %c0_i32_0 = arith.constant 0 : i32
    %c0_i32_1 = arith.constant 0 : i32
    return %c0_i32, %c0_i32_0 : i32, i32
  }
  func.func @transform_18(%arg0: i32) -> (i32, i32) {
    %c0_i32 = arith.constant 0 : i32
    %c0_i32_0 = arith.constant 0 : i32
    %c0_i32_1 = arith.constant 0 : i32
    return %c0_i32, %c0_i32_0 : i32, i32
  }
  func.func @transform_19(%arg0: i32) -> (i32, i32) {
    %c0_i32 = arith.constant 0 : i32
    %c0_i32_0 = arith.constant 0 : i32
    %c0_i32_1 = arith.constant 0 : i32
    return %c0_i32, %c0_i32_0 : i32, i32
  }
  func.func @transform_20(%arg0: i32) -> (i32, i32) {
    %c0_i32 = arith.constant 0 : i32
    %c0_i32_0 = arith.constant 0 : i32
    return %arg0, %c0_i32 : i32, i32
  }
  func.func @transform_21(%arg0: i32) -> (i32, i32, i32) {
    %c0_i32 = arith.constant 0 : i32
    %c0_i32_0 = arith.constant 0 : i32
    %c0_i32_1 = arith.constant 0 : i32
    return %c0_i32, %arg0, %c0_i32_0 : i32, i32, i32
  }
}

</mosaic_0001>

<bundles_post_ra>
// kernel: equivariant_scalar.1
= control target key start
LH: loop header
LB: loop body
LE: loop exit
PB: predicated region body
PF: predicated region fallthrough
CT: control target
= control target key end

     0   :  { %s9151_s0 = inlined_call_operand.vmem [shape: f32[256,32], index: 0, kind: input, shape index: {}]   ;;  %s9152_s1 = inlined_call_operand.vmem [shape: f32[3,256,32], index: 1, kind: input, shape index: {}]   ;;  %s9153_s2 = inlined_call_operand.vmem [shape: f32[32,32], index: 2, kind: input, shape index: {}]   ;;  %s9154_s3 = inlined_call_operand.vmem [shape: f32[32,16], index: 3, kind: input, shape index: {}]   ;;  %s9155_s4 = inlined_call_operand.vmem [shape: f32[32,32], index: 4, kind: input, shape index: {}]   ;;  %s9156_s5 = inlined_call_operand.vmem [shape: f32[32,32], index: 5, kind: input, shape index: {}]   ;;  %s9157_s6 = inlined_call_operand.vmem [shape: f32[1,32], index: 6, kind: input, shape index: {}]   ;;  %s9158_s7 = inlined_call_operand.vmem [shape: f32[32,16], index: 7, kind: input, shape index: {}]   ;;  %s9159_s8 = inlined_call_operand.vmem [shape: f32[32,16], index: 8, kind: input, shape index: {}]   ;;  %s9160_s9 = inlined_call_operand.vmem [shape: f32[1,16], index: 9, kind: input, shape index: {}]   ;;  %s9161_s10 = inlined_call_operand.vmem [shape: f32[1,16], index: 10, kind: input, shape index: {}]   ;;  %s9162_s11 = inlined_call_operand.vmem [shape: f32[16,16], index: 11, kind: input, shape index: {}]   ;;  %s9163_s12 = inlined_call_operand.vmem [shape: f32[16,1], index: 12, kind: input, shape index: {}]   ;;  %s9164_s13 = inlined_call_operand.vmem [shape: f32[16,16], index: 13, kind: input, shape index: {}]   ;;  %s9165_s14 = inlined_call_operand.vmem [shape: f32[16,16], index: 14, kind: input, shape index: {}]   ;;  %s9166_s15 = inlined_call_operand.vmem [shape: f32[1,16], index: 15, kind: input, shape index: {}]   ;;  %s9167_s16 = inlined_call_operand.vmem [shape: f32[16,1], index: 16, kind: input, shape index: {}]   ;;  %s9168_s17 = inlined_call_operand.vmem [shape: f32[16,1], index: 17, kind: input, shape index: {}]   ;;  %s9169_s18 = inlined_call_operand.<no memory space> [shape: f32[1,1], index: 18, kind: input, shape index: {}]   ;;  %s9170_s20 = inlined_call_operand.vmem [shape: f32[256,1], index: 20, kind: output, shape index: {0}]   ;;  %s9171_s21 = inlined_call_operand.vmem [shape: f32[3,256,1], index: 21, kind: output, shape index: {1}]   ;;  %s9172_s19 = inlined_call_operand.<no memory space> [shape: f32[1,1], index: 19, kind: input, shape index: {}]  }
   0x1   :  { %9179 = sst [smem:[#allocation24_spill]] %s9151_s0  ;;  %v27_v0 = vstv %s9169_s18  ;;  %v29_v1 = vstv %s9172_s19 }
   0x2   :  { %9180 = sst [smem:[#allocation25_spill]] %s9152_s1  ;;  %28 = vst [vmem:[#allocation2] sm:$0x1] %v27_v0  ;;  %30 = vst [vmem:[#allocation3] sm:$0x1] %v29_v1 }
   0x3   :  { %9181 = sst [smem:[#allocation26_spill]] %s9153_s2 }
   0x4   :  { %9182 = sst [smem:[#allocation27_spill]] %s9154_s3 }
   0x5   :  { %9183 = sst [smem:[#allocation28_spill]] %s9155_s4 }
   0x6   :  { %9184 = sst [smem:[#allocation29_spill]] %s9156_s5 }
   0x7   :  { %s7080_s3 = smov 0   ;;  %s7082_s28 = smov 0  }
   0x8   :  { %s7084_s29 = smov 0  }
   0x9 LB: > { %s7096_s18 = sadd.s32 4294967295, %s6962_s29   ;;  %s7099_s19 = sadd.s32 1, %s6962_s29   ;;  %s6962_s29 = sphi %s7084_s29, %s9263_s29   ;;  %s6958_s28 = sphi %s7082_s28, %s9262_s28   ;;  %s6954_s3 = sphi %s7080_s3, %s9261_s3  }
   0xa   : > { %s66_s0 = ssub.s32 %s6962_s29, %s7099_s19  ;;  %s69_s4 = sadd.s32 1, %s6958_s28 }
   0xb   : > { %p67_p0 = scmp.eq.s32.totalorder %s66_s0, 0  ;;  %p76_p1 = scmp.ne.s32.totalorder %s6958_s28, %s6954_s3 }
   0xc   : > { %p77_p2 = scmp.eq.s32.totalorder %s6962_s29, 0  ;;  %p510_p3 = scmp.eq.s32.totalorder %s7096_s18, 1 }
   0xd   : > { %s7109_s30 = scalar_select %p67_p0, %s6958_s28, %s69_s4  }
   0xe   : > { %p78_p4 = por %p77_p2, %p76_p1  ;;  %p7111_p5 = por %p510_p3, %p76_p1 }
   0xf   : > { %9185 = sst [smem:[#allocation6_spill]] %s7109_s30  ;;  %p5362_p6 = scmp.ge.s32.totalorder %s6962_s29, 2 }
  0x11   : > { %586 = sbr.rel (%p5362_p6) target bundleno = 57 (0x39), region = 88 }
  0x16   : > { %598 = sbr.rel (!%p78_p4) target bundleno = 57 (0x39), region = 96  ;;  %s600_s22 = sand.u32 (%p78_p4), 1, %s6958_s28  }
  0x17   : > { %s5748_s23 = sshll.u32 (%p78_p4), %s6962_s29, 7  ;;  %s6658_s1 = smul.u32 (%p78_p4), 384, %s600_s22 }
  0x18   : > { %s9187_s25 = sld [smem:[#allocation25_spill]] (%p78_p4) }
  0x19   : > { %s7129_s27 = scalar_lea.vmem (%p78_p4), [#allocation4], %s6658_s1 }
  0x1e   : > { %s7121_s26 = scalar_lea.vmem %s9187_s25, %s5748_s23 }
  0x1f   : > { %v728_v2 = vld [vmem:[%s7121_s26] sm:$0xff]  ;;  %v730_v3 = vld [vmem:[%s7121_s26 + $0x8] sm:$0xff]  ;;  %v732_v4 = vld [vmem:[%s7121_s26 + $0x10] sm:$0xff] }
  0x20   : > { %v734_v5 = vld [vmem:[%s7121_s26 + $0x18] sm:$0xff]  ;;  %v736_v6 = vld [vmem:[%s7121_s26 + $0x20] sm:$0xff]  ;;  %v738_v7 = vld [vmem:[%s7121_s26 + $0x28] sm:$0xff]  ;;  %729 = vst [vmem:[%s7129_s27] sm:$0xff] %v728_v2 }
  0x21   : > { %731 = vst [vmem:[%s7129_s27 + $0x8] sm:$0xff] %v730_v3  ;;  %733 = vst [vmem:[%s7129_s27 + $0x10] sm:$0xff] %v732_v4  ;;  %v740_v8 = vld [vmem:[%s7121_s26 + $0x30] sm:$0xff]  ;;  %v742_v9 = vld [vmem:[%s7121_s26 + $0x38] sm:$0xff] }
  0x22   : > { %735 = vst [vmem:[%s7129_s27 + $0x18] sm:$0xff] %v734_v5  ;;  %737 = vst [vmem:[%s7129_s27 + $0x20] sm:$0xff] %v736_v6  ;;  %v744_v10 = vld [vmem:[%s7121_s26 + $0x40] sm:$0xff]  ;;  %v746_v11 = vld [vmem:[%s7121_s26 + $0x48] sm:$0xff] }
  0x23   : > { %739 = vst [vmem:[%s7129_s27 + $0x28] sm:$0xff] %v738_v7  ;;  %741 = vst [vmem:[%s7129_s27 + $0x30] sm:$0xff] %v740_v8  ;;  %v748_v12 = vld [vmem:[%s7121_s26 + $0x50] sm:$0xff]  ;;  %v750_v13 = vld [vmem:[%s7121_s26 + $0x58] sm:$0xff] }
  0x24   : > { %743 = vst [vmem:[%s7129_s27 + $0x38] sm:$0xff] %v742_v9  ;;  %745 = vst [vmem:[%s7129_s27 + $0x40] sm:$0xff] %v744_v10  ;;  %v752_v14 = vld [vmem:[%s7121_s26 + $0x60] sm:$0xff]  ;;  %v754_v15 = vld [vmem:[%s7121_s26 + $0x68] sm:$0xff] }
  0x25   : > { %747 = vst [vmem:[%s7129_s27 + $0x48] sm:$0xff] %v746_v11  ;;  %749 = vst [vmem:[%s7129_s27 + $0x50] sm:$0xff] %v748_v12  ;;  %v756_v16 = vld [vmem:[%s7121_s26 + $0x70] sm:$0xff]  ;;  %v758_v17 = vld [vmem:[%s7121_s26 + $0x78] sm:$0xff] }
  0x26   : > { %751 = vst [vmem:[%s7129_s27 + $0x58] sm:$0xff] %v750_v13  ;;  %753 = vst [vmem:[%s7129_s27 + $0x60] sm:$0xff] %v752_v14  ;;  %v760_v18 = vld [vmem:[%s7121_s26 + $0x100] sm:$0xff]  ;;  %v762_v19 = vld [vmem:[%s7121_s26 + $0x108] sm:$0xff] }
  0x27   : > { %755 = vst [vmem:[%s7129_s27 + $0x68] sm:$0xff] %v754_v15  ;;  %757 = vst [vmem:[%s7129_s27 + $0x70] sm:$0xff] %v756_v16  ;;  %v764_v20 = vld [vmem:[%s7121_s26 + $0x110] sm:$0xff]  ;;  %v766_v21 = vld [vmem:[%s7121_s26 + $0x118] sm:$0xff] }
  0x28   : > { %759 = vst [vmem:[%s7129_s27 + $0x78] sm:$0xff] %v758_v17  ;;  %761 = vst [vmem:[%s7129_s27 + $0x80] sm:$0xff] %v760_v18  ;;  %v768_v22 = vld [vmem:[%s7121_s26 + $0x120] sm:$0xff]  ;;  %v770_v23 = vld [vmem:[%s7121_s26 + $0x128] sm:$0xff] }
  0x29   : > { %763 = vst [vmem:[%s7129_s27 + $0x88] sm:$0xff] %v762_v19  ;;  %765 = vst [vmem:[%s7129_s27 + $0x90] sm:$0xff] %v764_v20  ;;  %v772_v24 = vld [vmem:[%s7121_s26 + $0x130] sm:$0xff]  ;;  %v774_v25 = vld [vmem:[%s7121_s26 + $0x138] sm:$0xff] }
  0x2a   : > { %767 = vst [vmem:[%s7129_s27 + $0x98] sm:$0xff] %v766_v21  ;;  %769 = vst [vmem:[%s7129_s27 + $0xa0] sm:$0xff] %v768_v22  ;;  %v776_v26 = vld [vmem:[%s7121_s26 + $0x140] sm:$0xff]  ;;  %v778_v27 = vld [vmem:[%s7121_s26 + $0x148] sm:$0xff] }
  0x2b   : > { %771 = vst [vmem:[%s7129_s27 + $0xa8] sm:$0xff] %v770_v23  ;;  %773 = vst [vmem:[%s7129_s27 + $0xb0] sm:$0xff] %v772_v24  ;;  %v780_v28 = vld [vmem:[%s7121_s26 + $0x150] sm:$0xff]  ;;  %v782_v29 = vld [vmem:[%s7121_s26 + $0x158] sm:$0xff] }
  0x2c   : > { %775 = vst [vmem:[%s7129_s27 + $0xb8] sm:$0xff] %v774_v25  ;;  %777 = vst [vmem:[%s7129_s27 + $0xc0] sm:$0xff] %v776_v26  ;;  %v784_v30 = vld [vmem:[%s7121_s26 + $0x160] sm:$0xff]  ;;  %v786_v31 = vld [vmem:[%s7121_s26 + $0x168] sm:$0xff] }
  0x2d   : > { %779 = vst [vmem:[%s7129_s27 + $0xc8] sm:$0xff] %v778_v27  ;;  %781 = vst [vmem:[%s7129_s27 + $0xd0] sm:$0xff] %v780_v28  ;;  %v788_v32 = vld [vmem:[%s7121_s26 + $0x170] sm:$0xff]  ;;  %v790_v33 = vld [vmem:[%s7121_s26 + $0x178] sm:$0xff] }
  0x2e   : > { %783 = vst [vmem:[%s7129_s27 + $0xd8] sm:$0xff] %v782_v29  ;;  %785 = vst [vmem:[%s7129_s27 + $0xe0] sm:$0xff] %v784_v30  ;;  %v792_v34 = vld [vmem:[%s7121_s26 + $0x200] sm:$0xff]  ;;  %v794_v35 = vld [vmem:[%s7121_s26 + $0x208] sm:$0xff] }
  0x2f   : > { %787 = vst [vmem:[%s7129_s27 + $0xe8] sm:$0xff] %v786_v31  ;;  %789 = vst [vmem:[%s7129_s27 + $0xf0] sm:$0xff] %v788_v32  ;;  %v796_v36 = vld [vmem:[%s7121_s26 + $0x210] sm:$0xff]  ;;  %v798_v37 = vld [vmem:[%s7121_s26 + $0x218] sm:$0xff] }
  0x30   : > { %791 = vst [vmem:[%s7129_s27 + $0xf8] sm:$0xff] %v790_v33  ;;  %793 = vst [vmem:[%s7129_s27 + $0x100] sm:$0xff] %v792_v34  ;;  %v800_v38 = vld [vmem:[%s7121_s26 + $0x220] sm:$0xff]  ;;  %v802_v39 = vld [vmem:[%s7121_s26 + $0x228] sm:$0xff] }
  0x31   : > { %795 = vst [vmem:[%s7129_s27 + $0x108] sm:$0xff] %v794_v35  ;;  %797 = vst [vmem:[%s7129_s27 + $0x110] sm:$0xff] %v796_v36  ;;  %v804_v40 = vld [vmem:[%s7121_s26 + $0x230] sm:$0xff]  ;;  %v806_v41 = vld [vmem:[%s7121_s26 + $0x238] sm:$0xff] }
  0x32   : > { %799 = vst [vmem:[%s7129_s27 + $0x118] sm:$0xff] %v798_v37  ;;  %801 = vst [vmem:[%s7129_s27 + $0x120] sm:$0xff] %v800_v38  ;;  %v808_v42 = vld [vmem:[%s7121_s26 + $0x240] sm:$0xff]  ;;  %v810_v43 = vld [vmem:[%s7121_s26 + $0x248] sm:$0xff] }
  0x33   : > { %803 = vst [vmem:[%s7129_s27 + $0x128] sm:$0xff] %v802_v39  ;;  %805 = vst [vmem:[%s7129_s27 + $0x130] sm:$0xff] %v804_v40  ;;  %v812_v44 = vld [vmem:[%s7121_s26 + $0x250] sm:$0xff]  ;;  %v814_v45 = vld [vmem:[%s7121_s26 + $0x258] sm:$0xff] }
  0x34   : > { %807 = vst [vmem:[%s7129_s27 + $0x138] sm:$0xff] %v806_v41  ;;  %809 = vst [vmem:[%s7129_s27 + $0x140] sm:$0xff] %v808_v42  ;;  %v816_v46 = vld [vmem:[%s7121_s26 + $0x260] sm:$0xff]  ;;  %v818_v47 = vld [vmem:[%s7121_s26 + $0x268] sm:$0xff] }
  0x35   : > { %811 = vst [vmem:[%s7129_s27 + $0x148] sm:$0xff] %v810_v43  ;;  %813 = vst [vmem:[%s7129_s27 + $0x150] sm:$0xff] %v812_v44  ;;  %v820_v48 = vld [vmem:[%s7121_s26 + $0x270] sm:$0xff]  ;;  %v822_v49 = vld [vmem:[%s7121_s26 + $0x278] sm:$0xff] }
  0x36   : > { %815 = vst [vmem:[%s7129_s27 + $0x158] sm:$0xff] %v814_v45  ;;  %817 = vst [vmem:[%s7129_s27 + $0x160] sm:$0xff] %v816_v46 }
  0x37   : > { %819 = vst [vmem:[%s7129_s27 + $0x168] sm:$0xff] %v818_v47  ;;  %821 = vst [vmem:[%s7129_s27 + $0x170] sm:$0xff] %v820_v48 }
  0x38   : > { %823 = vst [vmem:[%s7129_s27 + $0x178] sm:$0xff] %v822_v49 }
  0x39 PF: > { %p5365_p7 = scmp.ge.s32.totalorder %s6962_s29, 1  ;;  %p828_p8 = scmp.lt.s32.totalorder %s6962_s29, 3 }
  0x3b   : > { %p829_p9 = pnand %p5365_p7, %p828_p8 }
  0x3d   : > { %832 = sbr.rel (%p829_p9) target bundleno = 1570 (0x622), region = 134 }
  0x42   : > { %s9188_s22 = sld [smem:[#allocation26_spill]]  ;;  %s835_s24 = sand.u32 1, %s6954_s3   ;;  %vm1023_vm0 = vcmask 261120  }
  0x43   : > { %s7230_s2 = smul.u32 384, %s835_s24  ;;  %s9189_s27 = sld [smem:[#allocation27_spill]] }
  0x44   : > { %s9190_s4 = sld [smem:[#allocation29_spill]]  ;;  %s5366_s0 = sshll.u32 %s7096_s18, 4 }
  0x45   : > { %s7245_s1 = scalar_lea.vmem [#allocation4], %s7230_s2  ;;  %s9191_s30 = sld [smem:[#allocation28_spill]] }
  0x46   : > { %v975_v56 = vld [vmem:[%s7245_s1] sm:$0xff]  ;;  %v976_v58 = vld [vmem:[%s7245_s1 + $0x8] sm:$0xff]  ;;  %v977_v60 = vld [vmem:[%s7245_s1 + $0x10] sm:$0xff]  ;;  %p904_p10 = scmp.lt.s32.totalorder %s5366_s0, 31 }
  0x47   : > { %6114 = vmatprep.mubr.msk.f32.mxu0 %vm1023_vm0, %v975_v56  ;;  %v978_v63 = vld [vmem:[%s7245_s1 + $0x18] sm:$0xff]  ;;  %v979_v0 = vld [vmem:[%s7245_s1 + $0x20] sm:$0xff]  ;;  %6194 = vmatprep.mubr.msk.f32.mxu1 %vm1023_vm0, %v975_v56  ;;  %v980_v1 = vld [vmem:[%s7245_s1 + $0x28] sm:$0xff] }
  0x48   : > { %v920_v50 = vld [vmem:[%s9188_s22 + $0x18] sm:$0xff]  ;;  %v919_v51 = vld [vmem:[%s9188_s22 + $0x10] sm:$0xff]  ;;  %v918_v54 = vld [vmem:[%s9188_s22 + $0x8] sm:$0xff]  ;;  %s9265_s0 = smov (!%p904_p10, %s5366_s0), 31 }
  0x49   : > { %6106 = vmatprep.subr.mxu0 %v920_v50  ;;  %v924_v52 = vld [vmem:[%s9189_s27 + $0x18] sm:$0xff]  ;;  %v923_v53 = vld [vmem:[%s9189_s27 + $0x10] sm:$0xff]  ;;  %v917_v55 = vld [vmem:[%s9188_s22] sm:$0xff]  ;;  %s9177_s3 = sshll.u32 %s9265_s0, 3  ;;  %s9243_s26 = sshll.u32 %s9265_s0, 3 }
  0x4a   : > { %6107 = vmatpush3.msra.mxu0 %v920_v50  ;;  %6186 = vmatprep.subr.mxu1 %v924_v52  ;;  %v922_v57 = vld [vmem:[%s9189_s27 + $0x8] sm:$0xff]  ;;  %v921_v59 = vld [vmem:[%s9189_s27] sm:$0xff]  ;;  %v932_v61 = vld [vmem:[%s9190_s4 + $0x18] sm:$0xff]  ;;  %s8824_s24 = scalar_lea.vmem %s9170_s20, %s9243_s26  ;;  %s8836_s0 = scalar_lea.vmem [#allocation5], %s7230_s2 }
  0x4b   : > { %6108 = vmatprep.subr.mxu0 %v919_v51  ;;  %6187 = vmatpush3.msra.mxu1 %v924_v52  ;;  %v928_v62 = vld [vmem:[%s9191_s30 + $0x18] sm:$0xff]  ;;  %v983_v4 = vld [vmem:[%s7245_s1 + $0x40] sm:$0xff]  ;;  %v984_v5 = vld [vmem:[%s7245_s1 + $0x48] sm:$0xff]  ;;  %s5749_s2 = sshll.u32 (%p7111_p5), %s7096_s18, 7 }
  0x4c   : > { %6109 = vmatpush3.msra.mxu0 %v919_v51  ;;  %6188 = vmatprep.subr.mxu1 %v923_v53  ;;  %v981_v2 = vld [vmem:[%s7245_s1 + $0x30] sm:$0xff]  ;;  %v982_v3 = vld [vmem:[%s7245_s1 + $0x38] sm:$0xff]  ;;  %v987_v8 = vld [vmem:[%s7245_s1 + $0x60] sm:$0xff] }
  0x4d   : > { %6110 = vmatprep.subr.mxu0 %v918_v54  ;;  %6189 = vmatpush3.msra.mxu1 %v923_v53  ;;  %v985_v6 = vld [vmem:[%s7245_s1 + $0x50] sm:$0xff]  ;;  %v986_v7 = vld [vmem:[%s7245_s1 + $0x58] sm:$0xff]  ;;  %v988_v9 = vld [vmem:[%s7245_s1 + $0x68] sm:$0xff] }
  0x4e   : > { %6111 = vmatpush3.msra.mxu0 %v918_v54  ;;  %6190 = vmatprep.subr.mxu1 %v922_v57  ;;  %v989_v10 = vld [vmem:[%s7245_s1 + $0x70] sm:$0xff]  ;;  %v990_v11 = vld [vmem:[%s7245_s1 + $0x78] sm:$0xff]  ;;  %v991_v12 = vld [vmem:[%s7245_s1 + $0x80] sm:$0xff] }
  0x4f   : > { %6112 = vmatprep.subr.mxu0 %v917_v55  ;;  %6191 = vmatpush3.msra.mxu1 %v922_v57  ;;  %v992_v13 = vld [vmem:[%s7245_s1 + $0x88] sm:$0xff]  ;;  %v993_v14 = vld [vmem:[%s7245_s1 + $0x90] sm:$0xff]  ;;  %v994_v15 = vld [vmem:[%s7245_s1 + $0x98] sm:$0xff] }
  0x50   : > { %6113 = vmatpush3.msra.mxu0 %v917_v55  ;;  %6192 = vmatprep.subr.mxu1 %v921_v59  ;;  %v995_v16 = vld [vmem:[%s7245_s1 + $0xa0] sm:$0xff]  ;;  %v996_v17 = vld [vmem:[%s7245_s1 + $0xa8] sm:$0xff]  ;;  %v997_v18 = vld [vmem:[%s7245_s1 + $0xb0] sm:$0xff] }
  0x51   : > { %6115 = vmatmul.mubr.msk.f32.vlgmr.msra.gmra.mxu0 %vm1023_vm0, %v976_v58  ;;  %6193 = vmatpush3.msra.mxu1 %v921_v59  ;;  %v998_v19 = vld [vmem:[%s7245_s1 + $0xb8] sm:$0xff]  ;;  %v999_v20 = vld [vmem:[%s7245_s1 + $0xc0] sm:$0xff]  ;;  %v1000_v21 = vld [vmem:[%s7245_s1 + $0xc8] sm:$0xff] }
  0x52   : > { %6117 = vmatprep.mubr.msk.f32.mxu0 %vm1023_vm0, %v977_v60  ;;  %6266 = vmatprep.subr.mxu0 %v932_v61  ;;  %v1001_v22 = vld [vmem:[%s7245_s1 + $0xd0] sm:$0xff]  ;;  %v1002_v23 = vld [vmem:[%s7245_s1 + $0xd8] sm:$0xff]  ;;  %v1003_v24 = vld [vmem:[%s7245_s1 + $0xe0] sm:$0xff] }
  0x53   : > { %6195 = vmatmul.mubr.msk.f32.vlgmr.msra.gmra.mxu1 %vm1023_vm0, %v976_v58  ;;  %6298 = vmatprep.subr.mxu1 %v928_v62  ;;  %v1004_v25 = vld [vmem:[%s7245_s1 + $0xe8] sm:$0xff]  ;;  %v1005_v26 = vld [vmem:[%s7245_s1 + $0xf0] sm:$0xff]  ;;  %v1006_v27 = vld [vmem:[%s7245_s1 + $0xf8] sm:$0xff] }
  0x54   : > { %6299 = vmatpush3.msra.mxu1 %v928_v62  ;;  %6267 = vmatpush3.msra.mxu0 %v932_v61  ;;  %v1007_v28 = vld [vmem:[%s7245_s1 + $0x100] sm:$0xff]  ;;  %v1008_v29 = vld [vmem:[%s7245_s1 + $0x108] sm:$0xff]  ;;  %v1009_v30 = vld [vmem:[%s7245_s1 + $0x110] sm:$0xff] }
  0x55   : > { %6118 = vmatmul.mubr.msk.f32.gmra.mxu0 %vm1023_vm0, %v978_v63  ;;  %6197 = vmatprep.mubr.msk.f32.mxu1 %vm1023_vm0, %v977_v60  ;;  %v1010_v31 = vld [vmem:[%s7245_s1 + $0x118] sm:$0xff]  ;;  %v1011_v32 = vld [vmem:[%s7245_s1 + $0x120] sm:$0xff]  ;;  %v1012_v33 = vld [vmem:[%s7245_s1 + $0x128] sm:$0xff] }
  0x56   : > { %6120 = vmatprep.mubr.msk.f32.mxu0 %vm1023_vm0, %v979_v0  ;;  %v1013_v34 = vld [vmem:[%s7245_s1 + $0x130] sm:$0xff]  ;;  %v1014_v35 = vld [vmem:[%s7245_s1 + $0x138] sm:$0xff]  ;;  %v1015_v36 = vld [vmem:[%s7245_s1 + $0x140] sm:$0xff] }
  0x57   : > { %6198 = vmatmul.mubr.msk.f32.gmra.mxu1 %vm1023_vm0, %v978_v63  ;;  %v1016_v37 = vld [vmem:[%s7245_s1 + $0x148] sm:$0xff]  ;;  %v1017_v38 = vld [vmem:[%s7245_s1 + $0x150] sm:$0xff]  ;;  %v1018_v39 = vld [vmem:[%s7245_s1 + $0x158] sm:$0xff] }
  0x58   : > { %6200 = vmatprep.mubr.msk.f32.mxu1 %vm1023_vm0, %v979_v0  ;;  %v1019_v40 = vld [vmem:[%s7245_s1 + $0x160] sm:$0xff]  ;;  %v1020_v41 = vld [vmem:[%s7245_s1 + $0x168] sm:$0xff]  ;;  %v1021_v44 = vld [vmem:[%s7245_s1 + $0x170] sm:$0xff] }
  0x59   : > { %6121 = vmatmul.mubr.msk.f32.gmra.mxu0 %vm1023_vm0, %v980_v1  ;;  %v931_v42 = vld [vmem:[%s9190_s4 + $0x10] sm:$0xff]  ;;  %v1022_v45 = vld [vmem:[%s7245_s1 + $0x178] sm:$0xff]  ;;  %v930_v46 = vld [vmem:[%s9190_s4 + $0x8] sm:$0xff]  ;;  %s9192_s1 = sld [smem:[#allocation24_spill]] }
  0x5a   : > { %6123 = vmatprep.mubr.msk.f32.mxu0 %vm1023_vm0, %v981_v2  ;;  %v927_v43 = vld [vmem:[%s9191_s30 + $0x10] sm:$0xff]  ;;  %6268 = vmatprep.subr.mxu0 %v931_v42  ;;  %v926_v47 = vld [vmem:[%s9191_s30 + $0x8] sm:$0xff]  ;;  %v929_v48 = vld [vmem:[%s9190_s4] sm:$0xff] }
  0x5b   : > { %6201 = vmatmul.mubr.msk.f32.gmra.mxu1 %vm1023_vm0, %v980_v1  ;;  %6300 = vmatprep.subr.mxu1 %v927_v43  ;;  %v925_v49 = vld [vmem:[%s9191_s30] sm:$0xff] }
  0x5c   : > { %6203 = vmatprep.mubr.msk.f32.mxu1 %vm1023_vm0, %v981_v2  ;;  %6269 = vmatpush3.msra.mxu0 %v931_v42 }
  0x5d   : > { %6124 = vmatmul.mubr.msk.f32.gmra.mxu0 %vm1023_vm0, %v982_v3  ;;  %6301 = vmatpush3.msra.mxu1 %v927_v43 }
  0x5e   : > { %6126 = vmatprep.mubr.msk.f32.mxu0 %vm1023_vm0, %v983_v4  ;;  %6270 = vmatprep.subr.mxu0 %v930_v46 }
  0x5f   : > { %6204 = vmatmul.mubr.msk.f32.gmra.mxu1 %vm1023_vm0, %v982_v3  ;;  %6302 = vmatprep.subr.mxu1 %v926_v47  ;;  %s907_s25 = scalar_lea.vmem %s9192_s1, %s9177_s3  ;;  %s9046_s3 = scalar_lea.vmem (%p7111_p5), %s9171_s21, %s5749_s2 }
  0x60   : > { %6206 = vmatprep.mubr.msk.f32.mxu1 %vm1023_vm0, %v983_v4  ;;  %6271 = vmatpush3.msra.mxu0 %v930_v46  ;;  %v959_v50 = vld [vmem:[%s907_s25] sm:$0xff]  ;;  %v960_v51 = vld [vmem:[%s907_s25 + $0x8] sm:$0xff]  ;;  %v961_v52 = vld [vmem:[%s907_s25 + $0x10] sm:$0xff] }
  0x61   : > { %6127 = vmatmul.mubr.msk.f32.gmra.mxu0 %vm1023_vm0, %v984_v5  ;;  %6303 = vmatpush3.msra.mxu1 %v926_v47  ;;  %v962_v53 = vld [vmem:[%s907_s25 + $0x18] sm:$0xff]  ;;  %v963_v54 = vld [vmem:[%s907_s25 + $0x20] sm:$0xff]  ;;  %v964_v55 = vld [vmem:[%s907_s25 + $0x28] sm:$0xff] }
  0x62   : > { %6129 = vmatprep.mubr.msk.f32.mxu0 %vm1023_vm0, %v985_v6  ;;  %6272 = vmatprep.subr.mxu0 %v929_v48  ;;  %v965_v56 = vld [vmem:[%s907_s25 + $0x30] sm:$0xff]  ;;  %v966_v57 = vld [vmem:[%s907_s25 + $0x38] sm:$0xff]  ;;  %v967_v58 = vld [vmem:[%s907_s25 + $0x40] sm:$0xff] }
  0x63   : > { %6207 = vmatmul.mubr.msk.f32.gmra.mxu1 %vm1023_vm0, %v984_v5  ;;  %6304 = vmatprep.subr.mxu1 %v925_v49  ;;  %v968_v59 = vld [vmem:[%s907_s25 + $0x48] sm:$0xff]  ;;  %v969_v60 = vld [vmem:[%s907_s25 + $0x50] sm:$0xff]  ;;  %v970_v61 = vld [vmem:[%s907_s25 + $0x58] sm:$0xff] }
  0x64   : > { %6209 = vmatprep.mubr.msk.f32.mxu1 %vm1023_vm0, %v985_v6  ;;  %6273 = vmatpush3.msra.mxu0 %v929_v48  ;;  %v971_v62 = vld [vmem:[%s907_s25 + $0x60] sm:$0xff]  ;;  %v972_v63 = vld [vmem:[%s907_s25 + $0x68] sm:$0xff]  ;;  %v973_v0 = vld [vmem:[%s907_s25 + $0x70] sm:$0xff] }
  0x65   : > { %6130 = vmatmul.mubr.msk.f32.gmra.mxu0 %vm1023_vm0, %v986_v7  ;;  %6305 = vmatpush3.msra.mxu1 %v925_v49  ;;  %v974_v1 = vld [vmem:[%s907_s25 + $0x78] sm:$0xff] }
  0x66   : > { %6132 = vmatprep.mubr.msk.f32.mxu0 %vm1023_vm0, %v987_v8 }
  0x67   : > { %6210 = vmatmul.mubr.msk.f32.gmra.mxu1 %vm1023_vm0, %v986_v7 }
  0x68   : > { %6212 = vmatprep.mubr.msk.f32.mxu1 %vm1023_vm0, %v987_v8 }
  0x69   : > { %6133 = vmatmul.mubr.msk.f32.gmra.mxu0 %vm1023_vm0, %v988_v9 }
  0x6a   : > { %6135 = vmatprep.mubr.msk.f32.mxu0 %vm1023_vm0, %v989_v10 }
  0x6b   : > { %6213 = vmatmul.mubr.msk.f32.gmra.mxu1 %vm1023_vm0, %v988_v9 }
  0x6c   : > { %6215 = vmatprep.mubr.msk.f32.mxu1 %vm1023_vm0, %v989_v10 }
  0x6d   : > { %6136 = vmatmul.mubr.msk.f32.gmra.mxu0 %vm1023_vm0, %v990_v11 }
  0x6e   : > { %6138 = vmatprep.mubr.msk.f32.mxu0 %vm1023_vm0, %v991_v12 }
  0x6f   : > { %6216 = vmatmul.mubr.msk.f32.gmra.mxu1 %vm1023_vm0, %v990_v11 }
  0x70   : > { %6218 = vmatprep.mubr.msk.f32.mxu1 %vm1023_vm0, %v991_v12 }
  0x71   : > { %6139 = vmatmul.mubr.msk.f32.gmra.mxu0 %vm1023_vm0, %v992_v13 }
  0x72   : > { %6141 = vmatprep.mubr.msk.f32.mxu0 %vm1023_vm0, %v993_v14 }
  0x73   : > { %6219 = vmatmul.mubr.msk.f32.gmra.mxu1 %vm1023_vm0, %v992_v13 }
  0x74   : > { %6221 = vmatprep.mubr.msk.f32.mxu1 %vm1023_vm0, %v993_v14 }
  0x75   : > { %6142 = vmatmul.mubr.msk.f32.gmra.mxu0 %vm1023_vm0, %v994_v15 }
  0x76   : > { %6144 = vmatprep.mubr.msk.f32.mxu0 %vm1023_vm0, %v995_v16 }
  0x77   : > { %6222 = vmatmul.mubr.msk.f32.gmra.mxu1 %vm1023_vm0, %v994_v15 }
  0x78   : > { %6224 = vmatprep.mubr.msk.f32.mxu1 %vm1023_vm0, %v995_v16 }
  0x79   : > { %6145 = vmatmul.mubr.msk.f32.gmra.mxu0 %vm1023_vm0, %v996_v17 }
  0x7a   : > { %6147 = vmatprep.mubr.msk.f32.mxu0 %vm1023_vm0, %v997_v18 }
  0x7b   : > { %6225 = vmatmul.mubr.msk.f32.gmra.mxu1 %vm1023_vm0, %v996_v17 }
  0x7c   : > { %6227 = vmatprep.mubr.msk.f32.mxu1 %vm1023_vm0, %v997_v18 }
  0x7d   : > { %6148 = vmatmul.mubr.msk.f32.gmra.mxu0 %vm1023_vm0, %v998_v19 }
  0x7e   : > { %6150 = vmatprep.mubr.msk.f32.mxu0 %vm1023_vm0, %v999_v20 }
  0x7f   : > { %6228 = vmatmul.mubr.msk.f32.gmra.mxu1 %vm1023_vm0, %v998_v19 }
  0x80   : > { %6230 = vmatprep.mubr.msk.f32.mxu1 %vm1023_vm0, %v999_v20 }
  0x81   : > { %6151 = vmatmul.mubr.msk.f32.gmra.mxu0 %vm1023_vm0, %v1000_v21 }
  0x82   : > { %6153 = vmatprep.mubr.msk.f32.mxu0 %vm1023_vm0, %v1001_v22 }
  0x83   : > { %6231 = vmatmul.mubr.msk.f32.gmra.mxu1 %vm1023_vm0, %v1000_v21 }
  0x84   : > { %6233 = vmatprep.mubr.msk.f32.mxu1 %vm1023_vm0, %v1001_v22 }
  0x85   : > { %6154 = vmatmul.mubr.msk.f32.gmra.mxu0 %vm1023_vm0, %v1002_v23 }
  0x86   : > { %6156 = vmatprep.mubr.msk.f32.mxu0 %vm1023_vm0, %v1003_v24 }
  0x87   : > { %6234 = vmatmul.mubr.msk.f32.gmra.mxu1 %vm1023_vm0, %v1002_v23 }
  0x88   : > { %6236 = vmatprep.mubr.msk.f32.mxu1 %vm1023_vm0, %v1003_v24 }
  0x89   : > { %6157 = vmatmul.mubr.msk.f32.gmra.mxu0 %vm1023_vm0, %v1004_v25 }
  0x8a   : > { %6159 = vmatprep.mubr.msk.f32.mxu0 %vm1023_vm0, %v1005_v26 }
  0x8b   : > { %6237 = vmatmul.mubr.msk.f32.gmra.mxu1 %vm1023_vm0, %v1004_v25 }
  0x8c   : > { %6239 = vmatprep.mubr.msk.f32.mxu1 %vm1023_vm0, %v1005_v26 }
  0x8d   : > { %6160 = vmatmul.mubr.msk.f32.gmra.mxu0 %vm1023_vm0, %v1006_v27 }
  0x8e   : > { %6162 = vmatprep.mubr.msk.f32.mxu0 %vm1023_vm0, %v1007_v28 }
  0x8f   : > { %6240 = vmatmul.mubr.msk.f32.gmra.mxu1 %vm1023_vm0, %v1006_v27 }
  0x90   : > { %6242 = vmatprep.mubr.msk.f32.mxu1 %vm1023_vm0, %v1007_v28 }
  0x91   : > { %6163 = vmatmul.mubr.msk.f32.gmra.mxu0 %vm1023_vm0, %v1008_v29 }
  0x92   : > { %6165 = vmatprep.mubr.msk.f32.mxu0 %vm1023_vm0, %v1009_v30 }
  0x93   : > { %6243 = vmatmul.mubr.msk.f32.gmra.mxu1 %vm1023_vm0, %v1008_v29 }
  0x94   : > { %6245 = vmatprep.mubr.msk.f32.mxu1 %vm1023_vm0, %v1009_v30 }
  0x95   : > { %6166 = vmatmul.mubr.msk.f32.gmra.mxu0 %vm1023_vm0, %v1010_v31 }
  0x96   : > { %6168 = vmatprep.mubr.msk.f32.mxu0 %vm1023_vm0, %v1011_v32 }
  0x97   : > { %6246 = vmatmul.mubr.msk.f32.gmra.mxu1 %vm1023_vm0, %v1010_v31 }
  0x98   : > { %6248 = vmatprep.mubr.msk.f32.mxu1 %vm1023_vm0, %v1011_v32 }
  0x99   : > { %6169 = vmatmul.mubr.msk.f32.gmra.mxu0 %vm1023_vm0, %v1012_v33 }
  0x9a   : > { %6171 = vmatprep.mubr.msk.f32.mxu0 %vm1023_vm0, %v1013_v34 }
  0x9b   : > { %6249 = vmatmul.mubr.msk.f32.gmra.mxu1 %vm1023_vm0, %v1012_v33 }
  0x9c   : > { %6251 = vmatprep.mubr.msk.f32.mxu1 %vm1023_vm0, %v1013_v34 }
  0x9d   : > { %6172 = vmatmul.mubr.msk.f32.gmra.mxu0 %vm1023_vm0, %v1014_v35 }
  0x9e   : > { %6174 = vmatprep.mubr.msk.f32.mxu0 %vm1023_vm0, %v1015_v36 }
  0x9f   : > { %6252 = vmatmul.mubr.msk.f32.gmra.mxu1 %vm1023_vm0, %v1014_v35 }
  0xa0   : > { %6254 = vmatprep.mubr.msk.f32.mxu1 %vm1023_vm0, %v1015_v36 }
  0xa1   : > { %6175 = vmatmul.mubr.msk.f32.gmra.mxu0 %vm1023_vm0, %v1016_v37 }
  0xa2   : > { %6177 = vmatprep.mubr.msk.f32.mxu0 %vm1023_vm0, %v1017_v38 }
  0xa3   : > { %6255 = vmatmul.mubr.msk.f32.gmra.mxu1 %vm1023_vm0, %v1016_v37 }
  0xa4   : > { %6257 = vmatprep.mubr.msk.f32.mxu1 %vm1023_vm0, %v1017_v38 }
  0xa5   : > { %6178 = vmatmul.mubr.msk.f32.gmra.mxu0 %vm1023_vm0, %v1018_v39 }
  0xa6   : > { %6180 = vmatprep.mubr.msk.f32.mxu0 %vm1023_vm0, %v1019_v40 }
  0xa7   : > { %6258 = vmatmul.mubr.msk.f32.gmra.mxu1 %vm1023_vm0, %v1018_v39 }
  0xa8   : > { %6260 = vmatprep.mubr.msk.f32.mxu1 %vm1023_vm0, %v1019_v40 }
  0xa9   : > { %6181 = vmatmul.mubr.msk.f32.gmra.mxu0 %vm1023_vm0, %v1020_v41 }
  0xaa   : > { %6183 = vmatprep.mubr.msk.f32.mxu0 %vm1023_vm0, %v1021_v44 }
  0xab   : > { %6261 = vmatmul.mubr.msk.f32.gmra.mxu1 %vm1023_vm0, %v1020_v41 }
  0xac   : > { %6263 = vmatprep.mubr.msk.f32.mxu1 %vm1023_vm0, %v1021_v44 }
  0xad   : > { %6184 = vmatmul.mubr.msk.f32.gmra.mxu0 %vm1023_vm0, %v1022_v45 }
  0xaf   : > { %6264 = vmatmul.mubr.msk.f32.gmra.mxu1 %vm1023_vm0, %v1022_v45 }
  0xb0   : > { %6306 = vmatprep.mubr.msk.f32.mxu1 %vm1023_vm0, %v959_v50 }
  0xb3   : > { %6307 = vmatmul.mubr.msk.f32.vlgmr.msra.gmra.mxu1 %vm1023_vm0, %v960_v51 }
  0xb4   : > { %6309 = vmatprep.mubr.msk.f32.mxu1 %vm1023_vm0, %v961_v52 }
  0xb7   : > { %6310 = vmatmul.mubr.msk.f32.gmra.mxu1 %vm1023_vm0, %v962_v53 }
  0xb8   : > { %6312 = vmatprep.mubr.msk.f32.mxu1 %vm1023_vm0, %v963_v54 }
  0xbb   : > { %6313 = vmatmul.mubr.msk.f32.gmra.mxu1 %vm1023_vm0, %v964_v55 }
  0xbc   : > { %6315 = vmatprep.mubr.msk.f32.mxu1 %vm1023_vm0, %v965_v56 }
  0xbf   : > { %6316 = vmatmul.mubr.msk.f32.gmra.mxu1 %vm1023_vm0, %v966_v57 }
  0xc0   : > { %6318 = vmatprep.mubr.msk.f32.mxu1 %vm1023_vm0, %v967_v58 }
  0xc3   : > { %6319 = vmatmul.mubr.msk.f32.gmra.mxu1 %vm1023_vm0, %v968_v59 }
  0xc4   : > { %6321 = vmatprep.mubr.msk.f32.mxu1 %vm1023_vm0, %v969_v60 }
  0xc7   : > { %6322 = vmatmul.mubr.msk.f32.gmra.mxu1 %vm1023_vm0, %v970_v61 }
  0xc8   : > { %6324 = vmatprep.mubr.msk.f32.mxu1 %vm1023_vm0, %v971_v62 }
  0xcb   : > { %6325 = vmatmul.mubr.msk.f32.gmra.mxu1 %vm1023_vm0, %v972_v63 }
  0xcc   : > { %6327 = vmatprep.mubr.msk.f32.mxu1 %vm1023_vm0, %v973_v0 }
  0xcf   : > { %6328 = vmatmul.mubr.msk.f32.gmra.mxu1 %vm1023_vm0, %v974_v1 }
 0x111   : > { %v6116_v2 = vpop.f32.mrf.mxu0 }
 0x112   : > { %v1779_v28 = vmul.f32 %v6116_v2, %v6116_v2 }
 0x113   : > { %v1234_v3 = vpop.f32.mrf.mxu0  ;;  %v7462_v2 = vpop.f32.mrf.mxu1 }
 0x114   : > { %v1778_v29 = vmul.f32 %v1234_v3, %v1234_v3  ;;  %v1831_v38 = vsel %vm1023_vm0, %v1779_v28, 0.0 }
 0x115   : > { %v6119_v4 = vpop.f32.mrf.mxu0 }
 0x116   : > { %v1781_v30 = vmul.f32 %v6119_v4, %v6119_v4  ;;  %v1826_v39 = vsel %vm1023_vm0, %v1778_v29, 0.0 }
 0x117   : > { %v1244_v5 = vpop.f32.mrf.mxu0 }
 0x118   : > { %v1780_v31 = vmul.f32 %v1244_v5, %v1244_v5  ;;  %v1841_v40 = vsel %vm1023_vm0, %v1781_v30, 0.0 }
 0x119   : > { %v6122_v6 = vpop.f32.mrf.mxu0 }
 0x11a   : > { %v1783_v32 = vmul.f32 %v6122_v6, %v6122_v6  ;;  %v1836_v41 = vsel %vm1023_vm0, %v1780_v31, 0.0 }
 0x11b   : > { %v1254_v7 = vpop.f32.mrf.mxu0 }
 0x11c   : > { %v1782_v34 = vmul.f32 %v1254_v7, %v1254_v7  ;;  %v1851_v42 = vsel %vm1023_vm0, %v1783_v32, 0.0 }
 0x11d   : > { %v6125_v8 = vpop.f32.mrf.mxu0 }
 0x11e   : > { %v1785_v35 = vmul.f32 %v6125_v8, %v6125_v8  ;;  %v1846_v44 = vsel %vm1023_vm0, %v1782_v34, 0.0 }
 0x11f   : > { %v1264_v9 = vpop.f32.mrf.mxu0 }
 0x120   : > { %v1784_v36 = vmul.f32 %v1264_v9, %v1264_v9  ;;  %v1861_v45 = vsel %vm1023_vm0, %v1785_v35, 0.0 }
 0x121   : > { %v6128_v10 = vpop.f32.mrf.mxu0 }
 0x122   : > { %v1787_v46 = vmul.f32 %v6128_v10, %v6128_v10  ;;  %v1856_v48 = vsel %vm1023_vm0, %v1784_v36, 0.0 }
 0x123   : > { %v1274_v11 = vpop.f32.mrf.mxu0 }
 0x124   : > { %v1786_v47 = vmul.f32 %v1274_v11, %v1274_v11  ;;  %v1871_v62 = vsel %vm1023_vm0, %v1787_v46, 0.0 }
 0x125   : > { %v6131_v12 = vpop.f32.mrf.mxu0 }
 0x126   : > { %v1789_v49 = vmul.f32 %v6131_v12, %v6131_v12  ;;  %v1866_v63 = vsel %vm1023_vm0, %v1786_v47, 0.0 }
 0x127   : > { %v1284_v13 = vpop.f32.mrf.mxu0 }
 0x128   : > { %v1788_v50 = vmul.f32 %v1284_v13, %v1284_v13  ;;  %v7465_v3 = vsel %vm1023_vm0, %v1789_v49, 0.0 }
 0x129   : > { %v6134_v14 = vpop.f32.mrf.mxu0 }
 0x12a   : > { %v1791_v51 = vmul.f32 %v6134_v14, %v6134_v14  ;;  %v7468_v4 = vsel %vm1023_vm0, %v1788_v50, 0.0 }
 0x12b   : > { %v1294_v15 = vpop.f32.mrf.mxu0 }
 0x12c   : > { %v1790_v53 = vmul.f32 %v1294_v15, %v1294_v15  ;;  %v7471_v5 = vsel %vm1023_vm0, %v1791_v51, 0.0 }
 0x12d   : > { %v6137_v16 = vpop.f32.mrf.mxu0 }
 0x12e   : > { %v1793_v54 = vmul.f32 %v6137_v16, %v6137_v16  ;;  %v7474_v8 = vsel %vm1023_vm0, %v1790_v53, 0.0 }
 0x12f   : > { %v1304_v17 = vpop.f32.mrf.mxu0 }
 0x130   : > { %v1792_v57 = vmul.f32 %v1304_v17, %v1304_v17  ;;  %v7477_v9 = vsel %vm1023_vm0, %v1793_v54, 0.0 }
 0x131   : > { %v6140_v18 = vpop.f32.mrf.mxu0 }
 0x132   : > { %v1795_v55 = vmul.f32 %v6140_v18, %v6140_v18  ;;  %v7482_v12 = vsel %vm1023_vm0, %v1792_v57, 0.0 }
 0x133   : > { %v1314_v19 = vpop.f32.mrf.mxu0 }
 0x134   : > { %v1794_v56 = vmul.f32 %v1314_v19, %v1314_v19  ;;  %v1832_v10 = vsel %vm1023_vm0, %v1795_v55, 0.0 }
 0x135   : > { %v6143_v20 = vpop.f32.mrf.mxu0 }
 0x136   : > { %v1797_v58 = vmul.f32 %v6143_v20, %v6143_v20  ;;  %v1827_v11 = vsel %vm1023_vm0, %v1794_v56, 0.0 }
 0x137   : > { %v1324_v21 = vpop.f32.mrf.mxu0 }
 0x138   : > { %v1796_v59 = vmul.f32 %v1324_v21, %v1324_v21  ;;  %v1842_v13 = vsel %vm1023_vm0, %v1797_v58, 0.0  ;;  %v7489_v21 = vpop.f32.mrf.mxu1 }
 0x139   : > { %v6146_v22 = vpop.f32.mrf.mxu0  ;;  %v1843_v29 = vadd.f32 %v1842_v13, %v1841_v40 }
 0x13a   : > { %v1799_v60 = vmul.f32 %v6146_v22, %v6146_v22  ;;  %v1837_v14 = vsel %vm1023_vm0, %v1796_v59, 0.0  ;;  %v1833_v22 = vadd.f32 %v1832_v10, %v1831_v38 }
 0x13b   : > { %v1334_v23 = vpop.f32.mrf.mxu0  ;;  %v1838_v30 = vadd.f32 %v1837_v14, %v1836_v41 }
 0x13c   : > { %v1798_v0 = vmul.f32 %v1334_v23, %v1334_v23  ;;  %v1852_v15 = vsel %vm1023_vm0, %v1799_v60, 0.0  ;;  %v1828_v23 = vadd.f32 %v1827_v11, %v1826_v39 }
 0x13d   : > { %v6149_v24 = vpop.f32.mrf.mxu0  ;;  %v1853_v34 = vadd.f32 %v1852_v15, %v1851_v42 }
 0x13e   : > { %v1801_v1 = vmul.f32 %v6149_v24, %v6149_v24  ;;  %v1847_v17 = vsel %vm1023_vm0, %v1798_v0, 0.0 }
 0x13f   : > { %v1344_v25 = vpop.f32.mrf.mxu0  ;;  %v1848_v35 = vadd.f32 %v1847_v17, %v1846_v44 }
 0x140   : > { %v1800_v6 = vmul.f32 %v1344_v25, %v1344_v25  ;;  %v1862_v18 = vsel %vm1023_vm0, %v1801_v1, 0.0 }
 0x141   : > { %v6152_v26 = vpop.f32.mrf.mxu0  ;;  %v1863_v36 = vadd.f32 %v1862_v18, %v1861_v45 }
 0x142   : > { %v1803_v19 = vmul.f32 %v6152_v26, %v6152_v26  ;;  %v1857_v24 = vsel %vm1023_vm0, %v1800_v6, 0.0 }
 0x143   : > { %v1354_v27 = vpop.f32.mrf.mxu0  ;;  %v7495_v47 = vadd.f32 %v1857_v24, %v1856_v48 }
 0x144   : > { %v1802_v25 = vmul.f32 %v1354_v27, %v1354_v27  ;;  %v1872_v38 = vsel %vm1023_vm0, %v1803_v19, 0.0  ;;  %v7499_v27 = vpop.f32.mrf.mxu1 }
 0x145   : > { %v7446_v33 = vpop.f32.mrf.mxu0  ;;  %v1873_v56 = vadd.f32 %v1872_v38, %v1871_v62 }
 0x146   : > { %v1867_v40 = vsel %vm1023_vm0, %v1802_v25, 0.0  ;;  %v1805_v41 = vmul.f32 %v7446_v33, %v7446_v33  ;;  %v7516_v60 = vpop.f32.mrf.mxu1 }
 0x147   : > { %v7448_v37 = vpop.f32.mrf.mxu0 }
 0x148   : > { %v1804_v45 = vmul.f32 %v7448_v37, %v7448_v37  ;;  %v1868_v37 = vadd.f32 %v1867_v40, %v1866_v63  ;;  %v7533_v17 = vpop.f32.mrf.mxu1 }
 0x149   : > { %v7455_v43 = vpop.f32.mrf.mxu0 }
 0x14a   : > { %v1807_v48 = vmul.f32 %v7455_v43, %v7455_v43  ;;  %v1882_v43 = vsel %vm1023_vm0, %v1805_v41, 0.0 }
 0x14b   : > { %v1374_v52 = vpop.f32.mrf.mxu0  ;;  %v1883_v13 = vadd.f32 %v1882_v43, %v7465_v3 }
 0x14c   : > { %v1806_v53 = vmul.f32 %v1374_v52, %v1374_v52  ;;  %v1892_v1 = vsel %vm1023_vm0, %v1807_v48, 0.0 }
 0x14d   : > { %v6161_v61 = vpop.f32.mrf.mxu0  ;;  %v7539_v19 = vadd.f32 %v1892_v1, %v7471_v5 }
 0x14e   : > { %v1809_v54 = vmul.f32 %v6161_v61, %v6161_v61  ;;  %v1877_v61 = vsel %vm1023_vm0, %v1804_v45, 0.0 }
 0x14f   : > { %v1384_v7 = vpop.f32.mrf.mxu0  ;;  %v7536_v18 = vadd.f32 %v1877_v61, %v7468_v4 }
 0x150   : > { %v1808_v57 = vmul.f32 %v1384_v7, %v1384_v7  ;;  %v1887_v7 = vsel %vm1023_vm0, %v1806_v53, 0.0  ;;  %v1902_v10 = vsel %vm1023_vm0, %v1809_v54, 0.0 }
 0x151   : > { %v6164_v16 = vpop.f32.mrf.mxu0  ;;  %v7545_v3 = vadd.f32 %v1887_v7, %v7474_v8 }
 0x152   : > { %v1811_v20 = vmul.f32 %v6164_v16, %v6164_v16  ;;  %v1897_v14 = vsel %vm1023_vm0, %v1808_v57, 0.0 }
 0x153   : > { %v1394_v28 = vpop.f32.mrf.mxu0  ;;  %v7552_v4 = vadd.f32 %v1897_v14, %v7482_v12 }
 0x154   : > { %v1834_v31 = vsel %vm1023_vm0, %v1811_v20, 0.0  ;;  %v1810_v32 = vmul.f32 %v1394_v28, %v1394_v28 }
 0x155   : > { %v7493_v46 = vadd.f32 %v1834_v31, %v1833_v22  ;;  %v6167_v26 = vpop.f32.mrf.mxu0 }
 0x156   : > { %v1829_v39 = vsel %vm1023_vm0, %v1810_v32, 0.0  ;;  %v1813_v49 = vmul.f32 %v6167_v26, %v6167_v26 }
 0x157   : > { %6684 = vrsqrt.f32 %v7493_v46  ;;  %v7505_v42 = vadd.f32 %v1829_v39, %v1828_v23  ;;  %v1404_v44 = vpop.f32.mrf.mxu0  ;;  %v7548_v23 = vadd.f32 %v1902_v10, %v7477_v9  ;;  %vm1915_vm1 = vcmp.eq.f32.partialorder %v7493_v46, inf }
 0x158   : > { %v1844_v50 = vsel %vm1023_vm0, %v1813_v49, 0.0  ;;  %v1812_v51 = vmul.f32 %v1404_v44, %v1404_v44  ;;  %vm1917_vm2 = vcmp.eq.f32.partialorder %v7493_v46, 0.0  ;;  %v1918_v9 = vand.u32 2147483648, %v7493_v46 }
 0x159   : > { %6686 = vrsqrt.f32 %v7505_v42  ;;  %v7513_v55 = vadd.f32 %v1844_v50, %v1843_v29  ;;  %v6170_v33 = vpop.f32.mrf.mxu0  ;;  %vm1908_vm3 = vcmp.eq.f32.partialorder %v7505_v42, inf  ;;  %vm1910_vm4 = vcmp.eq.f32.partialorder %v7505_v42, 0.0 }
 0x15a   : > { %v1839_v58 = vsel %vm1023_vm0, %v1812_v51, 0.0  ;;  %v1815_v59 = vmul.f32 %v6170_v33, %v6170_v33 }
 0x15b   : > { %6688 = vrsqrt.f32 %v7513_v55  ;;  %v7520_v0 = vadd.f32 %v1839_v58, %v1838_v30  ;;  %v1414_v52 = vpop.f32.mrf.mxu0  ;;  %v7561_v30 = vpop.f32.mrf.mxu1  ;;  %vm1929_vm5 = vcmp.eq.f32.partialorder %v7513_v55, inf  ;;  %v1932_v39 = vand.u32 2147483648, %v7513_v55 }
 0x15c   : > { %v1854_v62 = vsel %vm1023_vm0, %v1815_v59, 0.0  ;;  %v1814_v6 = vmul.f32 %v1414_v52, %v1414_v52  ;;  %vm1931_vm8 = vcmp.eq.f32.partialorder %v7513_v55, 0.0 }
 0x15d   : > { %6690 = vrsqrt.f32 %v7520_v0  ;;  %v7528_v63 = vadd.f32 %v1854_v62, %v1853_v34  ;;  %v6173_v11 = vpop.f32.mrf.mxu0  ;;  %vm1922_vm6 = vcmp.eq.f32.partialorder %v7520_v0, inf  ;;  %vm1924_vm7 = vcmp.eq.f32.partialorder %v7520_v0, 0.0  ;;  %v7581_v44 = vpop.f32.mrf.mxu1 }
 0x15e   : > { %v1849_v15 = vsel %vm1023_vm0, %v1814_v6, 0.0  ;;  %v1817_v16 = vmul.f32 %v6173_v11, %v6173_v11  ;;  %v1925_v51 = vand.u32 2147483648, %v7520_v0 }
 0x15f   : > { %6692 = vrsqrt.f32 %v7528_v63  ;;  %v7542_v20 = vadd.f32 %v1849_v15, %v1848_v35  ;;  %v1424_v22 = vpop.f32.mrf.mxu0  ;;  %vm1943_vm9 = vcmp.eq.f32.partialorder %v7528_v63, inf  ;;  %v1946_v62 = vand.u32 2147483648, %v7528_v63  ;;  %v7604_v6 = vpop.f32.mrf.mxu1 }
 0x160   : > { %v1864_v24 = vsel %vm1023_vm0, %v1817_v16, 0.0  ;;  %v1816_v25 = vmul.f32 %v1424_v22, %v1424_v22  ;;  %vm1945_vm12 = vcmp.eq.f32.partialorder %v7528_v63, 0.0 }
 0x161   : > { %6694 = vrsqrt.f32 %v7542_v20  ;;  %v7555_v5 = vadd.f32 %v1864_v24, %v1863_v36  ;;  %v6176_v28 = vpop.f32.mrf.mxu0  ;;  %v1911_v36 = vand.u32 2147483648, %v7505_v42  ;;  %vm1936_vm10 = vcmp.eq.f32.partialorder %v7542_v20, inf }
 0x162   : > { %v1859_v29 = vsel %vm1023_vm0, %v1816_v25, 0.0  ;;  %v1819_v8 = vmul.f32 %v6176_v28, %v6176_v28  ;;  %vm1938_vm11 = vcmp.eq.f32.partialorder %v7542_v20, 0.0 }
 0x163   : > { %6696 = vrsqrt.f32 %v7555_v5  ;;  %v7565_v12 = vadd.f32 %v1859_v29, %v7495_v47  ;;  %v1434_v31 = vpop.f32.mrf.mxu0  ;;  %vm1957_vm13 = vcmp.eq.f32.partialorder %v7555_v5, inf }
 0x164   : > { %v6685_v32 = vpop.eup %6684  ;;  %v1874_v34 = vsel %vm1023_vm0, %v1819_v8, 0.0  ;;  %v1818_v35 = vmul.f32 %v1434_v31, %v1434_v31 }
 0x165   : > { %6698 = vrsqrt.f32 %v7565_v12  ;;  %v7573_v26 = vadd.f32 %v1874_v34, %v1873_v56  ;;  %v6179_v38 = vpop.f32.mrf.mxu0  ;;  %v1914_v47 = vmul.f32 %v6685_v32, %v7493_v46  ;;  %vm1950_vm14 = vcmp.eq.f32.partialorder %v7565_v12, inf }
 0x166   : > { %v6687_v49 = vpop.eup %6686  ;;  %v1869_v40 = vsel %vm1023_vm0, %v1818_v35, 0.0  ;;  %v1821_v41 = vmul.f32 %v6179_v38, %v6179_v38  ;;  %v1939_v38 = vand.u32 2147483648, %v7542_v20  ;;  %vm1952_vm15 = vcmp.eq.f32.partialorder %v7565_v12, 0.0 }
 0x167   : > { %6700 = vrsqrt.f32 %v7573_v26  ;;  %v7584_v45 = vadd.f32 %v1869_v40, %v1868_v37  ;;  %v1444_v48 = vpop.f32.mrf.mxu0  ;;  %v1907_v50 = vmul.f32 %v6687_v49, %v7505_v42  ;;  %v1916_v56 = vsel %vm1915_vm1, %v7493_v46, %v1914_v47 }
 0x168   : > { %v6689_v53 = vpop.eup %6688  ;;  %v1884_v54 = vsel %vm1023_vm0, %v1821_v41, 0.0  ;;  %v1820_v33 = vmul.f32 %v1444_v48, %v1444_v48  ;;  %v1919_v11 = vsel %vm1917_vm2, %v1918_v9, %v1916_v56  ;;  %v7632_v9 = vpop.f32.mrf.mxu1  ;;  %vm1959_vm1 = vcmp.eq.f32.partialorder %v7555_v5, 0.0 }
 0x169   : > { %6702 = vrsqrt.f32 %v7584_v45  ;;  %v7594_v57 = vadd.f32 %v1884_v54, %v1883_v13  ;;  %v6182_v58 = vpop.f32.mrf.mxu0  ;;  %v1909_v59 = vsel %vm1908_vm3, %v7505_v42, %v1907_v50  ;;  %v1928_v37 = vmul.f32 %v6689_v53, %v7513_v55 }
 0x16a   : > { %v6691_v43 = vpop.eup %6690  ;;  %v1879_v52 = vsel %vm1023_vm0, %v1820_v33, 0.0  ;;  %v1823_v61 = vmul.f32 %v6182_v58, %v6182_v58  ;;  %v1912_v1 = vsel %vm1910_vm4, %v1911_v36, %v1909_v59  ;;  %v7661_v48 = vpop.f32.mrf.mxu1  ;;  %v1960_v54 = vand.u32 2147483648, %v7555_v5 }
 0x16b   : > { %6704 = vrsqrt.f32 %v7594_v57  ;;  %v7608_v7 = vadd.f32 %v1879_v52, %v7536_v18  ;;  %v1454_v10 = vpop.f32.mrf.mxu0  ;;  %6274 = vmatprep.mubr.msk.f32.mxu0 %vm1023_vm0, %v1912_v1  ;;  %v1921_v13 = vmul.f32 %v6691_v43, %v7520_v0  ;;  %v1930_v16 = vsel %vm1929_vm5, %v7513_v55, %v1928_v37 }
 0x16c   : > { %v6693_v14 = vpop.eup %6692  ;;  %v1894_v42 = vsel %vm1023_vm0, %v1823_v61, 0.0  ;;  %v1822_v15 = vmul.f32 %v1454_v10, %v1454_v10  ;;  %6275 = vmatmul.mubr.msk.f32.vlgmr.msra.gmra.mxu0 %vm1023_vm0, %v1919_v11  ;;  %v1933_v32 = vsel %vm1931_vm8, %v1932_v39, %v1930_v16  ;;  %v7679_v59 = vpop.f32.mrf.mxu1  ;;  %vm1971_vm2 = vcmp.eq.f32.partialorder %v7573_v26, inf }
 0x16d   : > { %6706 = vrsqrt.f32 %v7608_v7  ;;  %v7622_v18 = vadd.f32 %v1894_v42, %v7539_v19  ;;  %v6185_v46 = vpop.f32.mrf.mxu0  ;;  %v1923_v22 = vsel %vm1922_vm6, %v7520_v0, %v1921_v13  ;;  %v1942_v24 = vmul.f32 %v6693_v14, %v7528_v63 }
 0x16e   : > { %v6695_v25 = vpop.eup %6694  ;;  %v1889_v28 = vsel %vm1023_vm0, %v1822_v15, 0.0  ;;  %v1825_v29 = vmul.f32 %v6185_v46, %v6185_v46  ;;  %v1926_v8 = vsel %vm1924_vm7, %v1925_v51, %v1923_v22  ;;  %vm1964_vm3 = vcmp.eq.f32.partialorder %v7584_v45, inf  ;;  %v7693_v13 = vpop.f32.mrf.mxu1 }
 0x16f   : > { %6708 = vrsqrt.f32 %v7622_v18  ;;  %v7636_v19 = vadd.f32 %v1889_v28, %v7545_v3  ;;  %v1464_v31 = vpop.f32.mrf.mxu0  ;;  %6277 = vmatprep.mubr.msk.f32.mxu0 %vm1023_vm0, %v1926_v8  ;;  %v1935_v34 = vmul.f32 %v6695_v25, %v7542_v20  ;;  %v1944_v3 = vsel %vm1943_vm9, %v7528_v63, %v1942_v24 }
 0x170   : > { %v6697_v35 = vpop.eup %6696  ;;  %v1904_v0 = vsel %vm1023_vm0, %v1825_v29, 0.0  ;;  %v1824_v36 = vmul.f32 %v1464_v31, %v1464_v31  ;;  %6278 = vmatmul.mubr.msk.f32.gmra.mxu0 %vm1023_vm0, %v1933_v32  ;;  %v1947_v50 = vsel %vm1945_vm12, %v1946_v62, %v1944_v3  ;;  %v1953_v63 = vand.u32 2147483648, %v7565_v12  ;;  %v7707_v28 = vpop.f32.mrf.mxu1 }
 0x171   : > { %6710 = vrsqrt.f32 %v7636_v19  ;;  %v7650_v47 = vadd.f32 %v1904_v0, %v7548_v23  ;;  %v1937_v55 = vsel %vm1936_vm10, %v7542_v20, %v1935_v34  ;;  %v1956_v39 = vmul.f32 %v6697_v35, %v7555_v5 }
 0x172   : > { %v6699_v49 = vpop.eup %6698  ;;  %v1899_v40 = vsel %vm1023_vm0, %v1824_v36, 0.0  ;;  %v1940_v41 = vsel %vm1938_vm11, %v1939_v38, %v1937_v55  ;;  %vm1966_vm4 = vcmp.eq.f32.partialorder %v7584_v45, 0.0  ;;  %v1974_v1 = vand.u32 2147483648, %v7573_v26  ;;  %v7721_v38 = vpop.f32.mrf.mxu1 }
 0x173   : > { %6712 = vrsqrt.f32 %v7650_v47  ;;  %v7665_v23 = vadd.f32 %v1899_v40, %v7552_v4  ;;  %6280 = vmatprep.mubr.msk.f32.mxu0 %vm1023_vm0, %v1940_v41  ;;  %v1949_v51 = vmul.f32 %v6699_v49, %v7565_v12  ;;  %v1958_v20 = vsel %vm1957_vm13, %v7555_v5, %v1956_v39 }
 0x174   : > { %v6701_v53 = vpop.eup %6700  ;;  %6281 = vmatmul.mubr.msk.f32.gmra.mxu0 %vm1023_vm0, %v1947_v50  ;;  %v1961_v37 = vsel %vm1959_vm1, %v1960_v54, %v1958_v20  ;;  %vm1973_vm5 = vcmp.eq.f32.partialorder %v7573_v26, 0.0  ;;  %vm1985_vm6 = vcmp.eq.f32.partialorder %v7594_v57, inf  ;;  %vm1978_vm7 = vcmp.eq.f32.partialorder %v7608_v7, inf  ;;  %v7734_v41 = vpop.f32.mrf.mxu1 }
 0x175   : > { %6714 = vrsqrt.f32 %v7665_v23  ;;  %v1951_v4 = vsel %vm1950_vm14, %v7565_v12, %v1949_v51  ;;  %v1970_v33 = vmul.f32 %v6701_v53, %v7573_v26  ;;  %v1967_v12 = vand.u32 2147483648, %v7584_v45 }
 0x176   : > { %v6703_v56 = vpop.eup %6702  ;;  %v1954_v58 = vsel %vm1952_vm15, %v1953_v63, %v1951_v4  ;;  %vm1980_vm8 = vcmp.eq.f32.partialorder %v7608_v7, 0.0  ;;  %v1988_v46 = vand.u32 2147483648, %v7594_v57  ;;  %vm1987_vm9 = vcmp.eq.f32.partialorder %v7594_v57, 0.0  ;;  %v7738_v51 = vpop.f32.mrf.mxu1 }
 0x177   : > { %6283 = vmatprep.mubr.msk.f32.mxu0 %vm1023_vm0, %v1954_v58  ;;  %v1963_v43 = vmul.f32 %v6703_v56, %v7584_v45  ;;  %v1972_v61 = vsel %vm1971_vm2, %v7573_v26, %v1970_v33  ;;  %vm1999_vm10 = vcmp.eq.f32.partialorder %v7622_v18, inf  ;;  %vm1992_vm11 = vcmp.eq.f32.partialorder %v7636_v19, inf }
 0x178   : > { %v6705_v52 = vpop.eup %6704  ;;  %6284 = vmatmul.mubr.msk.f32.gmra.mxu0 %vm1023_vm0, %v1961_v37  ;;  %v1975_v14 = vsel %vm1973_vm5, %v1974_v1, %v1972_v61  ;;  %vm1994_vm12 = vcmp.eq.f32.partialorder %v7636_v19, 0.0  ;;  %v2002_v34 = vand.u32 2147483648, %v7622_v18  ;;  %vm2001_vm13 = vcmp.eq.f32.partialorder %v7622_v18, 0.0  ;;  %v7740_v53 = vpop.f32.mrf.mxu1 }
 0x179   : > { %v1965_v5 = vsel %vm1964_vm3, %v7584_v45, %v1963_v43  ;;  %v1984_v62 = vmul.f32 %v6705_v52, %v7594_v57  ;;  %v1981_v45 = vand.u32 2147483648, %v7608_v7  ;;  %vm2013_vm14 = vcmp.eq.f32.partialorder %v7650_v47, inf }
 0x17a   : > { %v6707_v10 = vpop.eup %6706  ;;  %v1968_v11 = vsel %vm1966_vm4, %v1967_v12, %v1965_v5  ;;  %vm2006_vm15 = vcmp.eq.f32.partialorder %v7665_v23, inf  ;;  %vm2008_vm1 = vcmp.eq.f32.partialorder %v7665_v23, 0.0  ;;  %vm2015_vm2 = vcmp.eq.f32.partialorder %v7650_v47, 0.0  ;;  %v7742_v63 = vpop.f32.mrf.mxu1 }
 0x17b   : > { %6286 = vmatprep.mubr.msk.f32.mxu0 %vm1023_vm0, %v1968_v11  ;;  %v1977_v42 = vmul.f32 %v6707_v10, %v7608_v7  ;;  %v1986_v16 = vsel %vm1985_vm6, %v7594_v57, %v1984_v62  ;;  %v941_v11 = vld [vmem:[%s9159_s8 + $0x18] sm:$0xff] }
 0x17c   : > { %v6709_v15 = vpop.eup %6708  ;;  %6287 = vmatmul.mubr.msk.f32.gmra.mxu0 %vm1023_vm0, %v1975_v14  ;;  %v1989_v29 = vsel %vm1987_vm9, %v1988_v46, %v1986_v16  ;;  %v7744_v20 = vpop.f32.mrf.mxu1  ;;  %v937_v14 = vld [vmem:[%s9158_s7 + $0x18] sm:$0xff]  ;;  %6362 = vmatprep.subr.mxu1 %v941_v11  ;;  %v939_v16 = vld [vmem:[%s9159_s8 + $0x8] sm:$0xff] }
 0x17d   : > { %v1979_v26 = vsel %vm1978_vm7, %v7608_v7, %v1977_v42  ;;  %v1998_v22 = vmul.f32 %v6709_v15, %v7622_v18  ;;  %v1995_v7 = vand.u32 2147483648, %v7636_v19  ;;  %6330 = vmatprep.subr.mxu0 %v937_v14  ;;  %6363 = vmatpush3.msra.mxu1 %v941_v11  ;;  %v940_v15 = vld [vmem:[%s9159_s8 + $0x10] sm:$0xff] }
 0x17e   : > { %v6711_v24 = vpop.eup %6710  ;;  %v1982_v25 = vsel %vm1980_vm8, %v1981_v45, %v1979_v26  ;;  %6331 = vmatpush3.msra.mxu0 %v937_v14  ;;  %v936_v45 = vld [vmem:[%s9158_s7 + $0x10] sm:$0xff]  ;;  %6364 = vmatprep.subr.mxu1 %v940_v15  ;;  %v935_v26 = vld [vmem:[%s9158_s7 + $0x8] sm:$0xff]  ;;  %v7837_v14 = vld [vmem:[%s9157_s6] ss:$0 sm:$0xff] }
 0x17f   : > { %6289 = vmatprep.mubr.msk.f32.mxu0 %vm1023_vm0, %v1982_v25  ;;  %v1991_v8 = vmul.f32 %v6711_v24, %v7636_v19  ;;  %v2000_v32 = vsel %vm1999_vm10, %v7622_v18, %v1998_v22  ;;  %v2016_v18 = vand.u32 2147483648, %v7650_v47  ;;  %6332 = vmatprep.subr.mxu0 %v936_v45  ;;  %v938_v22 = vld [vmem:[%s9159_s8] sm:$0xff] }
 0x180   : > { %v6713_v31 = vpop.eup %6712  ;;  %6290 = vmatmul.mubr.msk.f32.gmra.mxu0 %vm1023_vm0, %v1989_v29  ;;  %v2003_v3 = vsel %vm2001_vm13, %v2002_v34, %v2000_v32  ;;  %6365 = vmatpush3.msra.mxu1 %v940_v15  ;;  %v934_v24 = vld [vmem:[%s9158_s7] sm:$0xff]  ;;  %v7819_v32 = vld [vmem:[%s9162_s11 + $0x8] sm:$0xff] }
 0x181   : > { %v1993_v57 = vsel %vm1992_vm11, %v7636_v19, %v1991_v8  ;;  %v2012_v35 = vmul.f32 %v6713_v31, %v7650_v47  ;;  %v2009_v19 = vand.u32 2147483648, %v7665_v23  ;;  %6333 = vmatpush3.msra.mxu0 %v936_v45  ;;  %6366 = vmatprep.subr.mxu1 %v939_v16 }
 0x182   : > { %v6715_v0 = vpop.eup %6714  ;;  %v1996_v36 = vsel %vm1994_vm12, %v1995_v7, %v1993_v57  ;;  %6334 = vmatprep.subr.mxu0 %v935_v26  ;;  %6367 = vmatpush3.msra.mxu1 %v939_v16 }
 0x183   : > { %6292 = vmatprep.mubr.msk.f32.mxu0 %vm1023_vm0, %v1996_v36  ;;  %v2005_v55 = vmul.f32 %v6715_v0, %v7665_v23  ;;  %v2014_v39 = vsel %vm2013_vm14, %v7650_v47, %v2012_v35  ;;  %6335 = vmatpush3.msra.mxu0 %v935_v26 }
 0x184   : > { %6293 = vmatmul.mubr.msk.f32.gmra.mxu0 %vm1023_vm0, %v2003_v3  ;;  %v2017_v50 = vsel %vm2015_vm2, %v2016_v18, %v2014_v39  ;;  %6368 = vmatprep.subr.mxu1 %v938_v22 }
 0x185   : > { %v2007_v49 = vsel %vm2006_vm15, %v7665_v23, %v2005_v55  ;;  %v7746_v23 = vpop.f32.mrf.mxu1  ;;  %6336 = vmatprep.subr.mxu0 %v934_v24  ;;  %6369 = vmatpush3.msra.mxu1 %v938_v22 }
 0x186   : > { %v2010_v40 = vsel %vm2008_vm1, %v2009_v19, %v2007_v49  ;;  %6337 = vmatpush3.msra.mxu0 %v934_v24 }
 0x187   : > { %6295 = vmatprep.mubr.msk.f32.mxu0 %vm1023_vm0, %v2010_v40  ;;  %v7748_v54 = vpop.f32.mrf.mxu1  ;;  %6394 = vmatprep.subr.mxu0 %v7819_v32 }
 0x188   : > { %6296 = vmatmul.mubr.msk.f32.gmra.mxu0 %vm1023_vm0, %v2017_v50 }
 0x189   : > { %v7750_v47 = vpop.f32.mrf.mxu1 }
 0x18b   : > { %v7752_v4 = vpop.f32.mrf.mxu1 }
 0x18d   : > { %v7754_v33 = vpop.f32.mrf.mxu1 }
 0x18f   : > { %v7756_v56 = vpop.f32.mrf.mxu1 }
 0x191   : > { %v7758_v58 = vpop.f32.mrf.mxu1 }
 0x193   : > { %v7760_v37 = vpop.f32.mrf.mxu1 }
 0x195   : > { %v7762_v43 = vpop.f32.mrf.mxu1 }
 0x197   : > { %v7764_v52 = vpop.f32.mrf.mxu1 }
 0x199   : > { %v7766_v12 = vpop.f32.mrf.mxu1 }
 0x19b   : > { %v7768_v61 = vpop.f32.mrf.mxu1 }
 0x19c   : > { %9193 = vst [vmem:[#allocation7_spill] sm:$0xff] %v7768_v61 }
 0x19d   : > { %v7770_v5 = vpop.f32.mrf.mxu1 }
 0x19f   : > { %v7772_v1 = vpop.f32.mrf.mxu1 }
 0x1a0   : > { %9194 = vst [vmem:[#allocation8_spill] sm:$0xff] %v7772_v1 }
 0x1a1   : > { %v7774_v62 = vpop.f32.mrf.mxu1 }
 0x1a2   : > { %9195 = vst [vmem:[#allocation9_spill] sm:$0xff] %v7774_v62 }
 0x1a3   : > { %v7776_v10 = vpop.f32.mrf.mxu1 }
 0x1a4   : > { %9196 = vst [vmem:[#allocation10_spill] sm:$0xff] %v7776_v10 }
 0x1a5   : > { %v7784_v42 = vpop.f32.mrf.mxu1 }
 0x1a6   : > { %9197 = vst [vmem:[#allocation11_spill] sm:$0xff] %v7784_v42 }
 0x1a7   : > { %v7798_v46 = vpop.f32.mrf.mxu1 }
 0x1a8   : > { %9198 = vst [vmem:[#allocation12_spill] sm:$0xff] %v7798_v46 }
 0x1a9   : > { %v7806_v25 = vpop.f32.mrf.mxu1 }
 0x1aa   : > { %9199 = vst [vmem:[#allocation13_spill] sm:$0xff] %v7806_v25 }
 0x1ab   : > { %v7808_v29 = vpop.f32.mrf.mxu1 }
 0x1ac   : > { %9200 = vst [vmem:[#allocation14_spill] sm:$0xff] %v7808_v29 }
 0x1ad   : > { %v7810_v8 = vpop.f32.mrf.mxu1 }
 0x1ae   : > { %9201 = vst [vmem:[#allocation15_spill] sm:$0xff] %v7810_v8 }
 0x1af   : > { %v7812_v31 = vpop.f32.mrf.mxu1 }
 0x1b0   : > { %9202 = vst [vmem:[#allocation16_spill] sm:$0xff] %v7812_v31 }
 0x1b1   : > { %v7814_v7 = vpop.f32.mrf.mxu1 }
 0x1b2   : > { %9203 = vst [vmem:[#allocation17_spill] sm:$0xff] %v7814_v7 }
 0x1b3   : > { %v7822_v57 = vpop.f32.mrf.mxu1 }
 0x1b4   : > { %9204 = vst [vmem:[#allocation18_spill] sm:$0xff] %v7822_v57 }
 0x1b5   : > { %v7824_v34 = vpop.f32.mrf.mxu1 }
 0x1b6   : > { %9205 = vst [vmem:[#allocation19_spill] sm:$0xff] %v7824_v34 }
 0x1b7   : > { %v7826_v35 = vpop.f32.mrf.mxu1 }
 0x1b8   : > { %9206 = vst [vmem:[#allocation20_spill] sm:$0xff] %v7826_v35 }
 0x1b9   : > { %v7828_v0 = vpop.f32.mrf.mxu1 }
 0x1ba   : > { %9207 = vst [vmem:[#allocation21_spill] sm:$0xff] %v7828_v0 }
 0x1bb   : > { %v7830_v36 = vpop.f32.mrf.mxu1 }
 0x1bc   : > { %9208 = vst [vmem:[#allocation22_spill] sm:$0xff] %v7830_v36 }
 0x1bd   : > { %v7832_v3 = vpop.f32.mrf.mxu1 }
 0x1be   : > { %9209 = vst [vmem:[#allocation23_spill] sm:$0xff] %v7832_v3 }
 0x1bf   : > { %v6308_v55 = vpop.f32.mrf.mxu1 }
 0x1c1   : > { %v2325_v19 = vpop.f32.mrf.mxu1 }
 0x1c3   : > { %v6311_v39 = vpop.f32.mrf.mxu1 }
 0x1c5   : > { %v2335_v49 = vpop.f32.mrf.mxu1 }
 0x1c7   : > { %v6314_v18 = vpop.f32.mrf.mxu1 }
 0x1c9   : > { %v2345_v40 = vpop.f32.mrf.mxu1 }
 0x1cb   : > { %v6317_v50 = vpop.f32.mrf.mxu1 }
 0x1cd   : > { %v2355_v11 = vpop.f32.mrf.mxu1 }
 0x1cf   : > { %v6320_v26 = vpop.f32.mrf.mxu1 }
 0x1d1   : > { %v2365_v34 = vpop.f32.mrf.mxu1 }
 0x1d3   : > { %v6323_v29 = vpop.f32.mrf.mxu1 }
 0x1d5   : > { %v2375_v8 = vpop.f32.mrf.mxu1 }
 0x1d7   : > { %v6326_v46 = vpop.f32.mrf.mxu1 }
 0x1d9   : > { %v2385_v10 = vpop.f32.mrf.mxu1 }
 0x22c   : > { %v6276_v15 = vpop.f32.mrf.mxu0 }
 0x22d   : > { %v2331_v45 = vadd.f32 %v6308_v55, %v6276_v15 }
 0x22e   : > { %v2132_v16 = vpop.f32.mrf.mxu0 }
 0x22f   : > { %v7840_v22 = vadd.f32 %v7837_v14, %v2331_v45  ;;  %v2326_v24 = vadd.f32 %v2325_v19, %v2132_v16 }
 0x230   : > { %v6279_v36 = vpop.f32.mrf.mxu0 }
 0x231   : > { %v5500_v3 = vmul.f32 -1.442695, %v7840_v22  ;;  %v7844_v35 = vadd.f32 %v7837_v14, %v2326_v24  ;;  %v2341_v0 = vadd.f32 %v6311_v39, %v6279_v36 }
 0x232   : > { %v2142_v57 = vpop.f32.mrf.mxu0 }
 0x233   : > { %6716 = vpow2.f32 %v5500_v3  ;;  %v5499_v31 = vmul.f32 -1.442695, %v7844_v35  ;;  %v7848_v55 = vadd.f32 %v7837_v14, %v2341_v0  ;;  %v2336_v15 = vadd.f32 %v2335_v49, %v2142_v57 }
 0x234   : > { %v6282_v7 = vpop.f32.mrf.mxu0 }
 0x235   : > { %6718 = vpow2.f32 %v5499_v31  ;;  %v5502_v19 = vmul.f32 -1.442695, %v7848_v55  ;;  %v7852_v45 = vadd.f32 %v7837_v14, %v2336_v15  ;;  %v2351_v16 = vadd.f32 %v6314_v18, %v6282_v7 }
 0x236   : > { %v2152_v24 = vpop.f32.mrf.mxu0 }
 0x237   : > { %6720 = vpow2.f32 %v5502_v19  ;;  %v5501_v36 = vmul.f32 -1.442695, %v7852_v45  ;;  %v7856_v3 = vadd.f32 %v7837_v14, %v2351_v16  ;;  %v2346_v39 = vadd.f32 %v2345_v40, %v2152_v24 }
 0x238   : > { %v6285_v0 = vpop.f32.mrf.mxu0 }
 0x239   : > { %6722 = vpow2.f32 %v5501_v36  ;;  %v5504_v57 = vmul.f32 -1.442695, %v7856_v3  ;;  %v7860_v31 = vadd.f32 %v7837_v14, %v2346_v39  ;;  %v2361_v49 = vadd.f32 %v6317_v50, %v6285_v0 }
 0x23a   : > { %v2162_v15 = vpop.f32.mrf.mxu0 }
 0x23b   : > { %6724 = vpow2.f32 %v5504_v57  ;;  %v5503_v7 = vmul.f32 -1.442695, %v7860_v31  ;;  %v7864_v18 = vadd.f32 %v7837_v14, %v2361_v49  ;;  %v2356_v19 = vadd.f32 %v2355_v11, %v2162_v15 }
 0x23c   : > { %v6288_v16 = vpop.f32.mrf.mxu0 }
 0x23d   : > { %6726 = vpow2.f32 %v5503_v7  ;;  %v5506_v40 = vmul.f32 -1.442695, %v7864_v18  ;;  %v7868_v24 = vadd.f32 %v7837_v14, %v2356_v19  ;;  %v2371_v36 = vadd.f32 %v6320_v26, %v6288_v16 }
 0x23e   : > { %v2172_v39 = vpop.f32.mrf.mxu0 }
 0x23f   : > { %6728 = vpow2.f32 %v5506_v40  ;;  %v5505_v50 = vmul.f32 -1.442695, %v7868_v24  ;;  %v7872_v0 = vadd.f32 %v7837_v14, %v2371_v36  ;;  %v2366_v57 = vadd.f32 %v2365_v34, %v2172_v39 }
 0x240   : > { %v6717_v49 = vpop.eup %6716  ;;  %v6291_v25 = vpop.f32.mrf.mxu0 }
 0x241   : > { %v2475_v11 = vadd.f32 1.0, %v6717_v49  ;;  %6730 = vpow2.f32 %v5505_v50  ;;  %v5508_v15 = vmul.f32 -1.442695, %v7872_v0  ;;  %v7876_v7 = vadd.f32 %v7837_v14, %v2366_v57 }
 0x242   : > { %v6719_v19 = vpop.eup %6718  ;;  %v2381_v26 = vadd.f32 %v6323_v29, %v6291_v25  ;;  %v2182_v16 = vpop.f32.mrf.mxu0 }
 0x243   : > { %6732 = vrcp.f32 %v2475_v11  ;;  %v2474_v40 = vadd.f32 1.0, %v6719_v19  ;;  %v5507_v42 = vmul.f32 -1.442695, %v7876_v7  ;;  %v2376_v36 = vadd.f32 %v2375_v8, %v2182_v16  ;;  %v6329_v19 = vpop.f32.mrf.mxu1 }
 0x244   : > { %v6721_v1 = vpop.eup %6720  ;;  %6734 = vpow2.f32 %v5508_v15  ;;  %v7880_v34 = vadd.f32 %v7837_v14, %v2381_v26  ;;  %v6294_v39 = vpop.f32.mrf.mxu0 }
 0x245   : > { %6736 = vrcp.f32 %v2474_v40  ;;  %v2477_v50 = vadd.f32 1.0, %v6721_v1  ;;  %v7883_v57 = vadd.f32 %v7837_v14, %v2376_v36  ;;  %v2391_v49 = vadd.f32 %v6326_v46, %v6294_v39 }
 0x246   : > { %v6723_v25 = vpop.eup %6722  ;;  %6738 = vpow2.f32 %v5507_v42  ;;  %v5510_v29 = vmul.f32 -1.442695, %v7880_v34  ;;  %v2192_v11 = vpop.f32.mrf.mxu0 }
 0x247   : > { %6740 = vrcp.f32 %v2477_v50  ;;  %v2476_v8 = vadd.f32 1.0, %v6723_v25  ;;  %v5509_v15 = vmul.f32 -1.442695, %v7883_v57  ;;  %v7888_v26 = vadd.f32 %v7837_v14, %v2391_v49  ;;  %v2395_v50 = vpop.f32.mrf.mxu1 }
 0x248   : > { %v6725_v16 = vpop.eup %6724  ;;  %6742 = vpow2.f32 %v5510_v29  ;;  %v2386_v1 = vadd.f32 %v2385_v10, %v2192_v11  ;;  %v6297_v40 = vpop.f32.mrf.mxu0 }
 0x249   : > { %6744 = vrcp.f32 %v2476_v8  ;;  %v2479_v36 = vadd.f32 1.0, %v6725_v16  ;;  %v5512_v46 = vmul.f32 -1.442695, %v7888_v26  ;;  %v2401_v42 = vadd.f32 %v6329_v19, %v6297_v40 }
 0x24a   : > { %v6727_v39 = vpop.eup %6726  ;;  %6746 = vpow2.f32 %v5509_v15  ;;  %v7892_v62 = vadd.f32 %v7837_v14, %v2386_v1  ;;  %v2202_v25 = vpop.f32.mrf.mxu0 }
 0x24b   : > { %6748 = vrcp.f32 %v2479_v36  ;;  %v2478_v61 = vadd.f32 1.0, %v6727_v39  ;;  %v7895_v49 = vadd.f32 %v7837_v14, %v2401_v42  ;;  %v2396_v29 = vadd.f32 %v2395_v50, %v2202_v25 }
 0x24c   : > { %v6729_v10 = vpop.eup %6728  ;;  %6750 = vpow2.f32 %v5512_v46  ;;  %v5511_v11 = vmul.f32 -1.442695, %v7892_v62 }
 0x24d   : > { %6752 = vrcp.f32 %v2478_v61  ;;  %v2481_v8 = vadd.f32 1.0, %v6729_v10  ;;  %v5514_v19 = vmul.f32 -1.442695, %v7895_v49  ;;  %v7900_v15 = vadd.f32 %v7837_v14, %v2396_v29 }
 0x24e   : > { %v6731_v16 = vpop.eup %6730  ;;  %6754 = vpow2.f32 %v5511_v11  ;;  %v944_v11 = vld [vmem:[%s9162_s11] sm:$0xff] }
 0x24f   : > { %6756 = vrcp.f32 %v2481_v8  ;;  %v2480_v1 = vadd.f32 1.0, %v6731_v16  ;;  %v5513_v40 = vmul.f32 -1.442695, %v7900_v15 }
 0x250   : > { %v6733_v36 = vpop.eup %6732  ;;  %6758 = vpow2.f32 %v5514_v19 }
 0x251   : > { %v6735_v42 = vpop.eup %6734  ;;  %6760 = vrcp.f32 %v2480_v1  ;;  %v2523_v14 = vmul.f32 %v6733_v36, %v7840_v22 }
 0x252   : > { %v6737_v46 = vpop.eup %6736  ;;  %v2483_v39 = vadd.f32 1.0, %v6735_v42  ;;  %6762 = vpow2.f32 %v5513_v40 }
 0x253   : > { %v6739_v61 = vpop.eup %6738  ;;  %v2522_v50 = vmul.f32 %v6737_v46, %v7844_v35 }
 0x254   : > { %v6741_v25 = vpop.eup %6740  ;;  %v2482_v29 = vadd.f32 1.0, %v6739_v61  ;;  %6764 = vrcp.f32 %v2483_v39 }
 0x255   : > { %v6743_v10 = vpop.eup %6742  ;;  %6338 = vmatprep.mubr.msk.f32.mxu0 %vm1023_vm0, %v2522_v50  ;;  %6370 = vmatprep.mubr.msk.f32.mxu1 %vm1023_vm0, %v2522_v50  ;;  %v2525_v1 = vmul.f32 %v6741_v25, %v7848_v55 }
 0x256   : > { %v6745_v8 = vpop.eup %6744  ;;  %6766 = vrcp.f32 %v2482_v29  ;;  %v2485_v19 = vadd.f32 1.0, %v6743_v10  ;;  %6339 = vmatmul.mubr.msk.f32.vlgmr.msra.gmra.mxu0 %vm1023_vm0, %v2523_v14  ;;  %6371 = vmatmul.mubr.msk.f32.vlgmr.msra.gmra.mxu1 %vm1023_vm0, %v2523_v14 }
 0x257   : > { %v6747_v35 = vpop.eup %6746  ;;  %v2524_v22 = vmul.f32 %v6745_v8, %v7852_v45  ;;  %6395 = vmatpush3.msra.mxu0 %v7819_v32 }
 0x258   : > { %v6749_v16 = vpop.eup %6748  ;;  %v2484_v40 = vadd.f32 1.0, %v6747_v35  ;;  %6396 = vmatprep.subr.mxu0 %v944_v11  ;;  %6768 = vrcp.f32 %v2485_v19 }
 0x259   : > { %v6751_v36 = vpop.eup %6750  ;;  %6341 = vmatprep.mubr.msk.f32.mxu0 %vm1023_vm0, %v2524_v22  ;;  %6373 = vmatprep.mubr.msk.f32.mxu1 %vm1023_vm0, %v2524_v22  ;;  %v2527_v39 = vmul.f32 %v6749_v16, %v7856_v3 }
 0x25a   : > { %v6753_v42 = vpop.eup %6752  ;;  %6770 = vrcp.f32 %v2484_v40  ;;  %v2487_v46 = vadd.f32 1.0, %v6751_v36  ;;  %6342 = vmatmul.mubr.msk.f32.gmra.mxu0 %vm1023_vm0, %v2525_v1  ;;  %6374 = vmatmul.mubr.msk.f32.gmra.mxu1 %vm1023_vm0, %v2525_v1 }
 0x25b   : > { %v6755_v45 = vpop.eup %6754  ;;  %v2526_v32 = vmul.f32 %v6753_v42, %v7860_v31  ;;  %6397 = vmatpush3.msra.mxu0 %v944_v11 }
 0x25c   : > { %v6757_v55 = vpop.eup %6756  ;;  %v2486_v61 = vadd.f32 1.0, %v6755_v45  ;;  %6772 = vrcp.f32 %v2487_v46  ;;  %v7967_v46 = vld [vmem:[%s9161_s10] ss:$0 sm:$0xff] }
 0x25d   : > { %v6759_v50 = vpop.eup %6758  ;;  %6344 = vmatprep.mubr.msk.f32.mxu0 %vm1023_vm0, %v2526_v32  ;;  %6376 = vmatprep.mubr.msk.f32.mxu1 %vm1023_vm0, %v2526_v32  ;;  %v2529_v10 = vmul.f32 %v6757_v55, %v7864_v18 }
 0x25e   : > { %v6761_v25 = vpop.eup %6760  ;;  %6774 = vrcp.f32 %v2486_v61  ;;  %v2489_v14 = vadd.f32 1.0, %v6759_v50  ;;  %6345 = vmatmul.mubr.msk.f32.gmra.mxu0 %vm1023_vm0, %v2527_v39  ;;  %6377 = vmatmul.mubr.msk.f32.gmra.mxu1 %vm1023_vm0, %v2527_v39 }
 0x25f   : > { %v6763_v29 = vpop.eup %6762  ;;  %v2528_v31 = vmul.f32 %v6761_v25, %v7868_v24 }
 0x260   : > { %v2488_v3 = vadd.f32 1.0, %v6763_v29  ;;  %6776 = vrcp.f32 %v2489_v14 }
 0x261   : > { %6347 = vmatprep.mubr.msk.f32.mxu0 %vm1023_vm0, %v2528_v31  ;;  %6379 = vmatprep.mubr.msk.f32.mxu1 %vm1023_vm0, %v2528_v31  ;;  %v6765_v11 = vpop.eup %6764 }
 0x262   : > { %6778 = vrcp.f32 %v2488_v3  ;;  %6348 = vmatmul.mubr.msk.f32.gmra.mxu0 %vm1023_vm0, %v2529_v10  ;;  %6380 = vmatmul.mubr.msk.f32.gmra.mxu1 %vm1023_vm0, %v2529_v10  ;;  %v2531_v35 = vmul.f32 %v6765_v11, %v7872_v0  ;;  %v948_v10 = vld [vmem:[%s9164_s13] sm:$0xff] }
 0x263   : > { %v6767_v8 = vpop.eup %6766 }
 0x264   : > { %v2530_v19 = vmul.f32 %v6767_v8, %v7876_v7 }
 0x265   : > { %v6769_v24 = vpop.eup %6768 }
 0x266   : > { %6350 = vmatprep.mubr.msk.f32.mxu0 %vm1023_vm0, %v2530_v19  ;;  %6382 = vmatprep.mubr.msk.f32.mxu1 %vm1023_vm0, %v2530_v19  ;;  %v2533_v16 = vmul.f32 %v6769_v24, %v7880_v34 }
 0x267   : > { %v6771_v18 = vpop.eup %6770  ;;  %6351 = vmatmul.mubr.msk.f32.gmra.mxu0 %vm1023_vm0, %v2531_v35  ;;  %6383 = vmatmul.mubr.msk.f32.gmra.mxu1 %vm1023_vm0, %v2531_v35 }
 0x268   : > { %v2532_v22 = vmul.f32 %v6771_v18, %v7883_v57 }
 0x269   : > { %v6773_v1 = vpop.eup %6772 }
 0x26a   : > { %6353 = vmatprep.mubr.msk.f32.mxu0 %vm1023_vm0, %v2532_v22  ;;  %6385 = vmatprep.mubr.msk.f32.mxu1 %vm1023_vm0, %v2532_v22  ;;  %v2535_v40 = vmul.f32 %v6773_v1, %v7888_v26  ;;  %v946_v26 = vld [vmem:[%s9163_s12] sm:$0xff] }
 0x26b   : > { %v6775_v0 = vpop.eup %6774  ;;  %6354 = vmatmul.mubr.msk.f32.gmra.mxu0 %vm1023_vm0, %v2533_v16  ;;  %6386 = vmatmul.mubr.msk.f32.gmra.mxu1 %vm1023_vm0, %v2533_v16 }
 0x26c   : > { %v2534_v7 = vmul.f32 %v6775_v0, %v7892_v62  ;;  %v947_v62 = vld [vmem:[%s9163_s12 + $0x8] sm:$0xff] }
 0x26d   : > { %v6777_v36 = vpop.eup %6776  ;;  %6470 = vmatprep.subr.mxu1 %v947_v62 }
 0x26e   : > { %6356 = vmatprep.mubr.msk.f32.mxu0 %vm1023_vm0, %v2534_v7  ;;  %6388 = vmatprep.mubr.msk.f32.mxu1 %vm1023_vm0, %v2534_v7  ;;  %v2537_v42 = vmul.f32 %v6777_v36, %v7895_v49  ;;  %v949_v49 = vld [vmem:[%s9164_s13 + $0x8] sm:$0xff] }
 0x26f   : > { %v6779_v34 = vpop.eup %6778  ;;  %6357 = vmatmul.mubr.msk.f32.gmra.mxu0 %vm1023_vm0, %v2535_v40  ;;  %6389 = vmatmul.mubr.msk.f32.gmra.mxu1 %vm1023_vm0, %v2535_v40 }
 0x270   : > { %v2536_v57 = vmul.f32 %v6779_v34, %v7900_v15  ;;  %6471 = vmatpush3.msra.mxu1 %v947_v62 }
 0x271   : > { %6472 = vmatprep.subr.mxu1 %v946_v26 }
 0x272   : > { %6359 = vmatprep.mubr.msk.f32.mxu0 %vm1023_vm0, %v2536_v57  ;;  %6391 = vmatprep.mubr.msk.f32.mxu1 %vm1023_vm0, %v2536_v57 }
 0x273   : > { %6360 = vmatmul.mubr.msk.f32.gmra.mxu0 %vm1023_vm0, %v2537_v42  ;;  %6392 = vmatmul.mubr.msk.f32.gmra.mxu1 %vm1023_vm0, %v2537_v42  ;;  %vm3048_vm0 = vcmask 130048  }
 0x274   : > { %6473 = vmatpush3.msra.mxu1 %v946_v26 }
 0x275   : > { %6574 = vmatprep.subr.mxu1 %v949_v49 }
 0x316   : > { %v6372_v15 = vpop.f32.mrf.mxu1  ;;  %v8041_v34 = vpop.f32.mrf.mxu0 }
 0x317   : > { %v7970_v32 = vadd.f32 %v6372_v15, %v7967_v46 }
 0x318   : > { %v2809_v45 = vpop.f32.mrf.mxu1 }
 0x319   : > { %v7973_v55 = vadd.f32 %v7967_v46, %v2809_v45  ;;  %v3001_v25 = vmul.f32 %v7462_v2, %v7970_v32 }
 0x31a   : > { %v6375_v39 = vpop.f32.mrf.mxu1 }
 0x31b   : > { %v3000_v61 = vmul.f32 %v7973_v55, %v7489_v21  ;;  %v7980_v14 = vadd.f32 %v6375_v39, %v7967_v46  ;;  %v951_v21 = vld [vmem:[%s9165_s14 + $0x8] sm:$0xff] }
 0x31c   : > { %v2819_v50 = vpop.f32.mrf.mxu1  ;;  %6546 = vmatprep.subr.mxu0 %v951_v21 }
 0x31d   : > { %v7983_v29 = vadd.f32 %v7967_v46, %v2819_v50  ;;  %6398 = vmatprep.mubr.msk.f32.mxu0 %vm3048_vm0, %v3000_v61  ;;  %6474 = vmatprep.mubr.msk.f32.mxu1 %vm3048_vm0, %v3000_v61  ;;  %v3003_v11 = vmul.f32 %v7499_v27, %v7980_v14 }
 0x31e   : > { %v6378_v31 = vpop.f32.mrf.mxu1  ;;  %6399 = vmatmul.mubr.msk.f32.vlgmr.msra.gmra.mxu0 %vm3048_vm0, %v3001_v25  ;;  %6475 = vmatmul.mubr.msk.f32.vlgmr.msra.gmra.mxu1 %vm3048_vm0, %v3001_v25 }
 0x31f   : > { %v3002_v2 = vmul.f32 %v7983_v29, %v7516_v60  ;;  %6575 = vmatpush3.msra.mxu1 %v949_v49  ;;  %v8000_v8 = vadd.f32 %v6378_v31, %v7967_v46  ;;  %6547 = vmatpush3.msra.mxu0 %v951_v21  ;;  %v3016_v21 = vmul.f32 %v7973_v55, %v7742_v63 }
 0x320   : > { %v2829_v3 = vpop.f32.mrf.mxu1  ;;  %6576 = vmatprep.subr.mxu1 %v948_v10 }
 0x321   : > { %v8003_v19 = vadd.f32 %v7967_v46, %v2829_v3  ;;  %6401 = vmatprep.mubr.msk.f32.mxu0 %vm3048_vm0, %v3002_v2  ;;  %6477 = vmatprep.mubr.msk.f32.mxu1 %vm3048_vm0, %v3002_v2  ;;  %v3005_v24 = vmul.f32 %v7533_v17, %v8000_v8  ;;  %v3019_v2 = vmul.f32 %v7744_v20, %v7980_v14 }
 0x322   : > { %v6381_v35 = vpop.f32.mrf.mxu1  ;;  %6402 = vmatmul.mubr.msk.f32.gmra.mxu0 %vm3048_vm0, %v3003_v11  ;;  %6478 = vmatmul.mubr.msk.f32.gmra.mxu1 %vm3048_vm0, %v3003_v11 }
 0x323   : > { %v3004_v27 = vmul.f32 %v8003_v19, %v7561_v30  ;;  %6577 = vmatpush3.msra.mxu1 %v948_v10  ;;  %v8014_v18 = vadd.f32 %v6381_v35, %v7967_v46  ;;  %v3020_v3 = vmul.f32 %v8003_v19, %v7750_v47 }
 0x324   : > { %v2839_v60 = vpop.f32.mrf.mxu1 }
 0x325   : > { %v8017_v22 = vadd.f32 %v7967_v46, %v2839_v60  ;;  %6404 = vmatprep.mubr.msk.f32.mxu0 %vm3048_vm0, %v3004_v27  ;;  %6480 = vmatprep.mubr.msk.f32.mxu1 %vm3048_vm0, %v3004_v27  ;;  %v3007_v17 = vmul.f32 %v7581_v44, %v8014_v18  ;;  %v3023_v47 = vmul.f32 %v7752_v4, %v8014_v18 }
 0x326   : > { %6405 = vmatmul.mubr.msk.f32.gmra.mxu0 %vm3048_vm0, %v3005_v24  ;;  %6481 = vmatmul.mubr.msk.f32.gmra.mxu1 %vm3048_vm0, %v3005_v24 }
 0x327   : > { %v6384_v16 = vpop.f32.mrf.mxu1  ;;  %v3006_v30 = vmul.f32 %v8017_v22, %v7604_v6 }
 0x328   : > { %v8028_v1 = vadd.f32 %v6384_v16, %v7967_v46 }
 0x329   : > { %v2849_v0 = vpop.f32.mrf.mxu1  ;;  %6407 = vmatprep.mubr.msk.f32.mxu0 %vm3048_vm0, %v3006_v30  ;;  %6483 = vmatprep.mubr.msk.f32.mxu1 %vm3048_vm0, %v3006_v30 }
 0x32a   : > { %v8031_v7 = vadd.f32 %v7967_v46, %v2849_v0  ;;  %6408 = vmatmul.mubr.msk.f32.gmra.mxu0 %vm3048_vm0, %v3007_v17  ;;  %6484 = vmatmul.mubr.msk.f32.gmra.mxu1 %vm3048_vm0, %v3007_v17  ;;  %v3009_v44 = vmul.f32 %v7632_v9, %v8028_v1  ;;  %v2658_v9 = vpop.f32.mrf.mxu0  ;;  %v3025_v4 = vmul.f32 %v7756_v56, %v8028_v1 }
 0x32b   : > { %v6387_v40 = vpop.f32.mrf.mxu1 }
 0x32c   : > { %v3008_v6 = vmul.f32 %v8031_v7, %v7661_v48  ;;  %v8046_v57 = vadd.f32 %v6387_v40, %v7967_v46  ;;  %v8067_v61 = vpop.f32.mrf.mxu0  ;;  %v3024_v35 = vmul.f32 %v8031_v7, %v7758_v58 }
 0x32d   : > { %v2859_v36 = vpop.f32.mrf.mxu1 }
 0x32e   : > { %6410 = vmatprep.mubr.msk.f32.mxu0 %vm3048_vm0, %v3008_v6  ;;  %6486 = vmatprep.mubr.msk.f32.mxu1 %vm3048_vm0, %v3008_v6  ;;  %v8049_v42 = vadd.f32 %v7967_v46, %v2859_v36  ;;  %v3011_v49 = vmul.f32 %v7679_v59, %v8046_v57  ;;  %v2668_v10 = vpop.f32.mrf.mxu0 }
 0x32f   : > { %v6390_v62 = vpop.f32.mrf.mxu1  ;;  %6411 = vmatmul.mubr.msk.f32.gmra.mxu0 %vm3048_vm0, %v3009_v44  ;;  %6487 = vmatmul.mubr.msk.f32.gmra.mxu1 %vm3048_vm0, %v3009_v44 }
 0x330   : > { %v3010_v26 = vmul.f32 %v8049_v42, %v7693_v13  ;;  %v8058_v45 = vadd.f32 %v6390_v62, %v7967_v46  ;;  %v3026_v58 = vmul.f32 %v8049_v42, %v7762_v43  ;;  %v3027_v43 = vmul.f32 %v7760_v37, %v8046_v57 }
 0x331   : > { %v2869_v48 = vpop.f32.mrf.mxu1 }
 0x332   : > { %v8061_v39 = vadd.f32 %v7967_v46, %v2869_v48  ;;  %6413 = vmatprep.mubr.msk.f32.mxu0 %vm3048_vm0, %v3010_v26  ;;  %6489 = vmatprep.mubr.msk.f32.mxu1 %vm3048_vm0, %v3010_v26  ;;  %v3013_v50 = vmul.f32 %v7707_v28, %v8058_v45  ;;  %v3029_v37 = vmul.f32 %v7764_v52, %v8058_v45  ;;  %v9210_v52 = vld [vmem:[#allocation7_spill] sm:$0xff] }
 0x333   : > { %v6393_v15 = vpop.f32.mrf.mxu1  ;;  %6414 = vmatmul.mubr.msk.f32.gmra.mxu0 %vm3048_vm0, %v3011_v49  ;;  %6490 = vmatmul.mubr.msk.f32.gmra.mxu1 %vm3048_vm0, %v3011_v49 }
 0x334   : > { %v3012_v59 = vmul.f32 %v8061_v39, %v7721_v38  ;;  %v8074_v25 = vadd.f32 %v6393_v15, %v7967_v46  ;;  %v3028_v30 = vmul.f32 %v8061_v39, %v7766_v12 }
 0x335   : > { %v2879_v13 = vpop.f32.mrf.mxu1 }
 0x336   : > { %v8077_v31 = vadd.f32 %v7967_v46, %v2879_v13  ;;  %6416 = vmatprep.mubr.msk.f32.mxu0 %vm3048_vm0, %v3012_v59  ;;  %6492 = vmatprep.mubr.msk.f32.mxu1 %vm3048_vm0, %v3012_v59  ;;  %v3015_v28 = vmul.f32 %v7734_v41, %v8074_v25  ;;  %v8091_v46 = vpop.f32.mrf.mxu0  ;;  %v3017_v41 = vmul.f32 %v7740_v53, %v7970_v32  ;;  %v9212_v13 = vld [vmem:[#allocation8_spill] sm:$0xff] }
 0x337   : > { %6417 = vmatmul.mubr.msk.f32.gmra.mxu0 %vm3048_vm0, %v3013_v50  ;;  %6493 = vmatmul.mubr.msk.f32.gmra.mxu1 %vm3048_vm0, %v3013_v50  ;;  %v3021_v53 = vmul.f32 %v7748_v54, %v8000_v8  ;;  %v8132_v54 = vld [vmem:[%s9160_s9] ss:$0 sm:$0xff]  ;;  %v3033_v59 = vmul.f32 %v9212_v13, %v7970_v32  ;;  %v9213_v50 = vld [vmem:[#allocation11_spill] sm:$0xff] }
 0x338   : > { %v3014_v38 = vmul.f32 %v8077_v31, %v7738_v51  ;;  %v3018_v51 = vmul.f32 %v7983_v29, %v7746_v23  ;;  %v2678_v63 = vpop.f32.mrf.mxu0  ;;  %v3022_v23 = vmul.f32 %v8017_v22, %v7754_v33  ;;  %v8137_v33 = vadd.f32 %v8132_v54, %v2658_v9  ;;  %v9211_v9 = vld [vmem:[#allocation9_spill] sm:$0xff]  ;;  %v9221_v13 = vld [vmem:[#allocation19_spill] sm:$0xff] }
 0x339   : > { %v8145_v60 = vadd.f32 %v8041_v34, %v8132_v54  ;;  %v8150_v16 = vadd.f32 %v8132_v54, %v2668_v10  ;;  %v8162_v0 = vadd.f32 %v8067_v61, %v8132_v54  ;;  %v8168_v44 = vadd.f32 %v8132_v54, %v2678_v63  ;;  %v9215_v63 = vld [vmem:[#allocation13_spill] sm:$0xff] }
 0x33a   : > { %6419 = vmatprep.mubr.msk.f32.mxu0 %vm3048_vm0, %v3014_v38  ;;  %6495 = vmatprep.mubr.msk.f32.mxu1 %vm3048_vm0, %v3014_v38  ;;  %v8109_v11 = vpop.f32.mrf.mxu0  ;;  %v5549_v56 = vmul.f32 -1.442695, %v8137_v33  ;;  %v3030_v12 = vmul.f32 %v8077_v31, %v7770_v5  ;;  %v8181_v62 = vadd.f32 %v8091_v46, %v8132_v54  ;;  %v3031_v5 = vmul.f32 %v9210_v52, %v8074_v25 }
 0x33b   : > { %6420 = vmatmul.mubr.msk.f32.gmra.mxu0 %vm3048_vm0, %v3015_v28  ;;  %6496 = vmatmul.mubr.msk.f32.gmra.mxu1 %vm3048_vm0, %v3015_v28  ;;  %v5550_v17 = vmul.f32 -1.442695, %v8145_v60  ;;  %v5551_v6 = vmul.f32 -1.442695, %v8150_v16  ;;  %v5552_v36 = vmul.f32 -1.442695, %v8162_v0  ;;  %v3032_v26 = vmul.f32 %v7973_v55, %v9211_v9 }
 0x33c   : > { %6422 = vmatprep.mubr.msk.f32.mxu0 %vm3048_vm0, %v3016_v21  ;;  %6498 = vmatprep.mubr.msk.f32.mxu1 %vm3048_vm0, %v3016_v21  ;;  %v2688_v20 = vpop.f32.mrf.mxu0  ;;  %6780 = vpow2.f32 %v5549_v56  ;;  %v5553_v48 = vmul.f32 -1.442695, %v8168_v44  ;;  %v5554_v61 = vmul.f32 -1.442695, %v8181_v62  ;;  %v8202_v55 = vadd.f32 %v8109_v11, %v8132_v54 }
 0x33d   : > { %6782 = vpow2.f32 %v5550_v17  ;;  %v8191_v49 = vadd.f32 %v8132_v54, %v2688_v20  ;;  %v3034_v10 = vmul.f32 %v7983_v29, %v9213_v50  ;;  %v9214_v29 = vld [vmem:[#allocation10_spill] sm:$0xff] }
 0x33e   : > { %v6352_v27 = vpop.f32.mrf.mxu0  ;;  %6784 = vpow2.f32 %v5551_v6  ;;  %v3035_v46 = vmul.f32 %v9214_v29, %v7980_v14 }
 0x33f   : > { %6423 = vmatmul.mubr.msk.f32.gmra.mxu0 %vm3048_vm0, %v3017_v41  ;;  %6499 = vmatmul.mubr.msk.f32.gmra.mxu1 %vm3048_vm0, %v3017_v41  ;;  %6786 = vpow2.f32 %v5552_v36  ;;  %v5555_v38 = vmul.f32 -1.442695, %v8191_v49  ;;  %v8213_v32 = vadd.f32 %v6352_v27, %v8132_v54  ;;  %v5556_v41 = vmul.f32 -1.442695, %v8202_v55  ;;  %v9219_v36 = vld [vmem:[#allocation17_spill] sm:$0xff] }
 0x340   : > { %6425 = vmatprep.mubr.msk.f32.mxu0 %vm3048_vm0, %v3018_v51  ;;  %6501 = vmatprep.mubr.msk.f32.mxu1 %vm3048_vm0, %v3018_v51  ;;  %v2698_v24 = vpop.f32.mrf.mxu0  ;;  %6788 = vpow2.f32 %v5553_v48 }
 0x341   : > { %v8208_v28 = vadd.f32 %v8132_v54, %v2698_v24  ;;  %6790 = vpow2.f32 %v5554_v61  ;;  %v5558_v14 = vmul.f32 -1.442695, %v8213_v32 }
 0x342   : > { %v6355_v40 = vpop.f32.mrf.mxu0  ;;  %6792 = vpow2.f32 %v5555_v38 }
 0x343   : > { %6426 = vmatmul.mubr.msk.f32.gmra.mxu0 %vm3048_vm0, %v3019_v2  ;;  %6502 = vmatmul.mubr.msk.f32.gmra.mxu1 %vm3048_vm0, %v3019_v2  ;;  %v3036_v2 = vmul.f32 %v8003_v19, %v9215_v63  ;;  %6794 = vpow2.f32 %v5556_v41  ;;  %v8234_v27 = vadd.f32 %v6355_v40, %v8132_v54  ;;  %v9218_v40 = vld [vmem:[#allocation14_spill] sm:$0xff] }
 0x344   : > { %6428 = vmatprep.mubr.msk.f32.mxu0 %vm3048_vm0, %v3020_v3  ;;  %6504 = vmatprep.mubr.msk.f32.mxu1 %vm3048_vm0, %v3020_v3  ;;  %v2708_v34 = vpop.f32.mrf.mxu0  ;;  %v5557_v3 = vmul.f32 -1.442695, %v8208_v28  ;;  %v3039_v6 = vmul.f32 %v9218_v40, %v8014_v18 }
 0x345   : > { %v8224_v11 = vadd.f32 %v8132_v54, %v2708_v34  ;;  %v3040_v34 = vmul.f32 %v8031_v7, %v9219_v36  ;;  %v9220_v7 = vld [vmem:[#allocation16_spill] sm:$0xff] }
 0x346   : > { %v6358_v15 = vpop.f32.mrf.mxu0  ;;  %6796 = vpow2.f32 %v5557_v3 }
 0x347   : > { %6429 = vmatmul.mubr.msk.f32.gmra.mxu0 %vm3048_vm0, %v3021_v53  ;;  %6505 = vmatmul.mubr.msk.f32.gmra.mxu1 %vm3048_vm0, %v3021_v53  ;;  %v5559_v24 = vmul.f32 -1.442695, %v8224_v11  ;;  %6798 = vpow2.f32 %v5558_v14 }
 0x348   : > { %6431 = vmatprep.mubr.msk.f32.mxu0 %vm3048_vm0, %v3022_v23  ;;  %6507 = vmatprep.mubr.msk.f32.mxu1 %vm3048_vm0, %v3022_v23  ;;  %v2718_v21 = vpop.f32.mrf.mxu0 }
 0x349   : > { %v6781_v51 = vpop.eup %6780  ;;  %v8240_v56 = vadd.f32 %v8132_v54, %v2718_v21 }
 0x34a   : > { %v6361_v53 = vpop.f32.mrf.mxu0  ;;  %v6783_v23 = vpop.eup %6782  ;;  %v2936_v19 = vadd.f32 1.0, %v6781_v51 }
 0x34b   : > { %6432 = vmatmul.mubr.msk.f32.gmra.mxu0 %vm3048_vm0, %v3023_v47  ;;  %6508 = vmatmul.mubr.msk.f32.gmra.mxu1 %vm3048_vm0, %v3023_v47  ;;  %v6785_v20 = vpop.eup %6784  ;;  %v9216_v47 = vld [vmem:[#allocation12_spill] sm:$0xff]  ;;  %v5561_v48 = vmul.f32 -1.442695, %v8240_v56  ;;  %v8266_v61 = vadd.f32 %v6361_v53, %v8132_v54 }
 0x34c   : > { %6434 = vmatprep.mubr.msk.f32.mxu0 %vm3048_vm0, %v3024_v35  ;;  %6510 = vmatprep.mubr.msk.f32.mxu1 %vm3048_vm0, %v3024_v35  ;;  %v3037_v35 = vmul.f32 %v9216_v47, %v8000_v8  ;;  %v6787_v8 = vpop.eup %6786  ;;  %v2938_v17 = vadd.f32 1.0, %v6785_v20  ;;  %6800 = vrcp.f32 %v2936_v19 }
 0x34d   : > { %6802 = vpow2.f32 %v5559_v24 }
 0x34f   : > { %6435 = vmatmul.mubr.msk.f32.gmra.mxu0 %vm3048_vm0, %v3025_v4  ;;  %6511 = vmatmul.mubr.msk.f32.gmra.mxu1 %vm3048_vm0, %v3025_v4  ;;  %v9217_v4 = vld [vmem:[#allocation15_spill] sm:$0xff] }
 0x350   : > { %6437 = vmatprep.mubr.msk.f32.mxu0 %vm3048_vm0, %v3026_v58  ;;  %6513 = vmatprep.mubr.msk.f32.mxu1 %vm3048_vm0, %v3026_v58  ;;  %v3038_v58 = vmul.f32 %v8017_v22, %v9217_v4  ;;  %v6789_v22 = vpop.eup %6788 }
 0x351   : > { %v2940_v18 = vadd.f32 1.0, %v6789_v22  ;;  %v6791_v9 = vpop.eup %6790 }
 0x352   : > { %v2941_v38 = vadd.f32 1.0, %v6791_v9 }
 0x353   : > { %6438 = vmatmul.mubr.msk.f32.gmra.mxu0 %vm3048_vm0, %v3027_v43  ;;  %6514 = vmatmul.mubr.msk.f32.gmra.mxu1 %vm3048_vm0, %v3027_v43  ;;  %v2937_v43 = vadd.f32 1.0, %v6783_v23  ;;  %v9225_v23 = vld [vmem:[#allocation23_spill] sm:$0xff] }
 0x354   : > { %6440 = vmatprep.mubr.msk.f32.mxu0 %vm3048_vm0, %v3028_v30  ;;  %6516 = vmatprep.mubr.msk.f32.mxu1 %vm3048_vm0, %v3028_v30  ;;  %v2728_v30 = vpop.f32.mrf.mxu0  ;;  %v3046_v14 = vmul.f32 %v8077_v31, %v9225_v23 }
 0x355   : > { %v8256_v52 = vadd.f32 %v8132_v54, %v2728_v30  ;;  %6804 = vrcp.f32 %v2937_v43 }
 0x356   : > { %6806 = vrcp.f32 %v2938_v17 }
 0x357   : > { %6441 = vmatmul.mubr.msk.f32.gmra.mxu0 %vm3048_vm0, %v3029_v37  ;;  %6517 = vmatmul.mubr.msk.f32.gmra.mxu1 %vm3048_vm0, %v3029_v37  ;;  %v5560_v37 = vmul.f32 -1.442695, %v8234_v27  ;;  %v5563_v50 = vmul.f32 -1.442695, %v8256_v52 }
 0x358   : > { %6443 = vmatprep.mubr.msk.f32.mxu0 %vm3048_vm0, %v3030_v12  ;;  %6519 = vmatprep.mubr.msk.f32.mxu1 %vm3048_vm0, %v3030_v12  ;;  %v8250_v12 = vadd.f32 %v6358_v15, %v8132_v54 }
 0x359   : > { %6808 = vpow2.f32 %v5560_v37 }
 0x35a   : > { %v5562_v15 = vmul.f32 -1.442695, %v8250_v12  ;;  %6810 = vpow2.f32 %v5561_v48 }
 0x35b   : > { %6444 = vmatmul.mubr.msk.f32.gmra.mxu0 %vm3048_vm0, %v3031_v5  ;;  %6520 = vmatmul.mubr.msk.f32.gmra.mxu1 %vm3048_vm0, %v3031_v5  ;;  %v2939_v5 = vadd.f32 1.0, %v6787_v8 }
 0x35c   : > { %6446 = vmatprep.mubr.msk.f32.mxu0 %vm3048_vm0, %v3032_v26  ;;  %6522 = vmatprep.mubr.msk.f32.mxu1 %vm3048_vm0, %v3032_v26  ;;  %v3041_v26 = vmul.f32 %v9220_v7, %v8028_v1  ;;  %v9222_v1 = vld [vmem:[#allocation18_spill] sm:$0xff] }
 0x35d   : > { %6812 = vrcp.f32 %v2939_v5  ;;  %v3043_v54 = vmul.f32 %v9222_v1, %v8046_v57 }
 0x35e   : > { %6814 = vrcp.f32 %v2940_v18 }
 0x35f   : > { %6447 = vmatmul.mubr.msk.f32.gmra.mxu0 %vm3048_vm0, %v3033_v59  ;;  %6523 = vmatmul.mubr.msk.f32.gmra.mxu1 %vm3048_vm0, %v3033_v59  ;;  %v3042_v59 = vmul.f32 %v8049_v42, %v9221_v13  ;;  %6816 = vpow2.f32 %v5562_v15  ;;  %v5564_v42 = vmul.f32 -1.442695, %v8266_v61 }
 0x360   : > { %6449 = vmatprep.mubr.msk.f32.mxu0 %vm3048_vm0, %v3034_v10  ;;  %6525 = vmatprep.mubr.msk.f32.mxu1 %vm3048_vm0, %v3034_v10  ;;  %v6793_v10 = vpop.eup %6792  ;;  %6818 = vpow2.f32 %v5563_v50 }
 0x361   : > { %v6795_v21 = vpop.eup %6794  ;;  %v2942_v29 = vadd.f32 1.0, %v6793_v10  ;;  %6820 = vrcp.f32 %v2941_v38 }
 0x362   : > { %v6797_v51 = vpop.eup %6796  ;;  %v2943_v63 = vadd.f32 1.0, %v6795_v21  ;;  %6822 = vpow2.f32 %v5564_v42 }
 0x363   : > { %6450 = vmatmul.mubr.msk.f32.gmra.mxu0 %vm3048_vm0, %v3035_v46  ;;  %6526 = vmatmul.mubr.msk.f32.gmra.mxu1 %vm3048_vm0, %v3035_v46  ;;  %v9223_v46 = vld [vmem:[#allocation21_spill] sm:$0xff]  ;;  %v6799_v57 = vpop.eup %6798  ;;  %6824 = vrcp.f32 %v2942_v29 }
 0x364   : > { %6452 = vmatprep.mubr.msk.f32.mxu0 %vm3048_vm0, %v3036_v2  ;;  %6528 = vmatprep.mubr.msk.f32.mxu1 %vm3048_vm0, %v3036_v2  ;;  %v3044_v41 = vmul.f32 %v8061_v39, %v9223_v46  ;;  %v9224_v2 = vld [vmem:[#allocation20_spill] sm:$0xff]  ;;  %v6801_v53 = vpop.eup %6800  ;;  %v2944_v39 = vadd.f32 1.0, %v6797_v51  ;;  %6826 = vrcp.f32 %v2943_v63 }
 0x365   : > { %v3045_v3 = vmul.f32 %v9224_v2, %v8058_v45  ;;  %v6803_v20 = vpop.eup %6802  ;;  %v2945_v45 = vadd.f32 1.0, %v6799_v57  ;;  %v2984_v24 = vmul.f32 %v6801_v53, %v8137_v33 }
 0x366   : > { %v6805_v19 = vpop.eup %6804  ;;  %6828 = vrcp.f32 %v2944_v39  ;;  %v2946_v31 = vadd.f32 1.0, %v6803_v20 }
 0x367   : > { %6453 = vmatmul.mubr.msk.f32.gmra.mxu0 %vm3048_vm0, %v3037_v35  ;;  %6529 = vmatmul.mubr.msk.f32.gmra.mxu1 %vm3048_vm0, %v3037_v35  ;;  %v6807_v47 = vpop.eup %6806  ;;  %v9226_v35 = vld [vmem:[#allocation22_spill] sm:$0xff]  ;;  %v2985_v17 = vmul.f32 %v6805_v19, %v8145_v60  ;;  %6830 = vrcp.f32 %v2945_v45 }
 0x368   : > { %6455 = vmatprep.mubr.msk.f32.mxu0 %vm3048_vm0, %v3038_v58  ;;  %6531 = vmatprep.mubr.msk.f32.mxu1 %vm3048_vm0, %v3038_v58  ;;  %v3047_v4 = vmul.f32 %v9226_v35, %v8074_v25  ;;  %v6809_v58 = vpop.eup %6808  ;;  %v2986_v25 = vmul.f32 %v6807_v47, %v8150_v16  ;;  %6832 = vrcp.f32 %v2946_v31 }
 0x369   : > { %v6811_v43 = vpop.eup %6810  ;;  %v2947_v22 = vadd.f32 1.0, %v6809_v58 }
 0x36a   : > { %v6813_v30 = vpop.eup %6812  ;;  %v2948_v33 = vadd.f32 1.0, %v6811_v43 }
 0x36b   : > { %6456 = vmatmul.mubr.msk.f32.gmra.mxu0 %vm3048_vm0, %v3039_v6  ;;  %6532 = vmatmul.mubr.msk.f32.gmra.mxu1 %vm3048_vm0, %v3039_v6  ;;  %v6815_v8 = vpop.eup %6814  ;;  %v2987_v36 = vmul.f32 %v6813_v30, %v8162_v0  ;;  %6834 = vrcp.f32 %v2947_v22 }
 0x36c   : > { %6458 = vmatprep.mubr.msk.f32.mxu0 %vm3048_vm0, %v3040_v34  ;;  %6534 = vmatprep.mubr.msk.f32.mxu1 %vm3048_vm0, %v3040_v34  ;;  %v6817_v40 = vpop.eup %6816  ;;  %v2988_v60 = vmul.f32 %v6815_v8, %v8168_v44  ;;  %6836 = vrcp.f32 %v2948_v33 }
 0x36d   : > { %v6819_v6 = vpop.eup %6818  ;;  %v2949_v34 = vadd.f32 1.0, %v6817_v40 }
 0x36e   : > { %v6821_v37 = vpop.eup %6820  ;;  %v2950_v5 = vadd.f32 1.0, %v6819_v6 }
 0x36f   : > { %6459 = vmatmul.mubr.msk.f32.gmra.mxu0 %vm3048_vm0, %v3041_v26  ;;  %6535 = vmatmul.mubr.msk.f32.gmra.mxu1 %vm3048_vm0, %v3041_v26  ;;  %v6823_v48 = vpop.eup %6822  ;;  %v2989_v16 = vmul.f32 %v6821_v37, %v8181_v62  ;;  %6838 = vrcp.f32 %v2949_v34 }
 0x370   : > { %6461 = vmatprep.mubr.msk.f32.mxu0 %vm3048_vm0, %v3042_v59  ;;  %6537 = vmatprep.mubr.msk.f32.mxu1 %vm3048_vm0, %v3042_v59  ;;  %v6825_v18 = vpop.eup %6824  ;;  %v2951_v9 = vadd.f32 1.0, %v6823_v48  ;;  %6840 = vrcp.f32 %v2950_v5 }
 0x371   : > { %v6827_v7 = vpop.eup %6826  ;;  %v2990_v26 = vmul.f32 %v6825_v18, %v8191_v49  ;;  %v950_v49 = vld [vmem:[%s9165_s14] sm:$0xff] }
 0x372   : > { %v2991_v44 = vmul.f32 %v6827_v7, %v8202_v55  ;;  %6842 = vrcp.f32 %v2951_v9  ;;  %6548 = vmatprep.subr.mxu0 %v950_v49 }
 0x373   : > { %6462 = vmatmul.mubr.msk.f32.gmra.mxu0 %vm3048_vm0, %v3043_v54  ;;  %6538 = vmatmul.mubr.msk.f32.gmra.mxu1 %vm3048_vm0, %v3043_v54  ;;  %v6829_v0 = vpop.eup %6828 }
 0x374   : > { %6464 = vmatprep.mubr.msk.f32.mxu0 %vm3048_vm0, %v3044_v41  ;;  %6540 = vmatprep.mubr.msk.f32.mxu1 %vm3048_vm0, %v3044_v41  ;;  %v6831_v15 = vpop.eup %6830  ;;  %v2992_v13 = vmul.f32 %v6829_v0, %v8208_v28 }
 0x375   : > { %v6833_v59 = vpop.eup %6832  ;;  %v2993_v62 = vmul.f32 %v6831_v15, %v8213_v32  ;;  %6549 = vmatpush3.msra.mxu0 %v950_v49 }
 0x376   : > { %v2994_v10 = vmul.f32 %v6833_v59, %v8224_v11 }
 0x377   : > { %6465 = vmatmul.mubr.msk.f32.gmra.mxu0 %vm3048_vm0, %v3045_v3  ;;  %6541 = vmatmul.mubr.msk.f32.gmra.mxu1 %vm3048_vm0, %v3045_v3 }
 0x378   : > { %6467 = vmatprep.mubr.msk.f32.mxu0 %vm3048_vm0, %v3046_v14  ;;  %6543 = vmatprep.mubr.msk.f32.mxu1 %vm3048_vm0, %v3046_v14  ;;  %v6835_v50 = vpop.eup %6834 }
 0x379   : > { %v6837_v55 = vpop.eup %6836  ;;  %v2995_v28 = vmul.f32 %v6835_v50, %v8234_v27 }
 0x37a   : > { %v2996_v1 = vmul.f32 %v6837_v55, %v8240_v56 }
 0x37b   : > { %6468 = vmatmul.mubr.msk.f32.gmra.mxu0 %vm3048_vm0, %v3047_v4  ;;  %6544 = vmatmul.mubr.msk.f32.gmra.mxu1 %vm3048_vm0, %v3047_v4 }
 0x37c   : > { %6578 = vmatprep.mubr.msk.f32.mxu1 %vm3048_vm0, %v2984_v24  ;;  %v6839_v38 = vpop.eup %6838 }
 0x37d   : > { %v6841_v32 = vpop.eup %6840  ;;  %v2997_v54 = vmul.f32 %v6839_v38, %v8250_v12 }
 0x37e   : > { %v2998_v42 = vmul.f32 %v6841_v32, %v8256_v52 }
 0x37f   : > { %6579 = vmatmul.mubr.msk.f32.vlgmr.msra.gmra.mxu1 %vm3048_vm0, %v2985_v17  ;;  %v6843_v11 = vpop.eup %6842 }
 0x380   : > { %6581 = vmatprep.mubr.msk.f32.mxu1 %vm3048_vm0, %v2986_v25  ;;  %v2999_v21 = vmul.f32 %v6843_v11, %v8266_v61 }
 0x383   : > { %6582 = vmatmul.mubr.msk.f32.gmra.mxu1 %vm3048_vm0, %v2987_v36 }
 0x384   : > { %6584 = vmatprep.mubr.msk.f32.mxu1 %vm3048_vm0, %v2988_v60 }
 0x387   : > { %6585 = vmatmul.mubr.msk.f32.gmra.mxu1 %vm3048_vm0, %v2989_v16 }
 0x388   : > { %6587 = vmatprep.mubr.msk.f32.mxu1 %vm3048_vm0, %v2990_v26 }
 0x38b   : > { %6588 = vmatmul.mubr.msk.f32.gmra.mxu1 %vm3048_vm0, %v2991_v44 }
 0x38c   : > { %6590 = vmatprep.mubr.msk.f32.mxu1 %vm3048_vm0, %v2992_v13 }
 0x38f   : > { %6591 = vmatmul.mubr.msk.f32.gmra.mxu1 %vm3048_vm0, %v2993_v62 }
 0x390   : > { %6593 = vmatprep.mubr.msk.f32.mxu1 %vm3048_vm0, %v2994_v10 }
 0x393   : > { %6594 = vmatmul.mubr.msk.f32.gmra.mxu1 %vm3048_vm0, %v2995_v28 }
 0x394   : > { %6596 = vmatprep.mubr.msk.f32.mxu1 %vm3048_vm0, %v2996_v1 }
 0x397   : > { %6597 = vmatmul.mubr.msk.f32.gmra.mxu1 %vm3048_vm0, %v2997_v54 }
 0x398   : > { %6599 = vmatprep.mubr.msk.f32.mxu1 %vm3048_vm0, %v2998_v42 }
 0x39b   : > { %6600 = vmatmul.mubr.msk.f32.gmra.mxu1 %vm3048_vm0, %v2999_v21 }
 0x3de   : > { %v6400_v27 = vpop.f32.mrf.mxu0  ;;  %v8345_v54 = vpop.f32.mrf.mxu1 }
 0x3df   : > { %v3804_v43 = vmul.f32 %v6400_v27, %v6400_v27 }
 0x3e0   : > { %v3259_v56 = vpop.f32.mrf.mxu0 }
 0x3e1   : > { %v3803_v30 = vmul.f32 %v3259_v56, %v3259_v56  ;;  %v3856_v36 = vsel %vm3048_vm0, %v3804_v43, 0.0 }
 0x3e2   : > { %v6403_v29 = vpop.f32.mrf.mxu0 }
 0x3e3   : > { %v3806_v8 = vmul.f32 %v6403_v29, %v6403_v29  ;;  %v3851_v34 = vsel %vm3048_vm0, %v3803_v30, 0.0 }
 0x3e4   : > { %v3269_v46 = vpop.f32.mrf.mxu0 }
 0x3e5   : > { %v3805_v17 = vmul.f32 %v3269_v46, %v3269_v46  ;;  %v3866_v48 = vsel %vm3048_vm0, %v3806_v8, 0.0 }
 0x3e6   : > { %v6406_v41 = vpop.f32.mrf.mxu0 }
 0x3e7   : > { %v3808_v22 = vmul.f32 %v6406_v41, %v6406_v41  ;;  %v3861_v60 = vsel %vm3048_vm0, %v3805_v17, 0.0 }
 0x3e8   : > { %v3279_v51 = vpop.f32.mrf.mxu0 }
 0x3e9   : > { %v3807_v25 = vmul.f32 %v3279_v51, %v3279_v51  ;;  %v3876_v5 = vsel %vm3048_vm0, %v3808_v22, 0.0 }
 0x3ea   : > { %v6409_v57 = vpop.f32.mrf.mxu0 }
 0x3eb   : > { %v3810_v33 = vmul.f32 %v6409_v57, %v6409_v57  ;;  %v3871_v16 = vsel %vm3048_vm0, %v3807_v25, 0.0 }
 0x3ec   : > { %v3289_v63 = vpop.f32.mrf.mxu0 }
 0x3ed   : > { %v3809_v6 = vmul.f32 %v3289_v63, %v3289_v63  ;;  %v3886_v9 = vsel %vm3048_vm0, %v3810_v33, 0.0 }
 0x3ef   : > { %v6412_v12 = vpop.f32.mrf.mxu0  ;;  %v3881_v0 = vsel %vm3048_vm0, %v3809_v6, 0.0 }
 0x3f0   : > { %v3812_v7 = vmul.f32 %v6412_v12, %v6412_v12 }
 0x3f1   : > { %v3299_v2 = vpop.f32.mrf.mxu0 }
 0x3f2   : > { %v3811_v26 = vmul.f32 %v3299_v2, %v3299_v2  ;;  %v3896_v11 = vsel %vm3048_vm0, %v3812_v7, 0.0 }
 0x3f3   : > { %v6415_v3 = vpop.f32.mrf.mxu0 }
 0x3f4   : > { %v3814_v44 = vmul.f32 %v6415_v3, %v6415_v3  ;;  %v3891_v42 = vsel %vm3048_vm0, %v3811_v26, 0.0 }
 0x3f5   : > { %v3309_v52 = vpop.f32.mrf.mxu0 }
 0x3f6   : > { %v3813_v15 = vmul.f32 %v3309_v52, %v3309_v52  ;;  %v8350_v56 = vsel %vm3048_vm0, %v3814_v44, 0.0 }
 0x3f7   : > { %v6418_v53 = vpop.f32.mrf.mxu0 }
 0x3f8   : > { %v3816_v13 = vmul.f32 %v6418_v53, %v6418_v53  ;;  %v8353_v29 = vsel %vm3048_vm0, %v3813_v15, 0.0 }
 0x3f9   : > { %v3319_v39 = vpop.f32.mrf.mxu0 }
 0x3fa   : > { %v3815_v62 = vmul.f32 %v3319_v39, %v3319_v39  ;;  %v8356_v46 = vsel %vm3048_vm0, %v3816_v13, 0.0 }
 0x3fb   : > { %v6421_v23 = vpop.f32.mrf.mxu0 }
 0x3fc   : > { %v3818_v49 = vmul.f32 %v6421_v23, %v6421_v23  ;;  %v8359_v57 = vsel %vm3048_vm0, %v3815_v62, 0.0 }
 0x3fd   : > { %v3329_v14 = vpop.f32.mrf.mxu0 }
 0x3fe   : > { %v3817_v55 = vmul.f32 %v3329_v14, %v3329_v14  ;;  %v8362_v63 = vsel %vm3048_vm0, %v3818_v49, 0.0  ;;  %v8372_v14 = vpop.f32.mrf.mxu1 }
 0x3ff   : > { %v6424_v20 = vpop.f32.mrf.mxu0 }
 0x400   : > { %v3820_v50 = vmul.f32 %v6424_v20, %v6424_v20  ;;  %v8367_v3 = vsel %vm3048_vm0, %v3817_v55, 0.0  ;;  %v8380_v44 = vpop.f32.mrf.mxu1 }
 0x401   : > { %v3339_v61 = vpop.f32.mrf.mxu0 }
 0x402   : > { %v3819_v10 = vmul.f32 %v3339_v61, %v3339_v61  ;;  %v3857_v12 = vsel %vm3048_vm0, %v3820_v50, 0.0 }
 0x403   : > { %v6427_v19 = vpop.f32.mrf.mxu0 }
 0x404   : > { %v3822_v28 = vmul.f32 %v6427_v19, %v6427_v19  ;;  %v3852_v2 = vsel %vm3048_vm0, %v3819_v10, 0.0  ;;  %v8398_v10 = vpop.f32.mrf.mxu1 }
 0x405   : > { %v3349_v47 = vpop.f32.mrf.mxu0 }
 0x406   : > { %v3821_v38 = vmul.f32 %v3349_v47, %v3349_v47  ;;  %v3867_v52 = vsel %vm3048_vm0, %v3822_v28, 0.0 }
 0x407   : > { %v6430_v45 = vpop.f32.mrf.mxu0  ;;  %v3868_v30 = vadd.f32 %v3867_v52, %v3866_v48  ;;  %v8413_v52 = vpop.f32.mrf.mxu1 }
 0x408   : > { %v3824_v1 = vmul.f32 %v6430_v45, %v6430_v45  ;;  %v3862_v53 = vsel %vm3048_vm0, %v3821_v38, 0.0  ;;  %v3858_v45 = vadd.f32 %v3857_v12, %v3856_v36 }
 0x409   : > { %v3359_v35 = vpop.f32.mrf.mxu0  ;;  %v3863_v8 = vadd.f32 %v3862_v53, %v3861_v60 }
 0x40a   : > { %v3823_v21 = vmul.f32 %v3359_v35, %v3359_v35  ;;  %v3877_v39 = vsel %vm3048_vm0, %v3824_v1, 0.0  ;;  %v3853_v35 = vadd.f32 %v3852_v2, %v3851_v34 }
 0x40b   : > { %v6433_v4 = vpop.f32.mrf.mxu0  ;;  %v3878_v25 = vadd.f32 %v3877_v39, %v3876_v5 }
 0x40c   : > { %v3826_v27 = vmul.f32 %v6433_v4, %v6433_v4  ;;  %v3872_v20 = vsel %vm3048_vm0, %v3823_v21, 0.0 }
 0x40d   : > { %v3369_v58 = vpop.f32.mrf.mxu0  ;;  %v3873_v33 = vadd.f32 %v3872_v20, %v3871_v16 }
 0x40e   : > { %v3825_v41 = vmul.f32 %v3369_v58, %v3369_v58  ;;  %v3887_v61 = vsel %vm3048_vm0, %v3826_v27, 0.0 }
 0x40f   : > { %v6436_v24 = vpop.f32.mrf.mxu0  ;;  %v3888_v6 = vadd.f32 %v3887_v61, %v3886_v9 }
 0x410   : > { %v3828_v19 = vmul.f32 %v6436_v24, %v6436_v24  ;;  %v3882_v4 = vsel %vm3048_vm0, %v3825_v41, 0.0 }
 0x411   : > { %v3379_v31 = vpop.f32.mrf.mxu0  ;;  %v3883_v24 = vadd.f32 %v3882_v4, %v3881_v0 }
 0x412   : > { %v3827_v58 = vmul.f32 %v3379_v31, %v3379_v31  ;;  %v3897_v36 = vsel %vm3048_vm0, %v3828_v19, 0.0 }
 0x413   : > { %v8331_v40 = vpop.f32.mrf.mxu0  ;;  %v3898_v55 = vadd.f32 %v3897_v36, %v3896_v11 }
 0x414   : > { %v3892_v48 = vsel %vm3048_vm0, %v3827_v58, 0.0  ;;  %v3830_v60 = vmul.f32 %v8331_v40, %v8331_v40 }
 0x415   : > { %v8333_v37 = vpop.f32.mrf.mxu0  ;;  %v3893_v1 = vadd.f32 %v3892_v48, %v3891_v42 }
 0x416   : > { %v3829_v9 = vmul.f32 %v8333_v37, %v8333_v37 }
 0x417   : > { %v8340_v18 = vpop.f32.mrf.mxu0 }
 0x418   : > { %v3832_v0 = vmul.f32 %v8340_v18, %v8340_v18  ;;  %v3907_v18 = vsel %vm3048_vm0, %v3830_v60, 0.0 }
 0x419   : > { %v3399_v59 = vpop.f32.mrf.mxu0  ;;  %v3908_v53 = vadd.f32 %v3907_v18, %v8350_v56 }
 0x41a   : > { %v3831_v62 = vmul.f32 %v3399_v59, %v3399_v59  ;;  %v3917_v27 = vsel %vm3048_vm0, %v3832_v0, 0.0 }
 0x41b   : > { %v6445_v32 = vpop.f32.mrf.mxu0  ;;  %v8422_v19 = vadd.f32 %v3917_v27, %v8356_v46 }
 0x41c   : > { %v3834_v49 = vmul.f32 %v6445_v32, %v6445_v32  ;;  %v3902_v32 = vsel %vm3048_vm0, %v3829_v9, 0.0  ;;  %v3912_v11 = vsel %vm3048_vm0, %v3831_v62, 0.0 }
 0x41d   : > { %v3409_v51 = vpop.f32.mrf.mxu0  ;;  %v8419_v61 = vadd.f32 %v3902_v32, %v8353_v29 }
 0x41e   : > { %v3833_v28 = vmul.f32 %v3409_v51, %v3409_v51  ;;  %v3927_v51 = vsel %vm3048_vm0, %v3834_v49, 0.0 }
 0x41f   : > { %v6448_v23 = vpop.f32.mrf.mxu0  ;;  %v8431_v56 = vadd.f32 %v3927_v51, %v8362_v63 }
 0x420   : > { %v3836_v47 = vmul.f32 %v6448_v23, %v6448_v23  ;;  %v3922_v39 = vsel %vm3048_vm0, %v3833_v28, 0.0 }
 0x421   : > { %v3419_v43 = vpop.f32.mrf.mxu0  ;;  %v8435_v29 = vadd.f32 %v3922_v39, %v8367_v3 }
 0x422   : > { %v3859_v17 = vsel %vm3048_vm0, %v3836_v47, 0.0  ;;  %v3835_v22 = vmul.f32 %v3419_v43, %v3419_v43 }
 0x423   : > { %v8378_v7 = vadd.f32 %v3859_v17, %v3858_v45  ;;  %v6451_v26 = vpop.f32.mrf.mxu0 }
 0x424   : > { %v3854_v34 = vsel %vm3048_vm0, %v3835_v22, 0.0  ;;  %v3838_v31 = vmul.f32 %v6451_v26, %v6451_v26 }
 0x425   : > { %6844 = vrsqrt.f32 %v8378_v7  ;;  %v8388_v5 = vadd.f32 %v3854_v34, %v3853_v35  ;;  %v3429_v16 = vpop.f32.mrf.mxu0  ;;  %v8428_v35 = vadd.f32 %v3912_v11, %v8359_v57  ;;  %vm3940_vm3 = vcmp.eq.f32.partialorder %v8378_v7, inf }
 0x426   : > { %v3869_v15 = vsel %vm3048_vm0, %v3838_v31, 0.0  ;;  %v3837_v13 = vmul.f32 %v3429_v16, %v3429_v16  ;;  %vm3942_vm4 = vcmp.eq.f32.partialorder %v8378_v7, 0.0  ;;  %v3943_v63 = vand.u32 2147483648, %v8378_v7 }
 0x427   : > { %6846 = vrsqrt.f32 %v8388_v5  ;;  %v8396_v50 = vadd.f32 %v3869_v15, %v3868_v30  ;;  %v6454_v40 = vpop.f32.mrf.mxu0  ;;  %v8441_v30 = vpop.f32.mrf.mxu1  ;;  %vm3933_vm5 = vcmp.eq.f32.partialorder %v8388_v5, inf  ;;  %vm3935_vm6 = vcmp.eq.f32.partialorder %v8388_v5, 0.0 }
 0x428   : > { %v3864_v38 = vsel %vm3048_vm0, %v3837_v13, 0.0  ;;  %v3840_v37 = vmul.f32 %v6454_v40, %v6454_v40 }
 0x429   : > { %6848 = vrsqrt.f32 %v8396_v50  ;;  %v8403_v21 = vadd.f32 %v3864_v38, %v3863_v8  ;;  %v3439_v59 = vpop.f32.mrf.mxu0  ;;  %vm3954_vm7 = vcmp.eq.f32.partialorder %v8396_v50, inf  ;;  %v3957_v34 = vand.u32 2147483648, %v8396_v50  ;;  %v8459_v48 = vpop.f32.mrf.mxu1 }
 0x42a   : > { %v3879_v41 = vsel %vm3048_vm0, %v3840_v37, 0.0  ;;  %v3839_v12 = vmul.f32 %v3439_v59, %v3439_v59  ;;  %vm3956_vm10 = vcmp.eq.f32.partialorder %v8396_v50, 0.0 }
 0x42b   : > { %6850 = vrsqrt.f32 %v8403_v21  ;;  %v8411_v42 = vadd.f32 %v3879_v41, %v3878_v25  ;;  %v6457_v2 = vpop.f32.mrf.mxu0  ;;  %vm3947_vm8 = vcmp.eq.f32.partialorder %v8403_v21, inf  ;;  %vm3949_vm9 = vcmp.eq.f32.partialorder %v8403_v21, 0.0  ;;  %v8482_v59 = vpop.f32.mrf.mxu1 }
 0x42c   : > { %v3874_v23 = vsel %vm3048_vm0, %v3839_v12, 0.0  ;;  %v3842_v20 = vmul.f32 %v6457_v2, %v6457_v2  ;;  %v3950_v13 = vand.u32 2147483648, %v8403_v21 }
 0x42d   : > { %6852 = vrsqrt.f32 %v8411_v42  ;;  %v8425_v47 = vadd.f32 %v3874_v23, %v3873_v33  ;;  %v3449_v45 = vpop.f32.mrf.mxu0  ;;  %vm3968_vm11 = vcmp.eq.f32.partialorder %v8411_v42, inf  ;;  %v3971_v12 = vand.u32 2147483648, %v8411_v42 }
 0x42e   : > { %v3889_v4 = vsel %vm3048_vm0, %v3842_v20, 0.0  ;;  %v3841_v58 = vmul.f32 %v3449_v45, %v3449_v45  ;;  %vm3970_vm14 = vcmp.eq.f32.partialorder %v8411_v42, 0.0 }
 0x42f   : > { %6854 = vrsqrt.f32 %v8425_v47  ;;  %v8438_v46 = vadd.f32 %v3889_v4, %v3888_v6  ;;  %v6460_v43 = vpop.f32.mrf.mxu0  ;;  %v3936_v6 = vand.u32 2147483648, %v8388_v5  ;;  %vm3961_vm12 = vcmp.eq.f32.partialorder %v8425_v47, inf }
 0x430   : > { %v3884_v57 = vsel %vm3048_vm0, %v3841_v58, 0.0  ;;  %v3844_v8 = vmul.f32 %v6460_v43, %v6460_v43  ;;  %v8510_v43 = vpop.f32.mrf.mxu1  ;;  %vm3963_vm13 = vcmp.eq.f32.partialorder %v8425_v47, 0.0 }
 0x431   : > { %6856 = vrsqrt.f32 %v8438_v46  ;;  %v8447_v3 = vadd.f32 %v3884_v57, %v3883_v24  ;;  %v3459_v17 = vpop.f32.mrf.mxu0  ;;  %vm3982_vm15 = vcmp.eq.f32.partialorder %v8438_v46, inf }
 0x432   : > { %v6845_v22 = vpop.eup %6844  ;;  %v3899_v25 = vsel %vm3048_vm0, %v3844_v8, 0.0  ;;  %v3843_v33 = vmul.f32 %v3459_v17, %v3459_v17 }
 0x433   : > { %6858 = vrsqrt.f32 %v8447_v3  ;;  %v8455_v26 = vadd.f32 %v3899_v25, %v3898_v55  ;;  %v6463_v36 = vpop.f32.mrf.mxu0  ;;  %v3939_v24 = vmul.f32 %v6845_v22, %v8378_v7  ;;  %vm3975_vm1 = vcmp.eq.f32.partialorder %v8447_v3, inf }
 0x434   : > { %v6847_v31 = vpop.eup %6846  ;;  %v3894_v60 = vsel %vm3048_vm0, %v3843_v33, 0.0  ;;  %v3846_v16 = vmul.f32 %v6463_v36, %v6463_v36  ;;  %v3964_v36 = vand.u32 2147483648, %v8425_v47  ;;  %vm3977_vm2 = vcmp.eq.f32.partialorder %v8447_v3, 0.0 }
 0x435   : > { %6860 = vrsqrt.f32 %v8455_v26  ;;  %v8466_v9 = vadd.f32 %v3894_v60, %v3893_v1  ;;  %v3469_v0 = vpop.f32.mrf.mxu0  ;;  %v3932_v15 = vmul.f32 %v6847_v31, %v8388_v5  ;;  %v3941_v55 = vsel %vm3940_vm3, %v8378_v7, %v3939_v24  ;;  %v8538_v60 = vpop.f32.mrf.mxu1 }
 0x436   : > { %v6849_v62 = vpop.eup %6848  ;;  %v3909_v49 = vsel %vm3048_vm0, %v3846_v16, 0.0  ;;  %v3845_v40 = vmul.f32 %v3469_v0, %v3469_v0  ;;  %v3944_v2 = vsel %vm3942_vm4, %v3943_v63, %v3941_v55  ;;  %vm3984_vm3 = vcmp.eq.f32.partialorder %v8438_v46, 0.0 }
 0x437   : > { %6862 = vrsqrt.f32 %v8466_v9  ;;  %v8476_v28 = vadd.f32 %v3909_v49, %v3908_v53  ;;  %v6466_v38 = vpop.f32.mrf.mxu0  ;;  %v3934_v37 = vsel %vm3933_vm5, %v8388_v5, %v3932_v15  ;;  %v3953_v1 = vmul.f32 %v6849_v62, %v8396_v50 }
 0x438   : > { %v6851_v18 = vpop.eup %6850  ;;  %v3904_v32 = vsel %vm3048_vm0, %v3845_v40, 0.0  ;;  %v3848_v27 = vmul.f32 %v6466_v38, %v6466_v38  ;;  %v3937_v41 = vsel %vm3935_vm6, %v3936_v6, %v3934_v37  ;;  %v3985_v49 = vand.u32 2147483648, %v8438_v46  ;;  %v8560_v38 = vpop.f32.mrf.mxu1 }
 0x439   : > { %6864 = vrsqrt.f32 %v8476_v28  ;;  %v8490_v11 = vadd.f32 %v3904_v32, %v8419_v61  ;;  %v3479_v51 = vpop.f32.mrf.mxu0  ;;  %6550 = vmatprep.mubr.msk.f32.mxu0 %vm3048_vm0, %v3937_v41  ;;  %v3946_v53 = vmul.f32 %v6851_v18, %v8403_v21  ;;  %v3955_v20 = vsel %vm3954_vm7, %v8396_v50, %v3953_v1 }
 0x43a   : > { %v6853_v39 = vpop.eup %6852  ;;  %v3919_v23 = vsel %vm3048_vm0, %v3848_v27, 0.0  ;;  %v3847_v5 = vmul.f32 %v3479_v51, %v3479_v51  ;;  %6551 = vmatmul.mubr.msk.f32.vlgmr.msra.gmra.mxu0 %vm3048_vm0, %v3944_v2  ;;  %v3958_v22 = vsel %vm3956_vm10, %v3957_v34, %v3955_v20  ;;  %vm3996_vm4 = vcmp.eq.f32.partialorder %v8455_v26, inf  ;;  %v8574_v2 = vpop.f32.mrf.mxu1 }
 0x43b   : > { %6866 = vrsqrt.f32 %v8490_v11  ;;  %v8504_v61 = vadd.f32 %v3919_v23, %v8422_v19  ;;  %v6469_v7 = vpop.f32.mrf.mxu0  ;;  %v3948_v45 = vsel %vm3947_vm8, %v8403_v21, %v3946_v53  ;;  %v3967_v4 = vmul.f32 %v6853_v39, %v8411_v42  ;;  %9227 = vst [vmem:[#allocation7_spill] sm:$0xff] %v8574_v2 }
 0x43c   : > { %v6855_v58 = vpop.eup %6854  ;;  %v3914_v57 = vsel %vm3048_vm0, %v3847_v5, 0.0  ;;  %v3850_v8 = vmul.f32 %v6469_v7, %v6469_v7  ;;  %v3951_v63 = vsel %vm3949_vm9, %v3950_v13, %v3948_v45  ;;  %vm3989_vm5 = vcmp.eq.f32.partialorder %v8466_v9, inf }
 0x43d   : > { %6868 = vrsqrt.f32 %v8504_v61  ;;  %v8518_v19 = vadd.f32 %v3914_v57, %v8428_v35  ;;  %v3489_v17 = vpop.f32.mrf.mxu0  ;;  %6553 = vmatprep.mubr.msk.f32.mxu0 %vm3048_vm0, %v3951_v63  ;;  %v3960_v25 = vmul.f32 %v6855_v58, %v8425_v47  ;;  %v3969_v35 = vsel %vm3968_vm11, %v8411_v42, %v3967_v4  ;;  %v8588_v58 = vpop.f32.mrf.mxu1 }
 0x43e   : > { %v6857_v33 = vpop.eup %6856  ;;  %v3929_v6 = vsel %vm3048_vm0, %v3850_v8, 0.0  ;;  %v3849_v21 = vmul.f32 %v3489_v17, %v3489_v17  ;;  %6554 = vmatmul.mubr.msk.f32.gmra.mxu0 %vm3048_vm0, %v3958_v22  ;;  %v3972_v15 = vsel %vm3970_vm14, %v3971_v12, %v3969_v35  ;;  %vm3991_vm6 = vcmp.eq.f32.partialorder %v8466_v9, 0.0  ;;  %9228 = vst [vmem:[#allocation9_spill] sm:$0xff] %v8588_v58 }
 0x43f   : > { %6870 = vrsqrt.f32 %v8518_v19  ;;  %v8532_v24 = vadd.f32 %v3929_v6, %v8431_v56  ;;  %v3962_v50 = vsel %vm3961_vm12, %v8425_v47, %v3960_v25  ;;  %v3981_v34 = vmul.f32 %v6857_v33, %v8438_v46 }
 0x440   : > { %v6859_v31 = vpop.eup %6858  ;;  %v3924_v16 = vsel %vm3048_vm0, %v3849_v21, 0.0  ;;  %v3965_v0 = vsel %vm3963_vm13, %v3964_v36, %v3962_v50  ;;  %v3978_v47 = vand.u32 2147483648, %v8447_v3  ;;  %vm3998_vm7 = vcmp.eq.f32.partialorder %v8455_v26, 0.0  ;;  %v8602_v21 = vpop.f32.mrf.mxu1 }
 0x441   : > { %6872 = vrsqrt.f32 %v8532_v24  ;;  %v8547_v56 = vadd.f32 %v3924_v16, %v8435_v29  ;;  %6556 = vmatprep.mubr.msk.f32.mxu0 %vm3048_vm0, %v3965_v0  ;;  %v3974_v13 = vmul.f32 %v6859_v31, %v8447_v3  ;;  %v3983_v42 = vsel %vm3982_vm15, %v8438_v46, %v3981_v34  ;;  %9229 = vst [vmem:[#allocation8_spill] sm:$0xff] %v8602_v21 }
 0x442   : > { %v6861_v62 = vpop.eup %6860  ;;  %6557 = vmatmul.mubr.msk.f32.gmra.mxu0 %vm3048_vm0, %v3972_v15  ;;  %v3986_v1 = vsel %vm3984_vm3, %v3985_v49, %v3983_v42  ;;  %v3999_v46 = vand.u32 2147483648, %v8455_v26  ;;  %vm4010_vm8 = vcmp.eq.f32.partialorder %v8476_v28, inf  ;;  %vm4003_vm9 = vcmp.eq.f32.partialorder %v8490_v11, inf  ;;  %v8615_v16 = vpop.f32.mrf.mxu1 }
 0x443   : > { %6874 = vrsqrt.f32 %v8547_v56  ;;  %v3976_v29 = vsel %vm3975_vm1, %v8447_v3, %v3974_v13  ;;  %v3995_v40 = vmul.f32 %v6861_v62, %v8455_v26  ;;  %v3992_v3 = vand.u32 2147483648, %v8466_v9  ;;  %9230 = vst [vmem:[#allocation11_spill] sm:$0xff] %v8615_v16 }
 0x444   : > { %v6863_v55 = vpop.eup %6862  ;;  %v3979_v37 = vsel %vm3977_vm2, %v3978_v47, %v3976_v29  ;;  %vm4005_vm10 = vcmp.eq.f32.partialorder %v8490_v11, 0.0  ;;  %vm4012_vm11 = vcmp.eq.f32.partialorder %v8476_v28, 0.0  ;;  %vm4024_vm12 = vcmp.eq.f32.partialorder %v8504_v61, inf  ;;  %v8620_v13 = vpop.f32.mrf.mxu1 }
 0x445   : > { %6559 = vmatprep.mubr.msk.f32.mxu0 %vm3048_vm0, %v3979_v37  ;;  %v3988_v18 = vmul.f32 %v6863_v55, %v8466_v9  ;;  %v3997_v27 = vsel %vm3996_vm4, %v8455_v26, %v3995_v40  ;;  %v4013_v26 = vand.u32 2147483648, %v8476_v28  ;;  %vm4017_vm13 = vcmp.eq.f32.partialorder %v8518_v19, inf  ;;  %9231 = vst [vmem:[#allocation10_spill] sm:$0xff] %v8620_v13 }
 0x446   : > { %v6865_v32 = vpop.eup %6864  ;;  %6560 = vmatmul.mubr.msk.f32.gmra.mxu0 %vm3048_vm0, %v3986_v1  ;;  %v4000_v39 = vsel %vm3998_vm7, %v3999_v46, %v3997_v27  ;;  %vm4019_vm14 = vcmp.eq.f32.partialorder %v8518_v19, 0.0  ;;  %vm4026_vm15 = vcmp.eq.f32.partialorder %v8504_v61, 0.0  ;;  %vm4038_vm1 = vcmp.eq.f32.partialorder %v8532_v24, inf  ;;  %v8622_v62 = vpop.f32.mrf.mxu1 }
 0x447   : > { %v3990_v41 = vsel %vm3989_vm5, %v8466_v9, %v3988_v18  ;;  %v4009_v12 = vmul.f32 %v6865_v32, %v8476_v28  ;;  %v4006_v9 = vand.u32 2147483648, %v8490_v11  ;;  %vm4031_vm2 = vcmp.eq.f32.partialorder %v8547_v56, inf }
 0x448   : > { %v6867_v51 = vpop.eup %6866  ;;  %v3993_v53 = vsel %vm3991_vm6, %v3992_v3, %v3990_v41  ;;  %vm4033_vm3 = vcmp.eq.f32.partialorder %v8547_v56, 0.0  ;;  %vm4040_vm4 = vcmp.eq.f32.partialorder %v8532_v24, 0.0  ;;  %v8624_v47 = vpop.f32.mrf.mxu1  ;;  %vm4961_vm5 = vcmask 7168  }
 0x449   : > { %6562 = vmatprep.mubr.msk.f32.mxu0 %vm3048_vm0, %v3993_v53  ;;  %v4002_v23 = vmul.f32 %v6867_v51, %v8490_v11  ;;  %v4011_v20 = vsel %vm4010_vm8, %v8476_v28, %v4009_v12  ;;  %v4027_v28 = vand.u32 2147483648, %v8504_v61  ;;  %v956_v53 = vld [vmem:[%s9168_s17 + $0x8] sm:$0xff] }
 0x44a   : > { %v6869_v5 = vpop.eup %6868  ;;  %6563 = vmatmul.mubr.msk.f32.gmra.mxu0 %vm3048_vm0, %v4000_v39  ;;  %v4014_v8 = vsel %vm4012_vm11, %v4013_v26, %v4011_v20  ;;  %v8626_v42 = vpop.f32.mrf.mxu1  ;;  %6630 = vmatprep.subr.mxu1 %v956_v53  ;;  %v953_v20 = vld [vmem:[%s9167_s16] sm:$0xff] }
 0x44b   : > { %v4004_v7 = vsel %vm4003_vm9, %v8490_v11, %v4002_v23  ;;  %v4023_v45 = vmul.f32 %v6869_v5, %v8504_v61  ;;  %v4020_v11 = vand.u32 2147483648, %v8518_v19  ;;  %6631 = vmatpush3.msra.mxu1 %v956_v53  ;;  %v954_v23 = vld [vmem:[%s9167_s16 + $0x8] sm:$0xff] }
 0x44c   : > { %v6871_v4 = vpop.eup %6870  ;;  %v4007_v57 = vsel %vm4005_vm10, %v4006_v9, %v4004_v7  ;;  %6602 = vmatprep.subr.mxu0 %v954_v23  ;;  %v955_v9 = vld [vmem:[%s9168_s17] sm:$0xff] }
 0x44d   : > { %6565 = vmatprep.mubr.msk.f32.mxu0 %vm3048_vm0, %v4007_v57  ;;  %v4016_v63 = vmul.f32 %v6871_v4, %v8518_v19  ;;  %v4025_v22 = vsel %vm4024_vm12, %v8504_v61, %v4023_v45  ;;  %v4041_v61 = vand.u32 2147483648, %v8532_v24  ;;  %6603 = vmatpush3.msra.mxu0 %v954_v23 }
 0x44e   : > { %v6873_v17 = vpop.eup %6872  ;;  %6566 = vmatmul.mubr.msk.f32.gmra.mxu0 %vm3048_vm0, %v4014_v8  ;;  %v4028_v35 = vsel %vm4026_vm15, %v4027_v28, %v4025_v22  ;;  %6632 = vmatprep.subr.mxu1 %v955_v9 }
 0x44f   : > { %v4018_v25 = vsel %vm4017_vm13, %v8518_v19, %v4016_v63  ;;  %v4037_v33 = vmul.f32 %v6873_v17, %v8532_v24  ;;  %v4034_v19 = vand.u32 2147483648, %v8547_v56  ;;  %6604 = vmatprep.subr.mxu0 %v953_v20  ;;  %6633 = vmatpush3.msra.mxu1 %v955_v9 }
 0x450   : > { %v6875_v6 = vpop.eup %6874  ;;  %v4021_v36 = vsel %vm4019_vm14, %v4020_v11, %v4018_v25  ;;  %6605 = vmatpush3.msra.mxu0 %v953_v20 }
 0x451   : > { %6568 = vmatprep.mubr.msk.f32.mxu0 %vm3048_vm0, %v4021_v36  ;;  %v4030_v50 = vmul.f32 %v6875_v6, %v8547_v56  ;;  %v4039_v34 = vsel %vm4038_vm1, %v8532_v24, %v4037_v33 }
 0x452   : > { %6569 = vmatmul.mubr.msk.f32.gmra.mxu0 %vm3048_vm0, %v4028_v35  ;;  %v4042_v15 = vsel %vm4040_vm4, %v4041_v61, %v4039_v34 }
 0x453   : > { %v4032_v31 = vsel %vm4031_vm2, %v8547_v56, %v4030_v50  ;;  %v8628_v56 = vpop.f32.mrf.mxu1 }
 0x454   : > { %v4035_v0 = vsel %vm4033_vm3, %v4034_v19, %v4032_v31  ;;  %v8701_v31 = vld [vmem:[%s9166_s15] ss:$0 sm:$0xff] }
 0x455   : > { %6571 = vmatprep.mubr.msk.f32.mxu0 %vm3048_vm0, %v4035_v0  ;;  %v8630_v49 = vpop.f32.mrf.mxu1 }
 0x456   : > { %6572 = vmatmul.mubr.msk.f32.gmra.mxu0 %vm3048_vm0, %v4042_v15 }
 0x457   : > { %v8632_v29 = vpop.f32.mrf.mxu1 }
 0x459   : > { %v8634_v24 = vpop.f32.mrf.mxu1 }
 0x45b   : > { %v8636_v40 = vpop.f32.mrf.mxu1 }
 0x45d   : > { %v8638_v55 = vpop.f32.mrf.mxu1 }
 0x45f   : > { %v8640_v37 = vpop.f32.mrf.mxu1 }
 0x461   : > { %v8642_v1 = vpop.f32.mrf.mxu1 }
 0x463   : > { %v8644_v18 = vpop.f32.mrf.mxu1 }
 0x464   : > { %9232 = vst [vmem:[#allocation13_spill] sm:$0xff] %v8644_v18 }
 0x465   : > { %v8646_v32 = vpop.f32.mrf.mxu1 }
 0x466   : > { %9233 = vst [vmem:[#allocation12_spill] sm:$0xff] %v8646_v32 }
 0x467   : > { %v8648_v3 = vpop.f32.mrf.mxu1 }
 0x468   : > { %9234 = vst [vmem:[#allocation15_spill] sm:$0xff] %v8648_v3 }
 0x469   : > { %v8650_v27 = vpop.f32.mrf.mxu1 }
 0x46a   : > { %9235 = vst [vmem:[#allocation14_spill] sm:$0xff] %v8650_v27 }
 0x46b   : > { %v8652_v41 = vpop.f32.mrf.mxu1 }
 0x46c   : > { %9236 = vst [vmem:[#allocation17_spill] sm:$0xff] %v8652_v41 }
 0x46d   : > { %v8654_v46 = vpop.f32.mrf.mxu1 }
 0x46f   : > { %v8656_v12 = vpop.f32.mrf.mxu1 }
 0x471   : > { %v8658_v51 = vpop.f32.mrf.mxu1 }
 0x473   : > { %v8663_v39 = vpop.f32.mrf.mxu1 }
 0x475   : > { %v8668_v5 = vpop.f32.mrf.mxu1 }
 0x477   : > { %v8676_v7 = vpop.f32.mrf.mxu1 }
 0x479   : > { %v8678_v26 = vpop.f32.mrf.mxu1 }
 0x47b   : > { %v8680_v45 = vpop.f32.mrf.mxu1 }
 0x47d   : > { %v8682_v4 = vpop.f32.mrf.mxu1 }
 0x47f   : > { %v8684_v57 = vpop.f32.mrf.mxu1 }
 0x481   : > { %v8686_v8 = vpop.f32.mrf.mxu1 }
 0x482   : > { %9237 = vst [vmem:[#allocation16_spill] sm:$0xff] %v8686_v8 }
 0x483   : > { %v8688_v63 = vpop.f32.mrf.mxu1 }
 0x484   : > { %9238 = vst [vmem:[#allocation19_spill] sm:$0xff] %v8688_v63 }
 0x485   : > { %v8690_v17 = vpop.f32.mrf.mxu1 }
 0x486   : > { %9239 = vst [vmem:[#allocation18_spill] sm:$0xff] %v8690_v17 }
 0x487   : > { %v8692_v11 = vpop.f32.mrf.mxu1 }
 0x488   : > { %9240 = vst [vmem:[#allocation21_spill] sm:$0xff] %v8692_v11 }
 0x489   : > { %v8694_v22 = vpop.f32.mrf.mxu1 }
 0x48a   : > { %9241 = vst [vmem:[#allocation20_spill] sm:$0xff] %v8694_v22 }
 0x48b   : > { %v8696_v25 = vpop.f32.mrf.mxu1 }
 0x48c   : > { %9242 = vst [vmem:[#allocation23_spill] sm:$0xff] %v8696_v25 }
 0x48d   : > { %v6580_v28 = vpop.f32.mrf.mxu1 }
 0x48f   : > { %v4350_v33 = vpop.f32.mrf.mxu1 }
 0x491   : > { %v6583_v6 = vpop.f32.mrf.mxu1 }
 0x493   : > { %v4360_v36 = vpop.f32.mrf.mxu1 }
 0x495   : > { %v6586_v35 = vpop.f32.mrf.mxu1 }
 0x497   : > { %v4370_v50 = vpop.f32.mrf.mxu1 }
 0x499   : > { %v6589_v19 = vpop.f32.mrf.mxu1 }
 0x49b   : > { %v4380_v34 = vpop.f32.mrf.mxu1 }
 0x49d   : > { %v6592_v15 = vpop.f32.mrf.mxu1 }
 0x49f   : > { %v4390_v22 = vpop.f32.mrf.mxu1 }
 0x4fa   : > { %v6552_v61 = vpop.f32.mrf.mxu0 }
 0x4fb   : > { %v4356_v0 = vadd.f32 %v6580_v28, %v6552_v61 }
 0x4fc   : > { %v4157_v53 = vpop.f32.mrf.mxu0 }
 0x4fd   : > { %v8704_v23 = vadd.f32 %v8701_v31, %v4356_v0  ;;  %v4351_v9 = vadd.f32 %v4350_v33, %v4157_v53 }
 0x4fe   : > { %v6555_v20 = vpop.f32.mrf.mxu0 }
 0x4ff   : > { %v5695_v25 = vmul.f32 -1.442695, %v8704_v23  ;;  %v8708_v41 = vadd.f32 %v8701_v31, %v4351_v9  ;;  %v4366_v13 = vadd.f32 %v6583_v6, %v6555_v20  ;;  %v6595_v9 = vpop.f32.mrf.mxu1 }
 0x500   : > { %v4167_v27 = vpop.f32.mrf.mxu0 }
 0x501   : > { %6876 = vpow2.f32 %v5695_v25  ;;  %v5694_v16 = vmul.f32 -1.442695, %v8708_v41  ;;  %v8712_v28 = vadd.f32 %v8701_v31, %v4366_v13  ;;  %v4361_v61 = vadd.f32 %v4360_v36, %v4167_v27 }
 0x502   : > { %v6558_v11 = vpop.f32.mrf.mxu0 }
 0x503   : > { %6878 = vpow2.f32 %v5694_v16  ;;  %v5697_v33 = vmul.f32 -1.442695, %v8712_v28  ;;  %v8716_v0 = vadd.f32 %v8701_v31, %v4361_v61  ;;  %v4376_v53 = vadd.f32 %v6586_v35, %v6558_v11  ;;  %v4400_v61 = vpop.f32.mrf.mxu1 }
 0x504   : > { %v4177_v3 = vpop.f32.mrf.mxu0 }
 0x505   : > { %6880 = vpow2.f32 %v5697_v33  ;;  %v5696_v6 = vmul.f32 -1.442695, %v8716_v0  ;;  %v8720_v25 = vadd.f32 %v8701_v31, %v4376_v53  ;;  %v4371_v20 = vadd.f32 %v4370_v50, %v4177_v3 }
 0x506   : > { %v6561_v13 = vpop.f32.mrf.mxu0 }
 0x507   : > { %6882 = vpow2.f32 %v5696_v6  ;;  %v5699_v27 = vmul.f32 -1.442695, %v8720_v25  ;;  %v8724_v16 = vadd.f32 %v8701_v31, %v4371_v20  ;;  %v4386_v36 = vadd.f32 %v6589_v19, %v6561_v13  ;;  %v6598_v20 = vpop.f32.mrf.mxu1 }
 0x508   : > { %v4187_v21 = vpop.f32.mrf.mxu0 }
 0x509   : > { %6884 = vpow2.f32 %v5699_v27  ;;  %v5698_v11 = vmul.f32 -1.442695, %v8724_v16  ;;  %v8728_v35 = vadd.f32 %v8701_v31, %v4386_v36  ;;  %v4381_v33 = vadd.f32 %v4380_v34, %v4187_v21 }
 0x50a   : > { %v6564_v53 = vpop.f32.mrf.mxu0 }
 0x50b   : > { %6886 = vpow2.f32 %v5698_v11  ;;  %v5701_v3 = vmul.f32 -1.442695, %v8728_v35  ;;  %v8732_v50 = vadd.f32 %v8701_v31, %v4381_v33  ;;  %v4396_v6 = vadd.f32 %v6592_v15, %v6564_v53  ;;  %v4410_v15 = vpop.f32.mrf.mxu1 }
 0x50c   : > { %v4197_v17 = vpop.f32.mrf.mxu0 }
 0x50d   : > { %6888 = vpow2.f32 %v5701_v3  ;;  %v5700_v19 = vmul.f32 -1.442695, %v8732_v50  ;;  %v8736_v13 = vadd.f32 %v8701_v31, %v4396_v6  ;;  %v4391_v27 = vadd.f32 %v4390_v22, %v4197_v17 }
 0x50e   : > { %v6877_v36 = vpop.eup %6876  ;;  %v6567_v32 = vpop.f32.mrf.mxu0 }
 0x50f   : > { %v4500_v21 = vadd.f32 1.0, %v6877_v36  ;;  %6890 = vpow2.f32 %v5700_v19  ;;  %v5703_v34 = vmul.f32 -1.442695, %v8736_v13  ;;  %v8740_v11 = vadd.f32 %v8701_v31, %v4391_v27 }
 0x510   : > { %v6879_v33 = vpop.eup %6878  ;;  %v4406_v53 = vadd.f32 %v6595_v9, %v6567_v32  ;;  %v4207_v58 = vpop.f32.mrf.mxu0 }
 0x511   : > { %6892 = vrcp.f32 %v4500_v21  ;;  %v4499_v3 = vadd.f32 1.0, %v6879_v33  ;;  %v5702_v63 = vmul.f32 -1.442695, %v8740_v11  ;;  %v4401_v6 = vadd.f32 %v4400_v61, %v4207_v58  ;;  %v6601_v32 = vpop.f32.mrf.mxu1 }
 0x512   : > { %v6881_v18 = vpop.eup %6880  ;;  %6894 = vpow2.f32 %v5703_v34  ;;  %v8744_v17 = vadd.f32 %v8701_v31, %v4406_v53  ;;  %v6570_v22 = vpop.f32.mrf.mxu0 }
 0x513   : > { %6896 = vrcp.f32 %v4499_v3  ;;  %v4502_v19 = vadd.f32 1.0, %v6881_v18  ;;  %v8747_v27 = vadd.f32 %v8701_v31, %v4401_v6  ;;  %v4416_v36 = vadd.f32 %v6598_v20, %v6570_v22  ;;  %v4420_v22 = vpop.f32.mrf.mxu1 }
 0x514   : > { %v6883_v2 = vpop.eup %6882  ;;  %6898 = vpow2.f32 %v5702_v63  ;;  %v5705_v9 = vmul.f32 -1.442695, %v8744_v17  ;;  %v4217_v21 = vpop.f32.mrf.mxu0 }
 0x515   : > { %6900 = vrcp.f32 %v4502_v19  ;;  %v4501_v58 = vadd.f32 1.0, %v6883_v2  ;;  %v5704_v61 = vmul.f32 -1.442695, %v8747_v27  ;;  %v8752_v34 = vadd.f32 %v8701_v31, %v4416_v36 }
 0x516   : > { %v6885_v33 = vpop.eup %6884  ;;  %6902 = vpow2.f32 %v5705_v9  ;;  %v4411_v18 = vadd.f32 %v4410_v15, %v4217_v21  ;;  %v6573_v53 = vpop.f32.mrf.mxu0 }
 0x517   : > { %6904 = vrcp.f32 %v4501_v58  ;;  %v4504_v3 = vadd.f32 1.0, %v6885_v33  ;;  %v5707_v20 = vmul.f32 -1.442695, %v8752_v34  ;;  %v4426_v6 = vadd.f32 %v6601_v32, %v6573_v53 }
 0x518   : > { %v6887_v63 = vpop.eup %6886  ;;  %6906 = vpow2.f32 %v5704_v61  ;;  %v8756_v19 = vadd.f32 %v8701_v31, %v4411_v18  ;;  %v4227_v2 = vpop.f32.mrf.mxu0 }
 0x519   : > { %6908 = vrcp.f32 %v4504_v3  ;;  %v4503_v8 = vadd.f32 1.0, %v6887_v63  ;;  %v8759_v36 = vadd.f32 %v8701_v31, %v4426_v6  ;;  %v4421_v9 = vadd.f32 %v4420_v22, %v4227_v2 }
 0x51a   : > { %v6889_v15 = vpop.eup %6888  ;;  %6910 = vpow2.f32 %v5707_v20  ;;  %v5706_v21 = vmul.f32 -1.442695, %v8756_v19 }
 0x51b   : > { %6912 = vrcp.f32 %v4503_v8  ;;  %v4506_v58 = vadd.f32 1.0, %v6889_v15  ;;  %v5709_v32 = vmul.f32 -1.442695, %v8759_v36  ;;  %v8764_v61 = vadd.f32 %v8701_v31, %v4421_v9 }
 0x51c   : > { %v6891_v33 = vpop.eup %6890  ;;  %6914 = vpow2.f32 %v5706_v21 }
 0x51d   : > { %6916 = vrcp.f32 %v4506_v58  ;;  %v4505_v18 = vadd.f32 1.0, %v6891_v33  ;;  %v5708_v53 = vmul.f32 -1.442695, %v8764_v61 }
 0x51e   : > { %v6893_v3 = vpop.eup %6892  ;;  %6918 = vpow2.f32 %v5709_v32 }
 0x51f   : > { %v6895_v6 = vpop.eup %6894  ;;  %6920 = vrcp.f32 %v4505_v18  ;;  %v4548_v31 = vmul.f32 %v6893_v3, %v8704_v23 }
 0x520   : > { %v6897_v20 = vpop.eup %6896  ;;  %v4508_v63 = vadd.f32 1.0, %v6895_v6  ;;  %6922 = vpow2.f32 %v5708_v53 }
 0x521   : > { %v6899_v8 = vpop.eup %6898  ;;  %v4547_v22 = vmul.f32 %v6897_v20, %v8708_v41 }
 0x522   : > { %v6901_v2 = vpop.eup %6900  ;;  %v4507_v9 = vadd.f32 1.0, %v6899_v8  ;;  %6924 = vrcp.f32 %v4508_v63 }
 0x523   : > { %v6903_v15 = vpop.eup %6902  ;;  %6606 = vmatprep.mubr.msk.f32.mxu0 %vm3048_vm0, %v4547_v22  ;;  %6634 = vmatprep.mubr.msk.f32.mxu1 %vm3048_vm0, %v4547_v22  ;;  %v4550_v23 = vmul.f32 %v6901_v2, %v8712_v28 }
 0x524   : > { %v6905_v21 = vpop.eup %6904  ;;  %6926 = vrcp.f32 %v4507_v9  ;;  %v4510_v58 = vadd.f32 1.0, %v6903_v15  ;;  %6607 = vmatmul.mubr.msk.f32.vlgmr.msra.gmra.mxu0 %vm3048_vm0, %v4548_v31  ;;  %6635 = vmatmul.mubr.msk.f32.vlgmr.msra.gmra.mxu1 %vm3048_vm0, %v4548_v31 }
 0x525   : > { %v6907_v32 = vpop.eup %6906  ;;  %v4549_v41 = vmul.f32 %v6905_v21, %v8716_v0 }
 0x526   : > { %v6909_v33 = vpop.eup %6908  ;;  %v4509_v18 = vadd.f32 1.0, %v6907_v32  ;;  %6928 = vrcp.f32 %v4510_v58 }
 0x527   : > { %v6911_v53 = vpop.eup %6910  ;;  %6609 = vmatprep.mubr.msk.f32.mxu0 %vm3048_vm0, %v4549_v41  ;;  %6637 = vmatprep.mubr.msk.f32.mxu1 %vm3048_vm0, %v4549_v41  ;;  %v4552_v28 = vmul.f32 %v6909_v33, %v8720_v25 }
 0x528   : > { %v6913_v3 = vpop.eup %6912  ;;  %6930 = vrcp.f32 %v4509_v18  ;;  %v4512_v6 = vadd.f32 1.0, %v6911_v53  ;;  %6610 = vmatmul.mubr.msk.f32.gmra.mxu0 %vm3048_vm0, %v4550_v23  ;;  %6638 = vmatmul.mubr.msk.f32.gmra.mxu1 %vm3048_vm0, %v4550_v23 }
 0x529   : > { %v6915_v20 = vpop.eup %6914  ;;  %v4551_v0 = vmul.f32 %v6913_v3, %v8724_v16 }
 0x52a   : > { %v6917_v63 = vpop.eup %6916  ;;  %v4511_v8 = vadd.f32 1.0, %v6915_v20  ;;  %6932 = vrcp.f32 %v4512_v6 }
 0x52b   : > { %v6919_v22 = vpop.eup %6918  ;;  %6612 = vmatprep.mubr.msk.f32.mxu0 %vm3048_vm0, %v4551_v0  ;;  %6640 = vmatprep.mubr.msk.f32.mxu1 %vm3048_vm0, %v4551_v0  ;;  %v4554_v15 = vmul.f32 %v6917_v63, %v8728_v35 }
 0x52c   : > { %v6921_v2 = vpop.eup %6920  ;;  %6934 = vrcp.f32 %v4511_v8  ;;  %v4514_v31 = vadd.f32 1.0, %v6919_v22  ;;  %6613 = vmatmul.mubr.msk.f32.gmra.mxu0 %vm3048_vm0, %v4552_v28  ;;  %6641 = vmatmul.mubr.msk.f32.gmra.mxu1 %vm3048_vm0, %v4552_v28 }
 0x52d   : > { %v6923_v9 = vpop.eup %6922  ;;  %v4553_v16 = vmul.f32 %v6921_v2, %v8732_v50 }
 0x52e   : > { %v4513_v25 = vadd.f32 1.0, %v6923_v9  ;;  %6936 = vrcp.f32 %v4514_v31 }
 0x52f   : > { %6615 = vmatprep.mubr.msk.f32.mxu0 %vm3048_vm0, %v4553_v16  ;;  %6643 = vmatprep.mubr.msk.f32.mxu1 %vm3048_vm0, %v4553_v16  ;;  %v6925_v21 = vpop.eup %6924 }
 0x530   : > { %6938 = vrcp.f32 %v4513_v25  ;;  %6616 = vmatmul.mubr.msk.f32.gmra.mxu0 %vm3048_vm0, %v4554_v15  ;;  %6644 = vmatmul.mubr.msk.f32.gmra.mxu1 %vm3048_vm0, %v4554_v15  ;;  %v4556_v41 = vmul.f32 %v6925_v21, %v8736_v13 }
 0x531   : > { %v6927_v58 = vpop.eup %6926 }
 0x532   : > { %v4555_v32 = vmul.f32 %v6927_v58, %v8740_v11 }
 0x533   : > { %v6929_v50 = vpop.eup %6928 }
 0x534   : > { %6618 = vmatprep.mubr.msk.f32.mxu0 %vm3048_vm0, %v4555_v32  ;;  %6646 = vmatprep.mubr.msk.f32.mxu1 %vm3048_vm0, %v4555_v32  ;;  %v4558_v23 = vmul.f32 %v6929_v50, %v8744_v17 }
 0x535   : > { %v6931_v35 = vpop.eup %6930  ;;  %6619 = vmatmul.mubr.msk.f32.gmra.mxu0 %vm3048_vm0, %v4556_v41  ;;  %6647 = vmatmul.mubr.msk.f32.gmra.mxu1 %vm3048_vm0, %v4556_v41 }
 0x536   : > { %v4557_v33 = vmul.f32 %v6931_v35, %v8747_v27 }
 0x537   : > { %v6933_v18 = vpop.eup %6932 }
 0x538   : > { %6621 = vmatprep.mubr.msk.f32.mxu0 %vm3048_vm0, %v4557_v33  ;;  %6649 = vmatprep.mubr.msk.f32.mxu1 %vm3048_vm0, %v4557_v33  ;;  %v4560_v53 = vmul.f32 %v6933_v18, %v8752_v34  ;;  %v8815_v34 = vld [vmem:[#allocation2] ss:$0 sm:$0xff] }
 0x539   : > { %v6935_v13 = vpop.eup %6934  ;;  %6622 = vmatmul.mubr.msk.f32.gmra.mxu0 %vm3048_vm0, %v4558_v23  ;;  %6650 = vmatmul.mubr.msk.f32.gmra.mxu1 %vm3048_vm0, %v4558_v23 }
 0x53a   : > { %v4559_v11 = vmul.f32 %v6935_v13, %v8756_v19  ;;  %v8817_v19 = vld [vmem:[#allocation3] ss:$0 sm:$0xff] }
 0x53b   : > { %v6937_v3 = vpop.eup %6936 }
 0x53c   : > { %6624 = vmatprep.mubr.msk.f32.mxu0 %vm3048_vm0, %v4559_v11  ;;  %6652 = vmatprep.mubr.msk.f32.mxu1 %vm3048_vm0, %v4559_v11  ;;  %v4562_v6 = vmul.f32 %v6937_v3, %v8759_v36 }
 0x53d   : > { %v6939_v17 = vpop.eup %6938  ;;  %6625 = vmatmul.mubr.msk.f32.gmra.mxu0 %vm3048_vm0, %v4560_v53  ;;  %6653 = vmatmul.mubr.msk.f32.gmra.mxu1 %vm3048_vm0, %v4560_v53 }
 0x53e   : > { %v4561_v27 = vmul.f32 %v6939_v17, %v8764_v61 }
 0x540   : > { %6627 = vmatprep.mubr.msk.f32.mxu0 %vm3048_vm0, %v4561_v27  ;;  %6655 = vmatprep.mubr.msk.f32.mxu1 %vm3048_vm0, %v4561_v27 }
 0x541   : > { %6628 = vmatmul.mubr.msk.f32.gmra.mxu0 %vm3048_vm0, %v4562_v6  ;;  %6656 = vmatmul.mubr.msk.f32.gmra.mxu1 %vm3048_vm0, %v4562_v6 }
 0x5e4   : > { %v6608_v36 = vpop.f32.mrf.mxu0  ;;  %v6636_v61 = vpop.f32.mrf.mxu1 }
 0x5e5   : > { %v4689_v20 = vadd.f32 %v6608_v36, %v8815_v34  ;;  %v4840_v0 = vadd.f32 %v6636_v61, %v8817_v19 }
 0x5e6   : > { %v4683_v63 = vpop.f32.mrf.mxu0  ;;  %v4834_v28 = vpop.f32.mrf.mxu1 }
 0x5e7   : > { %4963 = vst.msk [vmem:[%s8824_s24 + $0x8] sm:$0xff] %vm4961_vm5, %v4689_v20  ;;  %v4914_v8 = vmul.f32 %v8345_v54, %v4840_v0  ;;  %v4930_v22 = vmul.f32 %v8622_v62, %v4840_v0  ;;  %v4946_v2 = vmul.f32 %v8654_v46, %v4840_v0  ;;  %v4684_v31 = vadd.f32 %v8815_v34, %v4683_v63 }
 0x5e8   : > { %v4835_v9 = vadd.f32 %v8817_v19, %v4834_v28  ;;  %v6611_v16 = vpop.f32.mrf.mxu0  ;;  %v6639_v15 = vpop.f32.mrf.mxu1 }
 0x5e9   : > { %4979 = vst.msk [vmem:[%s8836_s0 + $0x8] sm:$0xff] %vm4961_vm5, %v4914_v8  ;;  %4995 = vst.msk [vmem:[%s8836_s0 + $0x88] sm:$0xff] %vm4961_vm5, %v4930_v22  ;;  %v4699_v54 = vadd.f32 %v6611_v16, %v8815_v34  ;;  %v4850_v62 = vadd.f32 %v6639_v15, %v8817_v19 }
 0x5ea   : > { %5011 = vst.msk [vmem:[%s8836_s0 + $0x108] sm:$0xff] %vm4961_vm5, %v4946_v2  ;;  %4962 = vst.msk [vmem:[%s8824_s24] sm:$0xff] %vm4961_vm5, %v4684_v31  ;;  %v4913_v46 = vmul.f32 %v4835_v9, %v8372_v14  ;;  %v4929_v25 = vmul.f32 %v4835_v9, %v8624_v47  ;;  %v4945_v21 = vmul.f32 %v4835_v9, %v8656_v12  ;;  %v4693_v58 = vpop.f32.mrf.mxu0  ;;  %v4844_v32 = vpop.f32.mrf.mxu1 }
 0x5eb   : > { %4965 = vst.msk [vmem:[%s8824_s24 + $0x18] sm:$0xff] %vm4961_vm5, %v4699_v54  ;;  %v4916_v41 = vmul.f32 %v8380_v44, %v4850_v62  ;;  %v4932_v50 = vmul.f32 %v8626_v42, %v4850_v62  ;;  %v4948_v35 = vmul.f32 %v8658_v51, %v4850_v62  ;;  %v4694_v14 = vadd.f32 %v8815_v34, %v4693_v58 }
 0x5ec   : > { %4978 = vst.msk [vmem:[%s8836_s0] sm:$0xff] %vm4961_vm5, %v4913_v46  ;;  %4994 = vst.msk [vmem:[%s8836_s0 + $0x80] sm:$0xff] %vm4961_vm5, %v4929_v25  ;;  %v4845_v47 = vadd.f32 %v8817_v19, %v4844_v32  ;;  %v6614_v12 = vpop.f32.mrf.mxu0  ;;  %v6642_v33 = vpop.f32.mrf.mxu1 }
 0x5ed   : > { %5010 = vst.msk [vmem:[%s8836_s0 + $0x100] sm:$0xff] %vm4961_vm5, %v4945_v21  ;;  %4981 = vst.msk [vmem:[%s8836_s0 + $0x18] sm:$0xff] %vm4961_vm5, %v4916_v41  ;;  %v4709_v44 = vadd.f32 %v6614_v12, %v8815_v34  ;;  %v4860_v42 = vadd.f32 %v6642_v33, %v8817_v19  ;;  %v9244_v41 = vld [vmem:[#allocation16_spill] sm:$0xff]  ;;  %v9246_v33 = vld [vmem:[#allocation13_spill] sm:$0xff] }
 0x5ee   : > { %4997 = vst.msk [vmem:[%s8836_s0 + $0x98] sm:$0xff] %vm4961_vm5, %v4932_v50  ;;  %5013 = vst.msk [vmem:[%s8836_s0 + $0x118] sm:$0xff] %vm4961_vm5, %v4948_v35  ;;  %v4915_v51 = vmul.f32 %v4845_v47, %v8398_v10  ;;  %v4931_v23 = vmul.f32 %v4845_v47, %v8628_v56  ;;  %v4947_v18 = vmul.f32 %v4845_v47, %v8663_v39  ;;  %v4703_v13 = vpop.f32.mrf.mxu0  ;;  %v4854_v11 = vpop.f32.mrf.mxu1  ;;  %v9245_v47 = vld [vmem:[#allocation7_spill] sm:$0xff] }
 0x5ef   : > { %4964 = vst.msk [vmem:[%s8824_s24 + $0x10] sm:$0xff] %vm4961_vm5, %v4694_v14  ;;  %4967 = vst.msk [vmem:[%s8824_s24 + $0x28] sm:$0xff] %vm4961_vm5, %v4709_v44  ;;  %v4918_v53 = vmul.f32 %v8413_v52, %v4860_v42  ;;  %v4934_v3 = vmul.f32 %v8630_v49, %v4860_v42  ;;  %v4950_v17 = vmul.f32 %v8668_v5, %v4860_v42  ;;  %v9247_v42 = vld [vmem:[#allocation19_spill] sm:$0xff] }
 0x5f0   : > { %v4704_v10 = vadd.f32 %v8815_v34, %v4703_v13  ;;  %4980 = vst.msk [vmem:[%s8836_s0 + $0x10] sm:$0xff] %vm4961_vm5, %v4915_v51  ;;  %4996 = vst.msk [vmem:[%s8836_s0 + $0x90] sm:$0xff] %vm4961_vm5, %v4931_v23  ;;  %v4855_v56 = vadd.f32 %v8817_v19, %v4854_v11  ;;  %v6617_v39 = vpop.f32.mrf.mxu0  ;;  %v6645_v27 = vpop.f32.mrf.mxu1 }
 0x5f1   : > { %5012 = vst.msk [vmem:[%s8836_s0 + $0x110] sm:$0xff] %vm4961_vm5, %v4947_v18  ;;  %4983 = vst.msk [vmem:[%s8836_s0 + $0x28] sm:$0xff] %vm4961_vm5, %v4918_v53  ;;  %v4719_v52 = vadd.f32 %v6617_v39, %v8815_v34  ;;  %v4870_v49 = vadd.f32 %v6645_v27, %v8817_v19  ;;  %v9248_v53 = vld [vmem:[#allocation9_spill] sm:$0xff] }
 0x5f2   : > { %4999 = vst.msk [vmem:[%s8836_s0 + $0xa8] sm:$0xff] %vm4961_vm5, %v4934_v3  ;;  %5015 = vst.msk [vmem:[%s8836_s0 + $0x128] sm:$0xff] %vm4961_vm5, %v4950_v17  ;;  %v4917_v5 = vmul.f32 %v4855_v56, %v8441_v30  ;;  %v4933_v6 = vmul.f32 %v4855_v56, %v8632_v29  ;;  %v4949_v36 = vmul.f32 %v4855_v56, %v8676_v7  ;;  %v4713_v61 = vpop.f32.mrf.mxu0  ;;  %v4864_v20 = vpop.f32.mrf.mxu1  ;;  %v9249_v17 = vld [vmem:[#allocation12_spill] sm:$0xff]  ;;  %v9250_v56 = vld [vmem:[#allocation18_spill] sm:$0xff] }
 0x5f3   : > { %4966 = vst.msk [vmem:[%s8824_s24 + $0x20] sm:$0xff] %vm4961_vm5, %v4704_v10  ;;  %4969 = vst.msk [vmem:[%s8824_s24 + $0x38] sm:$0xff] %vm4961_vm5, %v4719_v52  ;;  %v4920_v0 = vmul.f32 %v8459_v48, %v4870_v49  ;;  %v4936_v63 = vmul.f32 %v8634_v24, %v4870_v49  ;;  %v4952_v28 = vmul.f32 %v8678_v26, %v4870_v49  ;;  %v9251_v49 = vld [vmem:[#allocation8_spill] sm:$0xff] }
 0x5f4   : > { %v4714_v8 = vadd.f32 %v8815_v34, %v4713_v61  ;;  %4982 = vst.msk [vmem:[%s8836_s0 + $0x20] sm:$0xff] %vm4961_vm5, %v4917_v5  ;;  %4998 = vst.msk [vmem:[%s8836_s0 + $0xa0] sm:$0xff] %vm4961_vm5, %v4933_v6  ;;  %v4865_v30 = vadd.f32 %v8817_v19, %v4864_v20  ;;  %v9252_v6 = vld [vmem:[#allocation15_spill] sm:$0xff]  ;;  %v9253_v61 = vld [vmem:[#allocation21_spill] sm:$0xff] }
 0x5f5   : > { %5014 = vst.msk [vmem:[%s8836_s0 + $0x120] sm:$0xff] %vm4961_vm5, %v4949_v36  ;;  %4985 = vst.msk [vmem:[%s8836_s0 + $0x38] sm:$0xff] %vm4961_vm5, %v4920_v0  ;;  %v6620_v48 = vpop.f32.mrf.mxu0  ;;  %v6648_v29 = vpop.f32.mrf.mxu1 }
 0x5f6   : > { %5001 = vst.msk [vmem:[%s8836_s0 + $0xb8] sm:$0xff] %vm4961_vm5, %v4936_v63  ;;  %5017 = vst.msk [vmem:[%s8836_s0 + $0x138] sm:$0xff] %vm4961_vm5, %v4952_v28  ;;  %v4919_v24 = vmul.f32 %v4865_v30, %v8482_v59  ;;  %v4935_v7 = vmul.f32 %v4865_v30, %v8636_v40  ;;  %v4951_v26 = vmul.f32 %v4865_v30, %v8680_v45 }
 0x5f7   : > { %4968 = vst.msk [vmem:[%s8824_s24 + $0x30] sm:$0xff] %vm4961_vm5, %v4714_v8  ;;  %v4729_v22 = vadd.f32 %v6620_v48, %v8815_v34  ;;  %v4880_v2 = vadd.f32 %v6648_v29, %v8817_v19  ;;  %v4723_v31 = vpop.f32.mrf.mxu0  ;;  %v4874_v9 = vpop.f32.mrf.mxu1  ;;  %v9254_v29 = vld [vmem:[#allocation11_spill] sm:$0xff] }
 0x5f8   : > { %4984 = vst.msk [vmem:[%s8836_s0 + $0x30] sm:$0xff] %vm4961_vm5, %v4919_v24  ;;  %5000 = vst.msk [vmem:[%s8836_s0 + $0xb0] sm:$0xff] %vm4961_vm5, %v4935_v7  ;;  %v4724_v59 = vadd.f32 %v8815_v34, %v4723_v31  ;;  %v4875_v40 = vadd.f32 %v8817_v19, %v4874_v9  ;;  %v9255_v7 = vld [vmem:[#allocation14_spill] sm:$0xff] }
 0x5f9   : > { %5016 = vst.msk [vmem:[%s8836_s0 + $0x130] sm:$0xff] %vm4961_vm5, %v4951_v26  ;;  %4971 = vst.msk [vmem:[%s8824_s24 + $0x48] sm:$0xff] %vm4961_vm5, %v4729_v22  ;;  %v4922_v45 = vmul.f32 %v8510_v43, %v4880_v2  ;;  %v4938_v16 = vmul.f32 %v8638_v55, %v4880_v2  ;;  %v4954_v15 = vmul.f32 %v8682_v4, %v4880_v2  ;;  %v6623_v54 = vpop.f32.mrf.mxu0  ;;  %v6651_v62 = vpop.f32.mrf.mxu1  ;;  %v9256_v22 = vld [vmem:[#allocation20_spill] sm:$0xff]  ;;  %v9257_v31 = vld [vmem:[#allocation10_spill] sm:$0xff] }
 0x5fa   : > { %4970 = vst.msk [vmem:[%s8824_s24 + $0x40] sm:$0xff] %vm4961_vm5, %v4724_v59  ;;  %v4921_v46 = vmul.f32 %v4875_v40, %v8538_v60  ;;  %v4937_v25 = vmul.f32 %v4875_v40, %v8640_v37  ;;  %v4953_v21 = vmul.f32 %v4875_v40, %v8684_v57  ;;  %v4739_v43 = vadd.f32 %v6623_v54, %v8815_v34  ;;  %v9258_v59 = vld [vmem:[#allocation17_spill] sm:$0xff]  ;;  %v5173_v54 = vld [vmem:[%s8836_s0 + $0x18] sm:$0xff] (%p7111_p5) }
 0x5fb   : > { %4987 = vst.msk [vmem:[%s8836_s0 + $0x48] sm:$0xff] %vm4961_vm5, %v4922_v45  ;;  %5003 = vst.msk [vmem:[%s8836_s0 + $0xc8] sm:$0xff] %vm4961_vm5, %v4938_v16  ;;  %v4890_v55 = vadd.f32 %v6651_v62, %v8817_v19  ;;  %v4733_v4 = vpop.f32.mrf.mxu0  ;;  %v4884_v58 = vpop.f32.mrf.mxu1  ;;  %v9259_v45 = vld [vmem:[#allocation23_spill] sm:$0xff] }
 0x5fc   : > { %5019 = vst.msk [vmem:[%s8836_s0 + $0x148] sm:$0xff] %vm4961_vm5, %v4954_v15  ;;  %4986 = vst.msk [vmem:[%s8836_s0 + $0x40] sm:$0xff] %vm4961_vm5, %v4921_v46  ;;  %v4734_v60 = vadd.f32 %v8815_v34, %v4733_v4  ;;  %v4885_v37 = vadd.f32 %v8817_v19, %v4884_v58  ;;  %v5171_v15 = vld [vmem:[%s8836_s0 + $0x10] sm:$0xff] (%p7111_p5)  ;;  %v5175_v62 = vld [vmem:[%s8836_s0 + $0x20] sm:$0xff] (%p7111_p5) }
 0x5fd   : > { %5002 = vst.msk [vmem:[%s8836_s0 + $0xc0] sm:$0xff] %vm4961_vm5, %v4937_v25  ;;  %5018 = vst.msk [vmem:[%s8836_s0 + $0x140] sm:$0xff] %vm4961_vm5, %v4953_v21  ;;  %v4924_v57 = vmul.f32 %v8560_v38, %v4890_v55  ;;  %v4940_v32 = vmul.f32 %v8642_v1, %v4890_v55  ;;  %v4956_v50 = vmul.f32 %v9244_v41, %v4890_v55  ;;  %v6626_v35 = vpop.f32.mrf.mxu0  ;;  %v6654_v14 = vpop.f32.mrf.mxu1  ;;  %v5177_v46 = vld [vmem:[%s8836_s0 + $0x28] sm:$0xff] (%p7111_p5)  ;;  %v5181_v21 = vld [vmem:[%s8836_s0 + $0x38] sm:$0xff] (%p7111_p5) }
 0x5fe   : > { %4973 = vst.msk [vmem:[%s8824_s24 + $0x58] sm:$0xff] %vm4961_vm5, %v4739_v43  ;;  %4972 = vst.msk [vmem:[%s8824_s24 + $0x50] sm:$0xff] %vm4961_vm5, %v4734_v60  ;;  %v4923_v12 = vmul.f32 %v4885_v37, %v9245_v47  ;;  %v4939_v44 = vmul.f32 %v4885_v37, %v9246_v33  ;;  %v4955_v51 = vmul.f32 %v4885_v37, %v9247_v42  ;;  %v5199_v41 = vld [vmem:[%s8836_s0 + $0x80] sm:$0xff] (%p7111_p5) }
 0x5ff   : > { %v4749_v38 = vadd.f32 %v6626_v35, %v8815_v34  ;;  %4989 = vst.msk [vmem:[%s8836_s0 + $0x58] sm:$0xff] %vm4961_vm5, %v4924_v57  ;;  %5005 = vst.msk [vmem:[%s8836_s0 + $0xd8] sm:$0xff] %vm4961_vm5, %v4940_v32  ;;  %v4900_v1 = vadd.f32 %v6654_v14, %v8817_v19  ;;  %v4743_v23 = vpop.f32.mrf.mxu0  ;;  %v4894_v18 = vpop.f32.mrf.mxu1  ;;  %v5179_v25 = vld [vmem:[%s8836_s0 + $0x30] sm:$0xff] (%p7111_p5)  ;;  %v5205_v14 = vld [vmem:[%s8836_s0 + $0x98] sm:$0xff] (%p7111_p5) }
 0x600   : > { %5021 = vst.msk [vmem:[%s8836_s0 + $0x158] sm:$0xff] %vm4961_vm5, %v4956_v50  ;;  %4988 = vst.msk [vmem:[%s8836_s0 + $0x50] sm:$0xff] %vm4961_vm5, %v4923_v12  ;;  %v4744_v13 = vadd.f32 %v8815_v34, %v4743_v23  ;;  %v4895_v11 = vadd.f32 %v8817_v19, %v4894_v18  ;;  %v5201_v50 = vld [vmem:[%s8836_s0 + $0x88] sm:$0xff] (%p7111_p5)  ;;  %v5203_v35 = vld [vmem:[%s8836_s0 + $0x90] sm:$0xff] (%p7111_p5) }
 0x601   : > { %5004 = vst.msk [vmem:[%s8836_s0 + $0xd0] sm:$0xff] %vm4961_vm5, %v4939_v44  ;;  %5020 = vst.msk [vmem:[%s8836_s0 + $0x150] sm:$0xff] %vm4961_vm5, %v4955_v51  ;;  %v4926_v3 = vmul.f32 %v9248_v53, %v4900_v1  ;;  %v4942_v10 = vmul.f32 %v9249_v17, %v4900_v1  ;;  %v4958_v39 = vmul.f32 %v9250_v56, %v4900_v1  ;;  %v6629_v27 = vpop.f32.mrf.mxu0  ;;  %v6657_v52 = vpop.f32.mrf.mxu1  ;;  %v5207_v47 = vld [vmem:[%s8836_s0 + $0xa0] sm:$0xff] (%p7111_p5)  ;;  %v5209_v12 = vld [vmem:[%s8836_s0 + $0xa8] sm:$0xff] (%p7111_p5) }
 0x602   : > { %4975 = vst.msk [vmem:[%s8824_s24 + $0x68] sm:$0xff] %vm4961_vm5, %v4749_v38  ;;  %4974 = vst.msk [vmem:[%s8824_s24 + $0x60] sm:$0xff] %vm4961_vm5, %v4744_v13  ;;  %v4925_v5 = vmul.f32 %v4895_v11, %v9251_v49  ;;  %v4941_v36 = vmul.f32 %v4895_v11, %v9252_v6  ;;  %v4957_v20 = vmul.f32 %v4895_v11, %v9253_v61  ;;  %v5185_v55 = vld [vmem:[%s8836_s0 + $0x48] sm:$0xff] (%p7111_p5)  ;;  %v5211_v33 = vld [vmem:[%s8836_s0 + $0xb0] sm:$0xff] (%p7111_p5) }
 0x603   : > { %v4759_v0 = vadd.f32 %v6629_v27, %v8815_v34  ;;  %4991 = vst.msk [vmem:[%s8836_s0 + $0x68] sm:$0xff] %vm4961_vm5, %v4926_v3  ;;  %5007 = vst.msk [vmem:[%s8836_s0 + $0xe8] sm:$0xff] %vm4961_vm5, %v4942_v10  ;;  %v4910_v63 = vadd.f32 %v6657_v52, %v8817_v19  ;;  %v4753_v28 = vpop.f32.mrf.mxu0  ;;  %v4904_v8 = vpop.f32.mrf.mxu1  ;;  %v5183_v43 = vld [vmem:[%s8836_s0 + $0x40] sm:$0xff] (%p7111_p5)  ;;  %v5213_v44 = vld [vmem:[%s8836_s0 + $0xb8] sm:$0xff] (%p7111_p5) }
 0x604   : > { %5023 = vst.msk [vmem:[%s8836_s0 + $0x168] sm:$0xff] %vm4961_vm5, %v4958_v39  ;;  %4990 = vst.msk [vmem:[%s8836_s0 + $0x60] sm:$0xff] %vm4961_vm5, %v4925_v5  ;;  %v4754_v30 = vadd.f32 %v8815_v34, %v4753_v28  ;;  %v4905_v48 = vadd.f32 %v8817_v19, %v4904_v8  ;;  %v5167_v34 = vld [vmem:[%s8836_s0] sm:$0xff] (%p7111_p5)  ;;  %v5169_v19 = vld [vmem:[%s8836_s0 + $0x8] sm:$0xff] (%p7111_p5) }
 0x605   : > { %5006 = vst.msk [vmem:[%s8836_s0 + $0xe0] sm:$0xff] %vm4961_vm5, %v4941_v36  ;;  %5022 = vst.msk [vmem:[%s8836_s0 + $0x160] sm:$0xff] %vm4961_vm5, %v4957_v20  ;;  %v4928_v24 = vmul.f32 %v9254_v29, %v4910_v63  ;;  %v4944_v26 = vmul.f32 %v9255_v7, %v4910_v63  ;;  %v4960_v2 = vmul.f32 %v9256_v22, %v4910_v63  ;;  %5041 = sbr.rel (!%p7111_p5) target bundleno = 1570 (0x622), region = 146  ;;  %v5215_v42 = vld [vmem:[%s8836_s0 + $0xc0] sm:$0xff] (%p7111_p5)  ;;  %v5217_v51 = vld [vmem:[%s8836_s0 + $0xc8] sm:$0xff] (%p7111_p5) }
 0x606   : > { %4977 = vst.msk [vmem:[%s8824_s24 + $0x78] sm:$0xff] %vm4961_vm5, %v4759_v0  ;;  %4976 = vst.msk [vmem:[%s8824_s24 + $0x70] sm:$0xff] %vm4961_vm5, %v4754_v30  ;;  %v4927_v9 = vmul.f32 %v4905_v48, %v9257_v31  ;;  %v4943_v40 = vmul.f32 %v4905_v48, %v9258_v59  ;;  %v4959_v16 = vmul.f32 %v4905_v48, %v9259_v45  ;;  %v5189_v58 = vld [vmem:[%s8836_s0 + $0x58] sm:$0xff] (%p7111_p5)  ;;  %v5231_v53 = vld [vmem:[%s8836_s0 + $0x100] sm:$0xff] (%p7111_p5) }
 0x607   : > { %4993 = vst.msk [vmem:[%s8836_s0 + $0x78] sm:$0xff] %vm4961_vm5, %v4928_v24  ;;  %5009 = vst.msk [vmem:[%s8836_s0 + $0xf8] sm:$0xff] %vm4961_vm5, %v4944_v26  ;;  %v5187_v4 = vld [vmem:[%s8836_s0 + $0x50] sm:$0xff] (%p7111_p5)  ;;  %v5221_v1 = vld [vmem:[%s8836_s0 + $0xd8] sm:$0xff] (%p7111_p5) }
 0x608   : > { %5025 = vst.msk [vmem:[%s8836_s0 + $0x178] sm:$0xff] %vm4961_vm5, %v4960_v2  ;;  %4992 = vst.msk [vmem:[%s8836_s0 + $0x70] sm:$0xff] %vm4961_vm5, %v4927_v9  ;;  %v5219_v38 = vld [vmem:[%s8836_s0 + $0xd0] sm:$0xff] (%p7111_p5)  ;;  %v5233_v3 = vld [vmem:[%s8836_s0 + $0x108] sm:$0xff] (%p7111_p5) }
 0x609   : > { %5008 = vst.msk [vmem:[%s8836_s0 + $0xf0] sm:$0xff] %vm4961_vm5, %v4943_v40  ;;  %5024 = vst.msk [vmem:[%s8836_s0 + $0x170] sm:$0xff] %vm4961_vm5, %v4959_v16  ;;  %v5235_v17 = vld [vmem:[%s8836_s0 + $0x110] sm:$0xff] (%p7111_p5)  ;;  %v5237_v10 = vld [vmem:[%s8836_s0 + $0x118] sm:$0xff] (%p7111_p5) }
 0x60a   : > { %5168 = vst [vmem:[%s9046_s3] sm:$0xff] %v5167_v34  ;;  %5170 = vst [vmem:[%s9046_s3 + $0x8] sm:$0xff] %v5169_v19  ;;  %v5193_v37 = vld [vmem:[%s8836_s0 + $0x68] sm:$0xff]  ;;  %v5239_v56 = vld [vmem:[%s8836_s0 + $0x120] sm:$0xff] }
 0x60b   : > { %5172 = vst [vmem:[%s9046_s3 + $0x10] sm:$0xff] %v5171_v15  ;;  %5174 = vst [vmem:[%s9046_s3 + $0x18] sm:$0xff] %v5173_v54  ;;  %v5191_v60 = vld [vmem:[%s8836_s0 + $0x60] sm:$0xff]  ;;  %v5225_v18 = vld [vmem:[%s8836_s0 + $0xe8] sm:$0xff] }
 0x60c   : > { %5176 = vst [vmem:[%s9046_s3 + $0x20] sm:$0xff] %v5175_v62  ;;  %5178 = vst [vmem:[%s9046_s3 + $0x28] sm:$0xff] %v5177_v46  ;;  %v5223_v23 = vld [vmem:[%s8836_s0 + $0xe0] sm:$0xff]  ;;  %v5241_v39 = vld [vmem:[%s8836_s0 + $0x128] sm:$0xff] }
 0x60d   : > { %5180 = vst [vmem:[%s9046_s3 + $0x30] sm:$0xff] %v5179_v25  ;;  %5182 = vst [vmem:[%s9046_s3 + $0x38] sm:$0xff] %v5181_v21  ;;  %v5243_v27 = vld [vmem:[%s8836_s0 + $0x130] sm:$0xff]  ;;  %v5245_v52 = vld [vmem:[%s8836_s0 + $0x138] sm:$0xff] }
 0x60e   : > { %5184 = vst [vmem:[%s9046_s3 + $0x40] sm:$0xff] %v5183_v43  ;;  %5186 = vst [vmem:[%s9046_s3 + $0x48] sm:$0xff] %v5185_v55  ;;  %v5197_v32 = vld [vmem:[%s8836_s0 + $0x78] sm:$0xff]  ;;  %v5247_v49 = vld [vmem:[%s8836_s0 + $0x140] sm:$0xff] }
 0x60f   : > { %5188 = vst [vmem:[%s9046_s3 + $0x50] sm:$0xff] %v5187_v4  ;;  %5190 = vst [vmem:[%s9046_s3 + $0x58] sm:$0xff] %v5189_v58  ;;  %v5195_v57 = vld [vmem:[%s8836_s0 + $0x70] sm:$0xff]  ;;  %v5229_v11 = vld [vmem:[%s8836_s0 + $0xf8] sm:$0xff] }
 0x610   : > { %5192 = vst [vmem:[%s9046_s3 + $0x60] sm:$0xff] %v5191_v60  ;;  %5194 = vst [vmem:[%s9046_s3 + $0x68] sm:$0xff] %v5193_v37  ;;  %v5227_v13 = vld [vmem:[%s8836_s0 + $0xf0] sm:$0xff]  ;;  %v5249_v5 = vld [vmem:[%s8836_s0 + $0x148] sm:$0xff] }
 0x611   : > { %5196 = vst [vmem:[%s9046_s3 + $0x70] sm:$0xff] %v5195_v57  ;;  %5198 = vst [vmem:[%s9046_s3 + $0x78] sm:$0xff] %v5197_v32  ;;  %v5251_v6 = vld [vmem:[%s8836_s0 + $0x150] sm:$0xff]  ;;  %v5253_v36 = vld [vmem:[%s8836_s0 + $0x158] sm:$0xff] }
 0x612   : > { %5200 = vst [vmem:[%s9046_s3 + $0x100] sm:$0xff] %v5199_v41  ;;  %5202 = vst [vmem:[%s9046_s3 + $0x108] sm:$0xff] %v5201_v50  ;;  %v5255_v61 = vld [vmem:[%s8836_s0 + $0x160] sm:$0xff]  ;;  %v5257_v20 = vld [vmem:[%s8836_s0 + $0x168] sm:$0xff] }
 0x613   : > { %5204 = vst [vmem:[%s9046_s3 + $0x110] sm:$0xff] %v5203_v35  ;;  %5206 = vst [vmem:[%s9046_s3 + $0x118] sm:$0xff] %v5205_v14  ;;  %v5259_v0 = vld [vmem:[%s8836_s0 + $0x170] sm:$0xff]  ;;  %v5261_v63 = vld [vmem:[%s8836_s0 + $0x178] sm:$0xff] }
 0x614   : > { %5208 = vst [vmem:[%s9046_s3 + $0x120] sm:$0xff] %v5207_v47  ;;  %5210 = vst [vmem:[%s9046_s3 + $0x128] sm:$0xff] %v5209_v12 }
 0x615   : > { %5212 = vst [vmem:[%s9046_s3 + $0x130] sm:$0xff] %v5211_v33  ;;  %5214 = vst [vmem:[%s9046_s3 + $0x138] sm:$0xff] %v5213_v44 }
 0x616   : > { %5216 = vst [vmem:[%s9046_s3 + $0x140] sm:$0xff] %v5215_v42  ;;  %5218 = vst [vmem:[%s9046_s3 + $0x148] sm:$0xff] %v5217_v51 }
 0x617   : > { %5220 = vst [vmem:[%s9046_s3 + $0x150] sm:$0xff] %v5219_v38  ;;  %5222 = vst [vmem:[%s9046_s3 + $0x158] sm:$0xff] %v5221_v1 }
 0x618   : > { %5224 = vst [vmem:[%s9046_s3 + $0x160] sm:$0xff] %v5223_v23  ;;  %5226 = vst [vmem:[%s9046_s3 + $0x168] sm:$0xff] %v5225_v18 }
 0x619   : > { %5228 = vst [vmem:[%s9046_s3 + $0x170] sm:$0xff] %v5227_v13  ;;  %5230 = vst [vmem:[%s9046_s3 + $0x178] sm:$0xff] %v5229_v11 }
 0x61a   : > { %5232 = vst [vmem:[%s9046_s3 + $0x200] sm:$0xff] %v5231_v53  ;;  %5234 = vst [vmem:[%s9046_s3 + $0x208] sm:$0xff] %v5233_v3 }
 0x61b   : > { %5236 = vst [vmem:[%s9046_s3 + $0x210] sm:$0xff] %v5235_v17  ;;  %5238 = vst [vmem:[%s9046_s3 + $0x218] sm:$0xff] %v5237_v10 }
 0x61c   : > { %5240 = vst [vmem:[%s9046_s3 + $0x220] sm:$0xff] %v5239_v56  ;;  %5242 = vst [vmem:[%s9046_s3 + $0x228] sm:$0xff] %v5241_v39 }
 0x61d   : > { %5244 = vst [vmem:[%s9046_s3 + $0x230] sm:$0xff] %v5243_v27  ;;  %5246 = vst [vmem:[%s9046_s3 + $0x238] sm:$0xff] %v5245_v52 }
 0x61e   : > { %5248 = vst [vmem:[%s9046_s3 + $0x240] sm:$0xff] %v5247_v49  ;;  %5250 = vst [vmem:[%s9046_s3 + $0x248] sm:$0xff] %v5249_v5 }
 0x61f   : > { %5252 = vst [vmem:[%s9046_s3 + $0x250] sm:$0xff] %v5251_v6  ;;  %5254 = vst [vmem:[%s9046_s3 + $0x258] sm:$0xff] %v5253_v36 }
 0x620   : > { %5256 = vst [vmem:[%s9046_s3 + $0x260] sm:$0xff] %v5255_v61  ;;  %5258 = vst [vmem:[%s9046_s3 + $0x268] sm:$0xff] %v5257_v20 }
 0x621   : > { %5260 = vst [vmem:[%s9046_s3 + $0x270] sm:$0xff] %v5259_v0  ;;  %5262 = vst [vmem:[%s9046_s3 + $0x278] sm:$0xff] %v5261_v63 }
 0x622 PF: > { %s9260_s18 = sld [smem:[#allocation6_spill]]  ;;  %p33_p11 = scmp.ge.s32.totalorder %s7099_s19, 4  }
 0x623   : > { %s9261_s3 = smov %s6958_s28  ;;  %s9263_s29 = smov %s7099_s19 }
 0x624   :  { %35 = sbr.rel (!%p33_p11) target bundleno = 9 (0x9), region = 226 }
 0x628   : > { %s9262_s28 = smov %s9260_s18 }

</bundles_post_ra>
